<compile_context>
chip_gen: v7x
topology: tpu7x:2x2x1
jax: 0.10.0
libtpu: 0.0.40
codegen_flags: <defaults>
</compile_context>

<pallas_src>
import functools

import jax
import jax.numpy as jnp
from jax import lax
from jax.experimental import pallas as pl
from jax.experimental.pallas import tpu as pltpu


# ----------------------------------------------------------------------------
# small helpers
# ----------------------------------------------------------------------------
def _round_up(x, m):
    return (x + m - 1) // m * m


def _largest_divisor_leq(n, cap):
    for d in range(min(n, cap), 0, -1):
        if n % d == 0:
            return d
    return 1


# ----------------------------------------------------------------------------
# Kernel 1: time-parallel input projection for LSTM layer 1.
#   gates_x[t] = x[t] @ W_ih1^T + (b_ih1 + b_hh1)     (all timesteps at once)
# ----------------------------------------------------------------------------
def _in_proj_kernel(x_ref, w_ref, b_ref, o_ref):
    tt, bp, hin = x_ref.shape
    x2 = x_ref[...].reshape(tt * bp, hin)                      # big-M MXU matmul
    y = jnp.dot(x2, w_ref[...], preferred_element_type=jnp.float32)
    y = y + b_ref[...]                                         # bias folded here
    o_ref[...] = y.reshape(o_ref.shape)


def input_projection(x_tbh, w_ih_t, bias, time_block):
    """x_tbh: (T, Bp, Hp) bf16, w_ih_t: (Hp, 4Hp) bf16, bias: (1, 4Hp) f32."""
    T, Bp, Hinp = x_tbh.shape
    G4 = w_ih_t.shape[1]
    return pl.pallas_call(
        _in_proj_kernel,
        out_shape=jax.ShapeDtypeStruct((T, Bp, G4), jnp.float32),
        grid_spec=pltpu.PrefetchScalarGridSpec(
            num_scalar_prefetch=0,
            grid=(T // time_block,),
            in_specs=[
                pl.BlockSpec((time_block, Bp, Hinp), lambda t: (t, 0, 0)),
                pl.BlockSpec((Hinp, G4), lambda t: (0, 0)),
                pl.BlockSpec((1, G4), lambda t: (0, 0)),
            ],
            out_specs=pl.BlockSpec((time_block, Bp, G4), lambda t: (t, 0, 0)),
        ),
        compiler_params=pltpu.CompilerParams(
            dimension_semantics=("parallel",),      # shard over both TCs on v7x
            vmem_limit_bytes=64 * 1024 * 1024,
        ),
    )(x_tbh, w_ih_t, bias)


# ----------------------------------------------------------------------------
# Kernel 2: fused 2-layer LSTM recurrence + final FC.
#   Grid over time-chunks (serial / "arbitrary"); h1,c1,h2,c2 carried in VMEM
#   scratch; only the final (Bp, Op) logits are written to HBM.
# ----------------------------------------------------------------------------
def _fused_lstm_fc_kernel(gx1_ref, whh1_ref, w2_ref, b2_ref, fcw_ref, fcb_ref,
                          out_ref, h1_ref, c1_ref, h2_ref, c2_ref):
    step = pl.program_id(0)
    TT = gx1_ref.shape[0]
    Bp, Hp = h1_ref.shape
    cdt = whh1_ref.dtype                      # matmul compute dtype (bf16)

    @pl.when(step == 0)
    def _():
        h1_ref[...] = jnp.zeros_like(h1_ref)
        c1_ref[...] = jnp.zeros_like(c1_ref)
        h2_ref[...] = jnp.zeros_like(h2_ref)
        c2_ref[...] = jnp.zeros_like(c2_ref)

    # Hoisted out of the per-timestep loop (JAX does not CSE these per-iteration).
    whh1 = whh1_ref[...]
    w2 = w2_ref[...]
    b2 = jnp.broadcast_to(b2_ref[...], (Bp, b2_ref.shape[1]))

    def lstm_cell(gates, c_prev):
        # Hp is a multiple of 128 -> lane-aligned gate slices (no relayout).
        i = jax.nn.sigmoid(gates[:, 0 * Hp:1 * Hp])
        f = jax.nn.sigmoid(gates[:, 1 * Hp:2 * Hp])
        g = jnp.tanh(gates[:, 2 * Hp:3 * Hp])
        o = jax.nn.sigmoid(gates[:, 3 * Hp:4 * Hp])
        c_new = f * c_prev + i * g
        h_new = o * jnp.tanh(c_new)
        return h_new, c_new

    def body(tt, carry):
        # Layer 1: x-projection (incl. bias) precomputed; only the serial h @ W_hh.
        g1 = gx1_ref[tt] + jnp.dot(h1_ref[...].astype(cdt), whh1,
                                   preferred_element_type=jnp.float32)
        h1, c1 = lstm_cell(g1, c1_ref[...])
        h1_ref[...] = h1
        c1_ref[...] = c1
        # Layer 2: single fused matmul [h1 | h2] @ [[W_ih2]; [W_hh2]] + b2.
        xh = jnp.concatenate([h1, h2_ref[...]], axis=1).astype(cdt)
        g2 = jnp.dot(xh, w2, preferred_element_type=jnp.float32) + b2
        h2, c2 = lstm_cell(g2, c2_ref[...])
        h2_ref[...] = h2
        c2_ref[...] = c2
        return carry

    lax.fori_loop(0, TT, body, 0, unroll=True)

    # Final step: dropout (eval mode) is identity; fuse the FC on the last hidden.
    @pl.when(step == pl.num_programs(0) - 1)
    def _():
        out_ref[...] = (
            jnp.dot(h2_ref[...].astype(cdt), fcw_ref[...],
                    preferred_element_type=jnp.float32)
            + fcb_ref[...]
        )


def fused_lstm_fc(gx1, w_hh1_t, w2_cat_t, b2, fc_w_t, fc_b, time_block):
    T, Bp, G4 = gx1.shape
    Hp = w_hh1_t.shape[0]
    Op = fc_w_t.shape[1]
    return pl.pallas_call(
        _fused_lstm_fc_kernel,
        out_shape=jax.ShapeDtypeStruct((Bp, Op), jnp.float32),
        grid_spec=pltpu.PrefetchScalarGridSpec(
            num_scalar_prefetch=0,
            grid=(T // time_block,),
            in_specs=[
                pl.BlockSpec((time_block, Bp, G4), lambda t: (t, 0, 0)),
                pl.BlockSpec((Hp, G4), lambda t: (0, 0)),
                pl.BlockSpec((2 * Hp, G4), lambda t: (0, 0)),
                pl.BlockSpec((1, G4), lambda t: (0, 0)),
                pl.BlockSpec((Hp, Op), lambda t: (0, 0)),
                pl.BlockSpec((1, Op), lambda t: (0, 0)),
            ],
            out_specs=pl.BlockSpec((Bp, Op), lambda t: (0, 0)),
            scratch_shapes=[
                pltpu.VMEM((Bp, Hp), jnp.float32),   # h1
                pltpu.VMEM((Bp, Hp), jnp.float32),   # c1
                pltpu.VMEM((Bp, Hp), jnp.float32),   # h2
                pltpu.VMEM((Bp, Hp), jnp.float32),   # c2
            ],
        ),
        compiler_params=pltpu.CompilerParams(
            dimension_semantics=("arbitrary",),     # true serial recurrence
            vmem_limit_bytes=64 * 1024 * 1024,
        ),
    )(gx1, w_hh1_t, w2_cat_t, b2, fc_w_t, fc_b)


# ----------------------------------------------------------------------------
# Parameter preparation: PyTorch-layout params -> padded / transposed / bf16.
#   Hidden padded to a multiple of 128 (per gate block), output to 128.
#   Zero-padding is exact: padded hidden units stay identically 0 through the
#   recurrence (i*g = 0, f*c = 0), so real lanes are unaffected.
# ----------------------------------------------------------------------------
def prepare_params(raw, lane=128, compute_dtype=jnp.bfloat16):
    H = raw["embedding"].shape[1]
    O = raw["fc_w"].shape[0]
    assert len(raw["lstm"]) == 2, "fused kernel implements exactly 2 LSTM layers"
    Hp = _round_up(H, lane)
    Op = _round_up(O, lane)

    def pad_gate_weight_t(w):
        # w: (4H, in_dim) PyTorch layout, gate order [i,f,g,o] along rows.
        in_dim = w.shape[1]
        w4 = w.reshape(4, H, in_dim)
        w4 = jnp.pad(w4, ((0, 0), (0, Hp - H), (0, Hp - in_dim)))
        return jnp.transpose(w4, (2, 0, 1)).reshape(Hp, 4 * Hp)   # (in_p, 4Hp)

    def pad_gate_bias(b):
        return jnp.pad(b.reshape(4, H), ((0, 0), (0, Hp - H))).reshape(1, 4 * Hp)

    l0, l1 = raw["lstm"]
    emb = jnp.pad(raw["embedding"], ((0, 0), (0, Hp - H)))

    w_ih1_t = pad_gate_weight_t(l0["w_ih"]).astype(compute_dtype)
    w_hh1_t = pad_gate_weight_t(l0["w_hh"]).astype(compute_dtype)
    b1 = pad_gate_bias(l0["b_ih"] + l0["b_hh"])

    w_ih2_t = pad_gate_weight_t(l1["w_ih"])
    w_hh2_t = pad_gate_weight_t(l1["w_hh"])
    w2_cat_t = jnp.concatenate([w_ih2_t, w_hh2_t], axis=0).astype(compute_dtype)
    b2 = pad_gate_bias(l1["b_ih"] + l1["b_hh"])

    fc_w_t = jnp.pad(raw["fc_w"], ((0, Op - O), (0, Hp - H))).T.astype(compute_dtype)
    fc_b = jnp.pad(raw["fc_b"], (0, Op - O))[None, :]

    return {
        "emb": emb, "w_ih1_t": w_ih1_t, "b1": b1, "w_hh1_t": w_hh1_t,
        "w2_cat_t": w2_cat_t, "b2": b2, "fc_w_t": fc_w_t, "fc_b": fc_b,
        "H": H, "Hp": Hp, "O": O, "Op": Op, "compute_dtype": compute_dtype,
    }


# ----------------------------------------------------------------------------
# Full model forward.
# ----------------------------------------------------------------------------
def lstm_model_forward(prepared, tokens, time_block_cap=16):
    """tokens: (B, T) int32. Returns (B, output_size) float32."""
    B, T = tokens.shape
    O = prepared["O"]
    cdt = prepared["compute_dtype"]

    Bp = _round_up(B, 8)                    # f32 sublane padding
    if Bp != B:
        tokens = jnp.pad(tokens, ((0, Bp - B), (0, 0)))

    # Embedding lookup (gather) -- glue in plain JAX.
    emb = jnp.take(prepared["emb"], tokens, axis=0)            # (Bp, T, Hp)
    x = jnp.transpose(emb, (1, 0, 2)).astype(cdt)              # time-major (T, Bp, Hp)

    TT = _largest_divisor_leq(T, time_block_cap)

    # Hoisted, time-parallel layer-1 input projection (bias folded in).
    gx1 = input_projection(x, prepared["w_ih1_t"], prepared["b1"], TT)

    # Fused serial recurrence (2 layers) + FC; only final logits hit HBM.
    # TODO(synk): inter-layer LSTM dropout and nn.Dropout are train-mode only;
    # the model is run in eval mode so they are identity here.
    out_p = fused_lstm_fc(gx1, prepared["w_hh1_t"], prepared["w2_cat_t"],
                          prepared["b2"], prepared["fc_w_t"], prepared["fc_b"], TT)

    return out_p[:B, :O]


# ----------------------------------------------------------------------------
# PyTorch-layout parameter init + pure-JAX reference (for correctness check).
# ----------------------------------------------------------------------------
def init_params(key, input_size, hidden_size, output_size, num_layers=2):
    H = hidden_size
    keys = jax.random.split(key, 2 + 4 * num_layers)
    params = {
        "embedding": jax.random.normal(keys[0], (input_size, H), jnp.float32) * 0.1
    }
    layers = []
    k = 1
    for _ in range(num_layers):
        in_dim = H
        layers.append({
            "w_ih": jax.random.normal(keys[k + 0], (4 * H, in_dim), jnp.float32) * 0.1,
            "w_hh": jax.random.normal(keys[k + 1], (4 * H, H), jnp.float32) * 0.1,
            "b_ih": jax.random.normal(keys[k + 2], (4 * H,), jnp.float32) * 0.1,
            "b_hh": jax.random.normal(keys[k + 3], (4 * H,), jnp.float32) * 0.1,
        })
        k += 4
    params["lstm"] = layers
    params["fc_w"] = jax.random.normal(keys[k], (output_size, H), jnp.float32) * 0.1
    params["fc_b"] = jnp.zeros((output_size,), jnp.float32)
    return params


def lstm_model_reference(raw, tokens):
    x = raw["embedding"][tokens]                               # (B, T, H)
    B, T, H = x.shape
    for layer in raw["lstm"]:
        h = jnp.zeros((B, H), jnp.float32)
        c = jnp.zeros((B, H), jnp.float32)
        outs = []
        for t in range(T):
            gates = (x[:, t] @ layer["w_ih"].T + h @ layer["w_hh"].T
                     + layer["b_ih"] + layer["b_hh"])
            i, f, g, o = jnp.split(gates, 4, axis=-1)
            i, f, o = jax.nn.sigmoid(i), jax.nn.sigmoid(f), jax.nn.sigmoid(o)
            g = jnp.tanh(g)
            c = f * c + i * g
            h = o * jnp.tanh(c)
            outs.append(h)
        x = jnp.stack(outs, axis=1)
    return x[:, -1] @ raw["fc_w"].T + raw["fc_b"]


if __name__ == "__main__":
    # Small deterministic config: vocab=16, hidden=32, output=10, batch=2, seq=8.
    input_size, hidden_size, output_size, num_layers = 16, 32, 10, 2
    B, T = 2, 8

    key = jax.random.PRNGKey(0)
    pkey, xkey = jax.random.split(key)
    raw = init_params(pkey, input_size, hidden_size, output_size, num_layers)
    prepared = prepare_params(raw)
    tokens = jax.random.randint(xkey, (B, T), 0, input_size, dtype=jnp.int32)

    fwd = jax.jit(functools.partial(lstm_model_forward, prepared))
    out = fwd(tokens)
    jax.block_until_ready(out)
    assert out.shape == (B, output_size), out.shape

    # Correctness against a pure-JAX f32 reference (loose tol: bf16 matmuls).
    ref = lstm_model_reference(raw, tokens)
    err = float(jnp.max(jnp.abs(out - ref)))
    assert err < 5e-2, f"max abs err {err}"

    print("KERNEL_OK")
</pallas_src>

<mosaic_0001>
module attributes {stable_mosaic.version = 11 : i64} {
  func.func @_in_proj_kernel(%arg0: i32, %arg1: memref<8x8x128xbf16, #tpu.memory_space<vmem>>, %arg2: memref<128x512xbf16, #tpu.memory_space<vmem>>, %arg3: memref<1x512xf32, #tpu.memory_space<vmem>>, %arg4: memref<8x8x512xf32, #tpu.memory_space<vmem>>) attributes {dimension_semantics = [#tpu.dimension_semantics<parallel>], iteration_bounds = array<i64: 1>, scalar_prefetch = 0 : i64, scratch_operands = 0 : i64, tpu.core_type = #tpu.core_type<tc>, window_params = [{transform_indices = @transform_0, window_bounds = array<i64: 8, 8, 128>}, {pipeline_mode = #tpu.pipeline_mode<synchronous>, transform_indices = @transform_1, window_bounds = array<i64: 128, 512>}, {pipeline_mode = #tpu.pipeline_mode<synchronous>, transform_indices = @transform_2, window_bounds = array<i64: 1, 512>}, {transform_indices = @transform_3, window_bounds = array<i64: 8, 8, 512>}]} {
    %c0 = arith.constant 0 : index
    %c0_0 = arith.constant 0 : index
    %c0_1 = arith.constant 0 : index
    %0 = vector.load %arg1[%c0, %c0_0, %c0_1] : memref<8x8x128xbf16, #tpu.memory_space<vmem>>, vector<8x8x128xbf16>
    %1 = vector.shape_cast %0 : vector<8x8x128xbf16> to vector<64x128xbf16>
    %c0_2 = arith.constant 0 : index
    %c0_3 = arith.constant 0 : index
    %2 = vector.load %arg2[%c0_2, %c0_3] : memref<128x512xbf16, #tpu.memory_space<vmem>>, vector<128x512xbf16>
    %cst = arith.constant dense<0.000000e+00> : vector<64x512xf32>
    %3 = tpu.matmul %1, %2, %cst {dimension_numbers = #tpu.dot_dimension_numbers<[1], [0], [0], [1], [0, 0, 1, 1], [], []>} : vector<64x128xbf16>, vector<128x512xbf16>, vector<64x512xf32> -> vector<64x512xf32>
    %c0_4 = arith.constant 0 : index
    %c0_5 = arith.constant 0 : index
    %4 = vector.load %arg3[%c0_4, %c0_5] : memref<1x512xf32, #tpu.memory_space<vmem>>, vector<1x512xf32>
    %5 = vector.broadcast %4 : vector<1x512xf32> to vector<64x512xf32>
    %6 = arith.addf %3, %5 : vector<64x512xf32>
    %7 = vector.shape_cast %6 : vector<64x512xf32> to vector<8x8x512xf32>
    %c0_6 = arith.constant 0 : index
    %c0_7 = arith.constant 0 : index
    %c0_8 = arith.constant 0 : index
    %8 = vector.load %arg4[%c0_6, %c0_7, %c0_8] : memref<8x8x512xf32, #tpu.memory_space<vmem>>, vector<8x8x512xf32>
    tpu.vector_store %arg4[%c0_6, %c0_7, %c0_8], %7 {strides = array<i32>} : memref<8x8x512xf32, #tpu.memory_space<vmem>>, vector<8x8x512xf32>,
    return
  }
  func.func @transform_0(%arg0: i32) -> (i32, i32, i32) {
    %c0_i32 = arith.constant 0 : i32
    %c0_i32_0 = arith.constant 0 : i32
    %c0_i32_1 = arith.constant 0 : i32
    return %arg0, %c0_i32, %c0_i32_0 : i32, i32, i32
  }
  func.func @transform_1(%arg0: i32) -> (i32, i32) {
    %c0_i32 = arith.constant 0 : i32
    %c0_i32_0 = arith.constant 0 : i32
    %c0_i32_1 = arith.constant 0 : i32
    return %c0_i32, %c0_i32_0 : i32, i32
  }
  func.func @transform_2(%arg0: i32) -> (i32, i32) {
    %c0_i32 = arith.constant 0 : i32
    %c0_i32_0 = arith.constant 0 : i32
    %c0_i32_1 = arith.constant 0 : i32
    return %c0_i32, %c0_i32_0 : i32, i32
  }
  func.func @transform_3(%arg0: i32) -> (i32, i32, i32) {
    %c0_i32 = arith.constant 0 : i32
    %c0_i32_0 = arith.constant 0 : i32
    %c0_i32_1 = arith.constant 0 : i32
    return %arg0, %c0_i32, %c0_i32_0 : i32, i32, i32
  }
}

module attributes {stable_mosaic.version = 11 : i64} {
  func.func @_fused_lstm_fc_kernel(%arg0: i32, %arg1: memref<8x8x512xf32, #tpu.memory_space<vmem>>, %arg2: memref<128x512xbf16, #tpu.memory_space<vmem>>, %arg3: memref<256x512xbf16, #tpu.memory_space<vmem>>, %arg4: memref<1x512xf32, #tpu.memory_space<vmem>>, %arg5: memref<128x128xbf16, #tpu.memory_space<vmem>>, %arg6: memref<1x128xf32, #tpu.memory_space<vmem>>, %arg7: memref<8x128xf32, #tpu.memory_space<vmem>>, %arg8: memref<8x128xf32, #tpu.memory_space<vmem>>, %arg9: memref<8x128xf32, #tpu.memory_space<vmem>>, %arg10: memref<8x128xf32, #tpu.memory_space<vmem>>, %arg11: memref<8x128xf32, #tpu.memory_space<vmem>>) attributes {dimension_semantics = [#tpu.dimension_semantics<arbitrary>], iteration_bounds = array<i64: 1>, scalar_prefetch = 0 : i64, scratch_operands = 4 : i64, tpu.core_type = #tpu.core_type<tc>, window_params = [{transform_indices = @transform_0, window_bounds = array<i64: 8, 8, 512>}, {pipeline_mode = #tpu.pipeline_mode<synchronous>, transform_indices = @transform_1, window_bounds = array<i64: 128, 512>}, {pipeline_mode = #tpu.pipeline_mode<synchronous>, transform_indices = @transform_2, window_bounds = array<i64: 256, 512>}, {pipeline_mode = #tpu.pipeline_mode<synchronous>, transform_indices = @transform_3, window_bounds = array<i64: 1, 512>}, {pipeline_mode = #tpu.pipeline_mode<synchronous>, transform_indices = @transform_4, window_bounds = array<i64: 128, 128>}, {pipeline_mode = #tpu.pipeline_mode<synchronous>, transform_indices = @transform_5, window_bounds = array<i64: 1, 128>}, {pipeline_mode = #tpu.pipeline_mode<synchronous>, transform_indices = @transform_6, window_bounds = array<i64: 8, 128>}]} {
    %c0_i32 = arith.constant 0 : i32
    %0 = arith.cmpi eq, %arg0, %c0_i32 : i32
    %1 = arith.extui %0 : i1 to i32
    %c0_i32_0 = arith.constant 0 : i32
    %2 = arith.cmpi ne, %1, %c0_i32_0 : i32
    scf.if %2 {
      %cst_216 = arith.constant 0.000000e+00 : f32
      %555 = vector.broadcast %cst_216 : f32 to vector<8x128xf32>
      %c0_217 = arith.constant 0 : index
      %c0_218 = arith.constant 0 : index
      %556 = vector.load %arg8[%c0_217, %c0_218] : memref<8x128xf32, #tpu.memory_space<vmem>>, vector<8x128xf32>
      tpu.vector_store %arg8[%c0_217, %c0_218], %555 {strides = array<i32>} : memref<8x128xf32, #tpu.memory_space<vmem>>, vector<8x128xf32>,
      %cst_219 = arith.constant 0.000000e+00 : f32
      %557 = vector.broadcast %cst_219 : f32 to vector<8x128xf32>
      %c0_220 = arith.constant 0 : index
      %c0_221 = arith.constant 0 : index
      %558 = vector.load %arg9[%c0_220, %c0_221] : memref<8x128xf32, #tpu.memory_space<vmem>>, vector<8x128xf32>
      tpu.vector_store %arg9[%c0_220, %c0_221], %557 {strides = array<i32>} : memref<8x128xf32, #tpu.memory_space<vmem>>, vector<8x128xf32>,
      %cst_222 = arith.constant 0.000000e+00 : f32
      %559 = vector.broadcast %cst_222 : f32 to vector<8x128xf32>
      %c0_223 = arith.constant 0 : index
      %c0_224 = arith.constant 0 : index
      %560 = vector.load %arg10[%c0_223, %c0_224] : memref<8x128xf32, #tpu.memory_space<vmem>>, vector<8x128xf32>
      tpu.vector_store %arg10[%c0_223, %c0_224], %559 {strides = array<i32>} : memref<8x128xf32, #tpu.memory_space<vmem>>, vector<8x128xf32>,
      %cst_225 = arith.constant 0.000000e+00 : f32
      %561 = vector.broadcast %cst_225 : f32 to vector<8x128xf32>
      %c0_226 = arith.constant 0 : index
      %c0_227 = arith.constant 0 : index
      %562 = vector.load %arg11[%c0_226, %c0_227] : memref<8x128xf32, #tpu.memory_space<vmem>>, vector<8x128xf32>
      tpu.vector_store %arg11[%c0_226, %c0_227], %561 {strides = array<i32>} : memref<8x128xf32, #tpu.memory_space<vmem>>, vector<8x128xf32>,
    } else {
    }
    %c0 = arith.constant 0 : index
    %c0_1 = arith.constant 0 : index
    %3 = vector.load %arg2[%c0, %c0_1] : memref<128x512xbf16, #tpu.memory_space<vmem>>, vector<128x512xbf16>
    %c0_2 = arith.constant 0 : index
    %c0_3 = arith.constant 0 : index
    %4 = vector.load %arg3[%c0_2, %c0_3] : memref<256x512xbf16, #tpu.memory_space<vmem>>, vector<256x512xbf16>
    %c0_4 = arith.constant 0 : index
    %c0_5 = arith.constant 0 : index
    %5 = vector.load %arg4[%c0_4, %c0_5] : memref<1x512xf32, #tpu.memory_space<vmem>>, vector<1x512xf32>
    %6 = vector.shape_cast %5 : vector<1x512xf32> to vector<1x512xf32>
    %7 = vector.broadcast %6 : vector<1x512xf32> to vector<8x512xf32>
    %c0_i32_6 = arith.constant 0 : i32
    %8 = arith.index_cast %c0_i32_6 : i32 to index
    %c0_7 = arith.constant 0 : index
    %c0_8 = arith.constant 0 : index
    %9 = vector.load %arg1[%8, %c0_7, %c0_8] : memref<8x8x512xf32, #tpu.memory_space<vmem>>, vector<1x8x512xf32>
    %10 = vector.shape_cast %9 : vector<1x8x512xf32> to vector<8x512xf32>
    %c0_9 = arith.constant 0 : index
    %c0_10 = arith.constant 0 : index
    %11 = vector.load %arg8[%c0_9, %c0_10] : memref<8x128xf32, #tpu.memory_space<vmem>>, vector<8x128xf32>
    %12 = arith.truncf %11 : vector<8x128xf32> to vector<8x128xbf16>
    %cst = arith.constant dense<0.000000e+00> : vector<8x512xf32>
    %13 = tpu.matmul %12, %3, %cst {dimension_numbers = #tpu.dot_dimension_numbers<[1], [0], [0], [1], [0, 0, 1, 1], [], []>} : vector<8x128xbf16>, vector<128x512xbf16>, vector<8x512xf32> -> vector<8x512xf32>
    %14 = arith.addf %10, %13 : vector<8x512xf32>
    %c0_11 = arith.constant 0 : index
    %c0_12 = arith.constant 0 : index
    %15 = vector.load %arg9[%c0_11, %c0_12] : memref<8x128xf32, #tpu.memory_space<vmem>>, vector<8x128xf32>
    %16 = vector.extract_strided_slice %14 {offsets = [0, 0], sizes = [8, 128], strides = [1, 1]} : vector<8x512xf32> to vector<8x128xf32>
    %17 = arith.negf %16 : vector<8x128xf32>
    %18 = math.exp %17 : vector<8x128xf32>
    %cst_13 = arith.constant 1.000000e+00 : f32
    %19 = vector.broadcast %cst_13 : f32 to vector<8x128xf32>
    %20 = arith.addf %19, %18 : vector<8x128xf32>
    %21 = arith.divf %19, %20 : vector<8x128xf32>
    %22 = vector.extract_strided_slice %14 {offsets = [0, 128], sizes = [8, 128], strides = [1, 1]} : vector<8x512xf32> to vector<8x128xf32>
    %23 = arith.negf %22 : vector<8x128xf32>
    %24 = math.exp %23 : vector<8x128xf32>
    %cst_14 = arith.constant 1.000000e+00 : f32
    %25 = vector.broadcast %cst_14 : f32 to vector<8x128xf32>
    %26 = arith.addf %25, %24 : vector<8x128xf32>
    %27 = arith.divf %25, %26 : vector<8x128xf32>
    %28 = vector.extract_strided_slice %14 {offsets = [0, 256], sizes = [8, 128], strides = [1, 1]} : vector<8x512xf32> to vector<8x128xf32>
    %29 = math.tanh %28 : vector<8x128xf32>
    %30 = vector.extract_strided_slice %14 {offsets = [0, 384], sizes = [8, 128], strides = [1, 1]} : vector<8x512xf32> to vector<8x128xf32>
    %31 = arith.negf %30 : vector<8x128xf32>
    %32 = math.exp %31 : vector<8x128xf32>
    %cst_15 = arith.constant 1.000000e+00 : f32
    %33 = vector.broadcast %cst_15 : f32 to vector<8x128xf32>
    %34 = arith.addf %33, %32 : vector<8x128xf32>
    %35 = arith.divf %33, %34 : vector<8x128xf32>
    %36 = arith.mulf %27, %15 : vector<8x128xf32>
    %37 = arith.mulf %21, %29 : vector<8x128xf32>
    %38 = arith.addf %36, %37 : vector<8x128xf32>
    %39 = math.tanh %38 : vector<8x128xf32>
    %40 = arith.mulf %35, %39 : vector<8x128xf32>
    %c0_16 = arith.constant 0 : index
    %c0_17 = arith.constant 0 : index
    %41 = vector.load %arg8[%c0_16, %c0_17] : memref<8x128xf32, #tpu.memory_space<vmem>>, vector<8x128xf32>
    tpu.vector_store %arg8[%c0_16, %c0_17], %40 {strides = array<i32>} : memref<8x128xf32, #tpu.memory_space<vmem>>, vector<8x128xf32>,
    %c0_18 = arith.constant 0 : index
    %c0_19 = arith.constant 0 : index
    %42 = vector.load %arg9[%c0_18, %c0_19] : memref<8x128xf32, #tpu.memory_space<vmem>>, vector<8x128xf32>
    tpu.vector_store %arg9[%c0_18, %c0_19], %38 {strides = array<i32>} : memref<8x128xf32, #tpu.memory_space<vmem>>, vector<8x128xf32>,
    %c0_20 = arith.constant 0 : index
    %c0_21 = arith.constant 0 : index
    %43 = vector.load %arg10[%c0_20, %c0_21] : memref<8x128xf32, #tpu.memory_space<vmem>>, vector<8x128xf32>
    %44 = tpu.concatenate %40, %43 in 1 : vector<8x128xf32>, vector<8x128xf32> -> vector<8x256xf32>
    %45 = arith.truncf %44 : vector<8x256xf32> to vector<8x256xbf16>
    %cst_22 = arith.constant dense<0.000000e+00> : vector<8x512xf32>
    %46 = tpu.matmul %45, %4, %cst_22 {dimension_numbers = #tpu.dot_dimension_numbers<[1], [0], [0], [1], [0, 0, 1, 1], [], []>} : vector<8x256xbf16>, vector<256x512xbf16>, vector<8x512xf32> -> vector<8x512xf32>
    %47 = arith.addf %46, %7 : vector<8x512xf32>
    %c0_23 = arith.constant 0 : index
    %c0_24 = arith.constant 0 : index
    %48 = vector.load %arg11[%c0_23, %c0_24] : memref<8x128xf32, #tpu.memory_space<vmem>>, vector<8x128xf32>
    %49 = vector.extract_strided_slice %47 {offsets = [0, 0], sizes = [8, 128], strides = [1, 1]} : vector<8x512xf32> to vector<8x128xf32>
    %50 = arith.negf %49 : vector<8x128xf32>
    %51 = math.exp %50 : vector<8x128xf32>
    %cst_25 = arith.constant 1.000000e+00 : f32
    %52 = vector.broadcast %cst_25 : f32 to vector<8x128xf32>
    %53 = arith.addf %52, %51 : vector<8x128xf32>
    %54 = arith.divf %52, %53 : vector<8x128xf32>
    %55 = vector.extract_strided_slice %47 {offsets = [0, 128], sizes = [8, 128], strides = [1, 1]} : vector<8x512xf32> to vector<8x128xf32>
    %56 = arith.negf %55 : vector<8x128xf32>
    %57 = math.exp %56 : vector<8x128xf32>
    %cst_26 = arith.constant 1.000000e+00 : f32
    %58 = vector.broadcast %cst_26 : f32 to vector<8x128xf32>
    %59 = arith.addf %58, %57 : vector<8x128xf32>
    %60 = arith.divf %58, %59 : vector<8x128xf32>
    %61 = vector.extract_strided_slice %47 {offsets = [0, 256], sizes = [8, 128], strides = [1, 1]} : vector<8x512xf32> to vector<8x128xf32>
    %62 = math.tanh %61 : vector<8x128xf32>
    %63 = vector.extract_strided_slice %47 {offsets = [0, 384], sizes = [8, 128], strides = [1, 1]} : vector<8x512xf32> to vector<8x128xf32>
    %64 = arith.negf %63 : vector<8x128xf32>
    %65 = math.exp %64 : vector<8x128xf32>
    %cst_27 = arith.constant 1.000000e+00 : f32
    %66 = vector.broadcast %cst_27 : f32 to vector<8x128xf32>
    %67 = arith.addf %66, %65 : vector<8x128xf32>
    %68 = arith.divf %66, %67 : vector<8x128xf32>
    %69 = arith.mulf %60, %48 : vector<8x128xf32>
    %70 = arith.mulf %54, %62 : vector<8x128xf32>
    %71 = arith.addf %69, %70 : vector<8x128xf32>
    %72 = math.tanh %71 : vector<8x128xf32>
    %73 = arith.mulf %68, %72 : vector<8x128xf32>
    %c0_28 = arith.constant 0 : index
    %c0_29 = arith.constant 0 : index
    %74 = vector.load %arg10[%c0_28, %c0_29] : memref<8x128xf32, #tpu.memory_space<vmem>>, vector<8x128xf32>
    tpu.vector_store %arg10[%c0_28, %c0_29], %73 {strides = array<i32>} : memref<8x128xf32, #tpu.memory_space<vmem>>, vector<8x128xf32>,
    %c0_30 = arith.constant 0 : index
    %c0_31 = arith.constant 0 : index
    %75 = vector.load %arg11[%c0_30, %c0_31] : memref<8x128xf32, #tpu.memory_space<vmem>>, vector<8x128xf32>
    tpu.vector_store %arg11[%c0_30, %c0_31], %71 {strides = array<i32>} : memref<8x128xf32, #tpu.memory_space<vmem>>, vector<8x128xf32>,
    %c1_i32 = arith.constant 1 : i32
    %76 = arith.index_cast %c1_i32 : i32 to index
    %c0_32 = arith.constant 0 : index
    %c0_33 = arith.constant 0 : index
    %77 = vector.load %arg1[%76, %c0_32, %c0_33] : memref<8x8x512xf32, #tpu.memory_space<vmem>>, vector<1x8x512xf32>
    %78 = vector.shape_cast %77 : vector<1x8x512xf32> to vector<8x512xf32>
    %c0_34 = arith.constant 0 : index
    %c0_35 = arith.constant 0 : index
    %79 = vector.load %arg8[%c0_34, %c0_35] : memref<8x128xf32, #tpu.memory_space<vmem>>, vector<8x128xf32>
    %80 = arith.truncf %79 : vector<8x128xf32> to vector<8x128xbf16>
    %cst_36 = arith.constant dense<0.000000e+00> : vector<8x512xf32>
    %81 = tpu.matmul %80, %3, %cst_36 {dimension_numbers = #tpu.dot_dimension_numbers<[1], [0], [0], [1], [0, 0, 1, 1], [], []>} : vector<8x128xbf16>, vector<128x512xbf16>, vector<8x512xf32> -> vector<8x512xf32>
    %82 = arith.addf %78, %81 : vector<8x512xf32>
    %c0_37 = arith.constant 0 : index
    %c0_38 = arith.constant 0 : index
    %83 = vector.load %arg9[%c0_37, %c0_38] : memref<8x128xf32, #tpu.memory_space<vmem>>, vector<8x128xf32>
    %84 = vector.extract_strided_slice %82 {offsets = [0, 0], sizes = [8, 128], strides = [1, 1]} : vector<8x512xf32> to vector<8x128xf32>
    %85 = arith.negf %84 : vector<8x128xf32>
    %86 = math.exp %85 : vector<8x128xf32>
    %cst_39 = arith.constant 1.000000e+00 : f32
    %87 = vector.broadcast %cst_39 : f32 to vector<8x128xf32>
    %88 = arith.addf %87, %86 : vector<8x128xf32>
    %89 = arith.divf %87, %88 : vector<8x128xf32>
    %90 = vector.extract_strided_slice %82 {offsets = [0, 128], sizes = [8, 128], strides = [1, 1]} : vector<8x512xf32> to vector<8x128xf32>
    %91 = arith.negf %90 : vector<8x128xf32>
    %92 = math.exp %91 : vector<8x128xf32>
    %cst_40 = arith.constant 1.000000e+00 : f32
    %93 = vector.broadcast %cst_40 : f32 to vector<8x128xf32>
    %94 = arith.addf %93, %92 : vector<8x128xf32>
    %95 = arith.divf %93, %94 : vector<8x128xf32>
    %96 = vector.extract_strided_slice %82 {offsets = [0, 256], sizes = [8, 128], strides = [1, 1]} : vector<8x512xf32> to vector<8x128xf32>
    %97 = math.tanh %96 : vector<8x128xf32>
    %98 = vector.extract_strided_slice %82 {offsets = [0, 384], sizes = [8, 128], strides = [1, 1]} : vector<8x512xf32> to vector<8x128xf32>
    %99 = arith.negf %98 : vector<8x128xf32>
    %100 = math.exp %99 : vector<8x128xf32>
    %cst_41 = arith.constant 1.000000e+00 : f32
    %101 = vector.broadcast %cst_41 : f32 to vector<8x128xf32>
    %102 = arith.addf %101, %100 : vector<8x128xf32>
    %103 = arith.divf %101, %102 : vector<8x128xf32>
    %104 = arith.mulf %95, %83 : vector<8x128xf32>
    %105 = arith.mulf %89, %97 : vector<8x128xf32>
    %106 = arith.addf %104, %105 : vector<8x128xf32>
    %107 = math.tanh %106 : vector<8x128xf32>
    %108 = arith.mulf %103, %107 : vector<8x128xf32>
    %c0_42 = arith.constant 0 : index
    %c0_43 = arith.constant 0 : index
    %109 = vector.load %arg8[%c0_42, %c0_43] : memref<8x128xf32, #tpu.memory_space<vmem>>, vector<8x128xf32>
    tpu.vector_store %arg8[%c0_42, %c0_43], %108 {strides = array<i32>} : memref<8x128xf32, #tpu.memory_space<vmem>>, vector<8x128xf32>,
    %c0_44 = arith.constant 0 : index
    %c0_45 = arith.constant 0 : index
    %110 = vector.load %arg9[%c0_44, %c0_45] : memref<8x128xf32, #tpu.memory_space<vmem>>, vector<8x128xf32>
    tpu.vector_store %arg9[%c0_44, %c0_45], %106 {strides = array<i32>} : memref<8x128xf32, #tpu.memory_space<vmem>>, vector<8x128xf32>,
    %c0_46 = arith.constant 0 : index
    %c0_47 = arith.constant 0 : index
    %111 = vector.load %arg10[%c0_46, %c0_47] : memref<8x128xf32, #tpu.memory_space<vmem>>, vector<8x128xf32>
    %112 = tpu.concatenate %108, %111 in 1 : vector<8x128xf32>, vector<8x128xf32> -> vector<8x256xf32>
    %113 = arith.truncf %112 : vector<8x256xf32> to vector<8x256xbf16>
    %cst_48 = arith.constant dense<0.000000e+00> : vector<8x512xf32>
    %114 = tpu.matmul %113, %4, %cst_48 {dimension_numbers = #tpu.dot_dimension_numbers<[1], [0], [0], [1], [0, 0, 1, 1], [], []>} : vector<8x256xbf16>, vector<256x512xbf16>, vector<8x512xf32> -> vector<8x512xf32>
    %115 = arith.addf %114, %7 : vector<8x512xf32>
    %c0_49 = arith.constant 0 : index
    %c0_50 = arith.constant 0 : index
    %116 = vector.load %arg11[%c0_49, %c0_50] : memref<8x128xf32, #tpu.memory_space<vmem>>, vector<8x128xf32>
    %117 = vector.extract_strided_slice %115 {offsets = [0, 0], sizes = [8, 128], strides = [1, 1]} : vector<8x512xf32> to vector<8x128xf32>
    %118 = arith.negf %117 : vector<8x128xf32>
    %119 = math.exp %118 : vector<8x128xf32>
    %cst_51 = arith.constant 1.000000e+00 : f32
    %120 = vector.broadcast %cst_51 : f32 to vector<8x128xf32>
    %121 = arith.addf %120, %119 : vector<8x128xf32>
    %122 = arith.divf %120, %121 : vector<8x128xf32>
    %123 = vector.extract_strided_slice %115 {offsets = [0, 128], sizes = [8, 128], strides = [1, 1]} : vector<8x512xf32> to vector<8x128xf32>
    %124 = arith.negf %123 : vector<8x128xf32>
    %125 = math.exp %124 : vector<8x128xf32>
    %cst_52 = arith.constant 1.000000e+00 : f32
    %126 = vector.broadcast %cst_52 : f32 to vector<8x128xf32>
    %127 = arith.addf %126, %125 : vector<8x128xf32>
    %128 = arith.divf %126, %127 : vector<8x128xf32>
    %129 = vector.extract_strided_slice %115 {offsets = [0, 256], sizes = [8, 128], strides = [1, 1]} : vector<8x512xf32> to vector<8x128xf32>
    %130 = math.tanh %129 : vector<8x128xf32>
    %131 = vector.extract_strided_slice %115 {offsets = [0, 384], sizes = [8, 128], strides = [1, 1]} : vector<8x512xf32> to vector<8x128xf32>
    %132 = arith.negf %131 : vector<8x128xf32>
    %133 = math.exp %132 : vector<8x128xf32>
    %cst_53 = arith.constant 1.000000e+00 : f32
    %134 = vector.broadcast %cst_53 : f32 to vector<8x128xf32>
    %135 = arith.addf %134, %133 : vector<8x128xf32>
    %136 = arith.divf %134, %135 : vector<8x128xf32>
    %137 = arith.mulf %128, %116 : vector<8x128xf32>
    %138 = arith.mulf %122, %130 : vector<8x128xf32>
    %139 = arith.addf %137, %138 : vector<8x128xf32>
    %140 = math.tanh %139 : vector<8x128xf32>
    %141 = arith.mulf %136, %140 : vector<8x128xf32>
    %c0_54 = arith.constant 0 : index
    %c0_55 = arith.constant 0 : index
    %142 = vector.load %arg10[%c0_54, %c0_55] : memref<8x128xf32, #tpu.memory_space<vmem>>, vector<8x128xf32>
    tpu.vector_store %arg10[%c0_54, %c0_55], %141 {strides = array<i32>} : memref<8x128xf32, #tpu.memory_space<vmem>>, vector<8x128xf32>,
    %c0_56 = arith.constant 0 : index
    %c0_57 = arith.constant 0 : index
    %143 = vector.load %arg11[%c0_56, %c0_57] : memref<8x128xf32, #tpu.memory_space<vmem>>, vector<8x128xf32>
    tpu.vector_store %arg11[%c0_56, %c0_57], %139 {strides = array<i32>} : memref<8x128xf32, #tpu.memory_space<vmem>>, vector<8x128xf32>,
    %c2_i32 = arith.constant 2 : i32
    %144 = arith.index_cast %c2_i32 : i32 to index
    %c0_58 = arith.constant 0 : index
    %c0_59 = arith.constant 0 : index
    %145 = vector.load %arg1[%144, %c0_58, %c0_59] : memref<8x8x512xf32, #tpu.memory_space<vmem>>, vector<1x8x512xf32>
    %146 = vector.shape_cast %145 : vector<1x8x512xf32> to vector<8x512xf32>
    %c0_60 = arith.constant 0 : index
    %c0_61 = arith.constant 0 : index
    %147 = vector.load %arg8[%c0_60, %c0_61] : memref<8x128xf32, #tpu.memory_space<vmem>>, vector<8x128xf32>
    %148 = arith.truncf %147 : vector<8x128xf32> to vector<8x128xbf16>
    %cst_62 = arith.constant dense<0.000000e+00> : vector<8x512xf32>
    %149 = tpu.matmul %148, %3, %cst_62 {dimension_numbers = #tpu.dot_dimension_numbers<[1], [0], [0], [1], [0, 0, 1, 1], [], []>} : vector<8x128xbf16>, vector<128x512xbf16>, vector<8x512xf32> -> vector<8x512xf32>
    %150 = arith.addf %146, %149 : vector<8x512xf32>
    %c0_63 = arith.constant 0 : index
    %c0_64 = arith.constant 0 : index
    %151 = vector.load %arg9[%c0_63, %c0_64] : memref<8x128xf32, #tpu.memory_space<vmem>>, vector<8x128xf32>
    %152 = vector.extract_strided_slice %150 {offsets = [0, 0], sizes = [8, 128], strides = [1, 1]} : vector<8x512xf32> to vector<8x128xf32>
    %153 = arith.negf %152 : vector<8x128xf32>
    %154 = math.exp %153 : vector<8x128xf32>
    %cst_65 = arith.constant 1.000000e+00 : f32
    %155 = vector.broadcast %cst_65 : f32 to vector<8x128xf32>
    %156 = arith.addf %155, %154 : vector<8x128xf32>
    %157 = arith.divf %155, %156 : vector<8x128xf32>
    %158 = vector.extract_strided_slice %150 {offsets = [0, 128], sizes = [8, 128], strides = [1, 1]} : vector<8x512xf32> to vector<8x128xf32>
    %159 = arith.negf %158 : vector<8x128xf32>
    %160 = math.exp %159 : vector<8x128xf32>
    %cst_66 = arith.constant 1.000000e+00 : f32
    %161 = vector.broadcast %cst_66 : f32 to vector<8x128xf32>
    %162 = arith.addf %161, %160 : vector<8x128xf32>
    %163 = arith.divf %161, %162 : vector<8x128xf32>
    %164 = vector.extract_strided_slice %150 {offsets = [0, 256], sizes = [8, 128], strides = [1, 1]} : vector<8x512xf32> to vector<8x128xf32>
    %165 = math.tanh %164 : vector<8x128xf32>
    %166 = vector.extract_strided_slice %150 {offsets = [0, 384], sizes = [8, 128], strides = [1, 1]} : vector<8x512xf32> to vector<8x128xf32>
    %167 = arith.negf %166 : vector<8x128xf32>
    %168 = math.exp %167 : vector<8x128xf32>
    %cst_67 = arith.constant 1.000000e+00 : f32
    %169 = vector.broadcast %cst_67 : f32 to vector<8x128xf32>
    %170 = arith.addf %169, %168 : vector<8x128xf32>
    %171 = arith.divf %169, %170 : vector<8x128xf32>
    %172 = arith.mulf %163, %151 : vector<8x128xf32>
    %173 = arith.mulf %157, %165 : vector<8x128xf32>
    %174 = arith.addf %172, %173 : vector<8x128xf32>
    %175 = math.tanh %174 : vector<8x128xf32>
    %176 = arith.mulf %171, %175 : vector<8x128xf32>
    %c0_68 = arith.constant 0 : index
    %c0_69 = arith.constant 0 : index
    %177 = vector.load %arg8[%c0_68, %c0_69] : memref<8x128xf32, #tpu.memory_space<vmem>>, vector<8x128xf32>
    tpu.vector_store %arg8[%c0_68, %c0_69], %176 {strides = array<i32>} : memref<8x128xf32, #tpu.memory_space<vmem>>, vector<8x128xf32>,
    %c0_70 = arith.constant 0 : index
    %c0_71 = arith.constant 0 : index
    %178 = vector.load %arg9[%c0_70, %c0_71] : memref<8x128xf32, #tpu.memory_space<vmem>>, vector<8x128xf32>
    tpu.vector_store %arg9[%c0_70, %c0_71], %174 {strides = array<i32>} : memref<8x128xf32, #tpu.memory_space<vmem>>, vector<8x128xf32>,
    %c0_72 = arith.constant 0 : index
    %c0_73 = arith.constant 0 : index
    %179 = vector.load %arg10[%c0_72, %c0_73] : memref<8x128xf32, #tpu.memory_space<vmem>>, vector<8x128xf32>
    %180 = tpu.concatenate %176, %179 in 1 : vector<8x128xf32>, vector<8x128xf32> -> vector<8x256xf32>
    %181 = arith.truncf %180 : vector<8x256xf32> to vector<8x256xbf16>
    %cst_74 = arith.constant dense<0.000000e+00> : vector<8x512xf32>
    %182 = tpu.matmul %181, %4, %cst_74 {dimension_numbers = #tpu.dot_dimension_numbers<[1], [0], [0], [1], [0, 0, 1, 1], [], []>} : vector<8x256xbf16>, vector<256x512xbf16>, vector<8x512xf32> -> vector<8x512xf32>
    %183 = arith.addf %182, %7 : vector<8x512xf32>
    %c0_75 = arith.constant 0 : index
    %c0_76 = arith.constant 0 : index
    %184 = vector.load %arg11[%c0_75, %c0_76] : memref<8x128xf32, #tpu.memory_space<vmem>>, vector<8x128xf32>
    %185 = vector.extract_strided_slice %183 {offsets = [0, 0], sizes = [8, 128], strides = [1, 1]} : vector<8x512xf32> to vector<8x128xf32>
    %186 = arith.negf %185 : vector<8x128xf32>
    %187 = math.exp %186 : vector<8x128xf32>
    %cst_77 = arith.constant 1.000000e+00 : f32
    %188 = vector.broadcast %cst_77 : f32 to vector<8x128xf32>
    %189 = arith.addf %188, %187 : vector<8x128xf32>
    %190 = arith.divf %188, %189 : vector<8x128xf32>
    %191 = vector.extract_strided_slice %183 {offsets = [0, 128], sizes = [8, 128], strides = [1, 1]} : vector<8x512xf32> to vector<8x128xf32>
    %192 = arith.negf %191 : vector<8x128xf32>
    %193 = math.exp %192 : vector<8x128xf32>
    %cst_78 = arith.constant 1.000000e+00 : f32
    %194 = vector.broadcast %cst_78 : f32 to vector<8x128xf32>
    %195 = arith.addf %194, %193 : vector<8x128xf32>
    %196 = arith.divf %194, %195 : vector<8x128xf32>
    %197 = vector.extract_strided_slice %183 {offsets = [0, 256], sizes = [8, 128], strides = [1, 1]} : vector<8x512xf32> to vector<8x128xf32>
    %198 = math.tanh %197 : vector<8x128xf32>
    %199 = vector.extract_strided_slice %183 {offsets = [0, 384], sizes = [8, 128], strides = [1, 1]} : vector<8x512xf32> to vector<8x128xf32>
    %200 = arith.negf %199 : vector<8x128xf32>
    %201 = math.exp %200 : vector<8x128xf32>
    %cst_79 = arith.constant 1.000000e+00 : f32
    %202 = vector.broadcast %cst_79 : f32 to vector<8x128xf32>
    %203 = arith.addf %202, %201 : vector<8x128xf32>
    %204 = arith.divf %202, %203 : vector<8x128xf32>
    %205 = arith.mulf %196, %184 : vector<8x128xf32>
    %206 = arith.mulf %190, %198 : vector<8x128xf32>
    %207 = arith.addf %205, %206 : vector<8x128xf32>
    %208 = math.tanh %207 : vector<8x128xf32>
    %209 = arith.mulf %204, %208 : vector<8x128xf32>
    %c0_80 = arith.constant 0 : index
    %c0_81 = arith.constant 0 : index
    %210 = vector.load %arg10[%c0_80, %c0_81] : memref<8x128xf32, #tpu.memory_space<vmem>>, vector<8x128xf32>
    tpu.vector_store %arg10[%c0_80, %c0_81], %209 {strides = array<i32>} : memref<8x128xf32, #tpu.memory_space<vmem>>, vector<8x128xf32>,
    %c0_82 = arith.constant 0 : index
    %c0_83 = arith.constant 0 : index
    %211 = vector.load %arg11[%c0_82, %c0_83] : memref<8x128xf32, #tpu.memory_space<vmem>>, vector<8x128xf32>
    tpu.vector_store %arg11[%c0_82, %c0_83], %207 {strides = array<i32>} : memref<8x128xf32, #tpu.memory_space<vmem>>, vector<8x128xf32>,
    %c3_i32 = arith.constant 3 : i32
    %212 = arith.index_cast %c3_i32 : i32 to index
    %c0_84 = arith.constant 0 : index
    %c0_85 = arith.constant 0 : index
    %213 = vector.load %arg1[%212, %c0_84, %c0_85] : memref<8x8x512xf32, #tpu.memory_space<vmem>>, vector<1x8x512xf32>
    %214 = vector.shape_cast %213 : vector<1x8x512xf32> to vector<8x512xf32>
    %c0_86 = arith.constant 0 : index
    %c0_87 = arith.constant 0 : index
    %215 = vector.load %arg8[%c0_86, %c0_87] : memref<8x128xf32, #tpu.memory_space<vmem>>, vector<8x128xf32>
    %216 = arith.truncf %215 : vector<8x128xf32> to vector<8x128xbf16>
    %cst_88 = arith.constant dense<0.000000e+00> : vector<8x512xf32>
    %217 = tpu.matmul %216, %3, %cst_88 {dimension_numbers = #tpu.dot_dimension_numbers<[1], [0], [0], [1], [0, 0, 1, 1], [], []>} : vector<8x128xbf16>, vector<128x512xbf16>, vector<8x512xf32> -> vector<8x512xf32>
    %218 = arith.addf %214, %217 : vector<8x512xf32>
    %c0_89 = arith.constant 0 : index
    %c0_90 = arith.constant 0 : index
    %219 = vector.load %arg9[%c0_89, %c0_90] : memref<8x128xf32, #tpu.memory_space<vmem>>, vector<8x128xf32>
    %220 = vector.extract_strided_slice %218 {offsets = [0, 0], sizes = [8, 128], strides = [1, 1]} : vector<8x512xf32> to vector<8x128xf32>
    %221 = arith.negf %220 : vector<8x128xf32>
    %222 = math.exp %221 : vector<8x128xf32>
    %cst_91 = arith.constant 1.000000e+00 : f32
    %223 = vector.broadcast %cst_91 : f32 to vector<8x128xf32>
    %224 = arith.addf %223, %222 : vector<8x128xf32>
    %225 = arith.divf %223, %224 : vector<8x128xf32>
    %226 = vector.extract_strided_slice %218 {offsets = [0, 128], sizes = [8, 128], strides = [1, 1]} : vector<8x512xf32> to vector<8x128xf32>
    %227 = arith.negf %226 : vector<8x128xf32>
    %228 = math.exp %227 : vector<8x128xf32>
    %cst_92 = arith.constant 1.000000e+00 : f32
    %229 = vector.broadcast %cst_92 : f32 to vector<8x128xf32>
    %230 = arith.addf %229, %228 : vector<8x128xf32>
    %231 = arith.divf %229, %230 : vector<8x128xf32>
    %232 = vector.extract_strided_slice %218 {offsets = [0, 256], sizes = [8, 128], strides = [1, 1]} : vector<8x512xf32> to vector<8x128xf32>
    %233 = math.tanh %232 : vector<8x128xf32>
    %234 = vector.extract_strided_slice %218 {offsets = [0, 384], sizes = [8, 128], strides = [1, 1]} : vector<8x512xf32> to vector<8x128xf32>
    %235 = arith.negf %234 : vector<8x128xf32>
    %236 = math.exp %235 : vector<8x128xf32>
    %cst_93 = arith.constant 1.000000e+00 : f32
    %237 = vector.broadcast %cst_93 : f32 to vector<8x128xf32>
    %238 = arith.addf %237, %236 : vector<8x128xf32>
    %239 = arith.divf %237, %238 : vector<8x128xf32>
    %240 = arith.mulf %231, %219 : vector<8x128xf32>
    %241 = arith.mulf %225, %233 : vector<8x128xf32>
    %242 = arith.addf %240, %241 : vector<8x128xf32>
    %243 = math.tanh %242 : vector<8x128xf32>
    %244 = arith.mulf %239, %243 : vector<8x128xf32>
    %c0_94 = arith.constant 0 : index
    %c0_95 = arith.constant 0 : index
    %245 = vector.load %arg8[%c0_94, %c0_95] : memref<8x128xf32, #tpu.memory_space<vmem>>, vector<8x128xf32>
    tpu.vector_store %arg8[%c0_94, %c0_95], %244 {strides = array<i32>} : memref<8x128xf32, #tpu.memory_space<vmem>>, vector<8x128xf32>,
    %c0_96 = arith.constant 0 : index
    %c0_97 = arith.constant 0 : index
    %246 = vector.load %arg9[%c0_96, %c0_97] : memref<8x128xf32, #tpu.memory_space<vmem>>, vector<8x128xf32>
    tpu.vector_store %arg9[%c0_96, %c0_97], %242 {strides = array<i32>} : memref<8x128xf32, #tpu.memory_space<vmem>>, vector<8x128xf32>,
    %c0_98 = arith.constant 0 : index
    %c0_99 = arith.constant 0 : index
    %247 = vector.load %arg10[%c0_98, %c0_99] : memref<8x128xf32, #tpu.memory_space<vmem>>, vector<8x128xf32>
    %248 = tpu.concatenate %244, %247 in 1 : vector<8x128xf32>, vector<8x128xf32> -> vector<8x256xf32>
    %249 = arith.truncf %248 : vector<8x256xf32> to vector<8x256xbf16>
    %cst_100 = arith.constant dense<0.000000e+00> : vector<8x512xf32>
    %250 = tpu.matmul %249, %4, %cst_100 {dimension_numbers = #tpu.dot_dimension_numbers<[1], [0], [0], [1], [0, 0, 1, 1], [], []>} : vector<8x256xbf16>, vector<256x512xbf16>, vector<8x512xf32> -> vector<8x512xf32>
    %251 = arith.addf %250, %7 : vector<8x512xf32>
    %c0_101 = arith.constant 0 : index
    %c0_102 = arith.constant 0 : index
    %252 = vector.load %arg11[%c0_101, %c0_102] : memref<8x128xf32, #tpu.memory_space<vmem>>, vector<8x128xf32>
    %253 = vector.extract_strided_slice %251 {offsets = [0, 0], sizes = [8, 128], strides = [1, 1]} : vector<8x512xf32> to vector<8x128xf32>
    %254 = arith.negf %253 : vector<8x128xf32>
    %255 = math.exp %254 : vector<8x128xf32>
    %cst_103 = arith.constant 1.000000e+00 : f32
    %256 = vector.broadcast %cst_103 : f32 to vector<8x128xf32>
    %257 = arith.addf %256, %255 : vector<8x128xf32>
    %258 = arith.divf %256, %257 : vector<8x128xf32>
    %259 = vector.extract_strided_slice %251 {offsets = [0, 128], sizes = [8, 128], strides = [1, 1]} : vector<8x512xf32> to vector<8x128xf32>
    %260 = arith.negf %259 : vector<8x128xf32>
    %261 = math.exp %260 : vector<8x128xf32>
    %cst_104 = arith.constant 1.000000e+00 : f32
    %262 = vector.broadcast %cst_104 : f32 to vector<8x128xf32>
    %263 = arith.addf %262, %261 : vector<8x128xf32>
    %264 = arith.divf %262, %263 : vector<8x128xf32>
    %265 = vector.extract_strided_slice %251 {offsets = [0, 256], sizes = [8, 128], strides = [1, 1]} : vector<8x512xf32> to vector<8x128xf32>
    %266 = math.tanh %265 : vector<8x128xf32>
    %267 = vector.extract_strided_slice %251 {offsets = [0, 384], sizes = [8, 128], strides = [1, 1]} : vector<8x512xf32> to vector<8x128xf32>
    %268 = arith.negf %267 : vector<8x128xf32>
    %269 = math.exp %268 : vector<8x128xf32>
    %cst_105 = arith.constant 1.000000e+00 : f32
    %270 = vector.broadcast %cst_105 : f32 to vector<8x128xf32>
    %271 = arith.addf %270, %269 : vector<8x128xf32>
    %272 = arith.divf %270, %271 : vector<8x128xf32>
    %273 = arith.mulf %264, %252 : vector<8x128xf32>
    %274 = arith.mulf %258, %266 : vector<8x128xf32>
    %275 = arith.addf %273, %274 : vector<8x128xf32>
    %276 = math.tanh %275 : vector<8x128xf32>
    %277 = arith.mulf %272, %276 : vector<8x128xf32>
    %c0_106 = arith.constant 0 : index
    %c0_107 = arith.constant 0 : index
    %278 = vector.load %arg10[%c0_106, %c0_107] : memref<8x128xf32, #tpu.memory_space<vmem>>, vector<8x128xf32>
    tpu.vector_store %arg10[%c0_106, %c0_107], %277 {strides = array<i32>} : memref<8x128xf32, #tpu.memory_space<vmem>>, vector<8x128xf32>,
    %c0_108 = arith.constant 0 : index
    %c0_109 = arith.constant 0 : index
    %279 = vector.load %arg11[%c0_108, %c0_109] : memref<8x128xf32, #tpu.memory_space<vmem>>, vector<8x128xf32>
    tpu.vector_store %arg11[%c0_108, %c0_109], %275 {strides = array<i32>} : memref<8x128xf32, #tpu.memory_space<vmem>>, vector<8x128xf32>,
    %c4_i32 = arith.constant 4 : i32
    %280 = arith.index_cast %c4_i32 : i32 to index
    %c0_110 = arith.constant 0 : index
    %c0_111 = arith.constant 0 : index
    %281 = vector.load %arg1[%280, %c0_110, %c0_111] : memref<8x8x512xf32, #tpu.memory_space<vmem>>, vector<1x8x512xf32>
    %282 = vector.shape_cast %281 : vector<1x8x512xf32> to vector<8x512xf32>
    %c0_112 = arith.constant 0 : index
    %c0_113 = arith.constant 0 : index
    %283 = vector.load %arg8[%c0_112, %c0_113] : memref<8x128xf32, #tpu.memory_space<vmem>>, vector<8x128xf32>
    %284 = arith.truncf %283 : vector<8x128xf32> to vector<8x128xbf16>
    %cst_114 = arith.constant dense<0.000000e+00> : vector<8x512xf32>
    %285 = tpu.matmul %284, %3, %cst_114 {dimension_numbers = #tpu.dot_dimension_numbers<[1], [0], [0], [1], [0, 0, 1, 1], [], []>} : vector<8x128xbf16>, vector<128x512xbf16>, vector<8x512xf32> -> vector<8x512xf32>
    %286 = arith.addf %282, %285 : vector<8x512xf32>
    %c0_115 = arith.constant 0 : index
    %c0_116 = arith.constant 0 : index
    %287 = vector.load %arg9[%c0_115, %c0_116] : memref<8x128xf32, #tpu.memory_space<vmem>>, vector<8x128xf32>
    %288 = vector.extract_strided_slice %286 {offsets = [0, 0], sizes = [8, 128], strides = [1, 1]} : vector<8x512xf32> to vector<8x128xf32>
    %289 = arith.negf %288 : vector<8x128xf32>
    %290 = math.exp %289 : vector<8x128xf32>
    %cst_117 = arith.constant 1.000000e+00 : f32
    %291 = vector.broadcast %cst_117 : f32 to vector<8x128xf32>
    %292 = arith.addf %291, %290 : vector<8x128xf32>
    %293 = arith.divf %291, %292 : vector<8x128xf32>
    %294 = vector.extract_strided_slice %286 {offsets = [0, 128], sizes = [8, 128], strides = [1, 1]} : vector<8x512xf32> to vector<8x128xf32>
    %295 = arith.negf %294 : vector<8x128xf32>
    %296 = math.exp %295 : vector<8x128xf32>
    %cst_118 = arith.constant 1.000000e+00 : f32
    %297 = vector.broadcast %cst_118 : f32 to vector<8x128xf32>
    %298 = arith.addf %297, %296 : vector<8x128xf32>
    %299 = arith.divf %297, %298 : vector<8x128xf32>
    %300 = vector.extract_strided_slice %286 {offsets = [0, 256], sizes = [8, 128], strides = [1, 1]} : vector<8x512xf32> to vector<8x128xf32>
    %301 = math.tanh %300 : vector<8x128xf32>
    %302 = vector.extract_strided_slice %286 {offsets = [0, 384], sizes = [8, 128], strides = [1, 1]} : vector<8x512xf32> to vector<8x128xf32>
    %303 = arith.negf %302 : vector<8x128xf32>
    %304 = math.exp %303 : vector<8x128xf32>
    %cst_119 = arith.constant 1.000000e+00 : f32
    %305 = vector.broadcast %cst_119 : f32 to vector<8x128xf32>
    %306 = arith.addf %305, %304 : vector<8x128xf32>
    %307 = arith.divf %305, %306 : vector<8x128xf32>
    %308 = arith.mulf %299, %287 : vector<8x128xf32>
    %309 = arith.mulf %293, %301 : vector<8x128xf32>
    %310 = arith.addf %308, %309 : vector<8x128xf32>
    %311 = math.tanh %310 : vector<8x128xf32>
    %312 = arith.mulf %307, %311 : vector<8x128xf32>
    %c0_120 = arith.constant 0 : index
    %c0_121 = arith.constant 0 : index
    %313 = vector.load %arg8[%c0_120, %c0_121] : memref<8x128xf32, #tpu.memory_space<vmem>>, vector<8x128xf32>
    tpu.vector_store %arg8[%c0_120, %c0_121], %312 {strides = array<i32>} : memref<8x128xf32, #tpu.memory_space<vmem>>, vector<8x128xf32>,
    %c0_122 = arith.constant 0 : index
    %c0_123 = arith.constant 0 : index
    %314 = vector.load %arg9[%c0_122, %c0_123] : memref<8x128xf32, #tpu.memory_space<vmem>>, vector<8x128xf32>
    tpu.vector_store %arg9[%c0_122, %c0_123], %310 {strides = array<i32>} : memref<8x128xf32, #tpu.memory_space<vmem>>, vector<8x128xf32>,
    %c0_124 = arith.constant 0 : index
    %c0_125 = arith.constant 0 : index
    %315 = vector.load %arg10[%c0_124, %c0_125] : memref<8x128xf32, #tpu.memory_space<vmem>>, vector<8x128xf32>
    %316 = tpu.concatenate %312, %315 in 1 : vector<8x128xf32>, vector<8x128xf32> -> vector<8x256xf32>
    %317 = arith.truncf %316 : vector<8x256xf32> to vector<8x256xbf16>
    %cst_126 = arith.constant dense<0.000000e+00> : vector<8x512xf32>
    %318 = tpu.matmul %317, %4, %cst_126 {dimension_numbers = #tpu.dot_dimension_numbers<[1], [0], [0], [1], [0, 0, 1, 1], [], []>} : vector<8x256xbf16>, vector<256x512xbf16>, vector<8x512xf32> -> vector<8x512xf32>
    %319 = arith.addf %318, %7 : vector<8x512xf32>
    %c0_127 = arith.constant 0 : index
    %c0_128 = arith.constant 0 : index
    %320 = vector.load %arg11[%c0_127, %c0_128] : memref<8x128xf32, #tpu.memory_space<vmem>>, vector<8x128xf32>
    %321 = vector.extract_strided_slice %319 {offsets = [0, 0], sizes = [8, 128], strides = [1, 1]} : vector<8x512xf32> to vector<8x128xf32>
    %322 = arith.negf %321 : vector<8x128xf32>
    %323 = math.exp %322 : vector<8x128xf32>
    %cst_129 = arith.constant 1.000000e+00 : f32
    %324 = vector.broadcast %cst_129 : f32 to vector<8x128xf32>
    %325 = arith.addf %324, %323 : vector<8x128xf32>
    %326 = arith.divf %324, %325 : vector<8x128xf32>
    %327 = vector.extract_strided_slice %319 {offsets = [0, 128], sizes = [8, 128], strides = [1, 1]} : vector<8x512xf32> to vector<8x128xf32>
    %328 = arith.negf %327 : vector<8x128xf32>
    %329 = math.exp %328 : vector<8x128xf32>
    %cst_130 = arith.constant 1.000000e+00 : f32
    %330 = vector.broadcast %cst_130 : f32 to vector<8x128xf32>
    %331 = arith.addf %330, %329 : vector<8x128xf32>
    %332 = arith.divf %330, %331 : vector<8x128xf32>
    %333 = vector.extract_strided_slice %319 {offsets = [0, 256], sizes = [8, 128], strides = [1, 1]} : vector<8x512xf32> to vector<8x128xf32>
    %334 = math.tanh %333 : vector<8x128xf32>
    %335 = vector.extract_strided_slice %319 {offsets = [0, 384], sizes = [8, 128], strides = [1, 1]} : vector<8x512xf32> to vector<8x128xf32>
    %336 = arith.negf %335 : vector<8x128xf32>
    %337 = math.exp %336 : vector<8x128xf32>
    %cst_131 = arith.constant 1.000000e+00 : f32
    %338 = vector.broadcast %cst_131 : f32 to vector<8x128xf32>
    %339 = arith.addf %338, %337 : vector<8x128xf32>
    %340 = arith.divf %338, %339 : vector<8x128xf32>
    %341 = arith.mulf %332, %320 : vector<8x128xf32>
    %342 = arith.mulf %326, %334 : vector<8x128xf32>
    %343 = arith.addf %341, %342 : vector<8x128xf32>
    %344 = math.tanh %343 : vector<8x128xf32>
    %345 = arith.mulf %340, %344 : vector<8x128xf32>
    %c0_132 = arith.constant 0 : index
    %c0_133 = arith.constant 0 : index
    %346 = vector.load %arg10[%c0_132, %c0_133] : memref<8x128xf32, #tpu.memory_space<vmem>>, vector<8x128xf32>
    tpu.vector_store %arg10[%c0_132, %c0_133], %345 {strides = array<i32>} : memref<8x128xf32, #tpu.memory_space<vmem>>, vector<8x128xf32>,
    %c0_134 = arith.constant 0 : index
    %c0_135 = arith.constant 0 : index
    %347 = vector.load %arg11[%c0_134, %c0_135] : memref<8x128xf32, #tpu.memory_space<vmem>>, vector<8x128xf32>
    tpu.vector_store %arg11[%c0_134, %c0_135], %343 {strides = array<i32>} : memref<8x128xf32, #tpu.memory_space<vmem>>, vector<8x128xf32>,
    %c5_i32 = arith.constant 5 : i32
    %348 = arith.index_cast %c5_i32 : i32 to index
    %c0_136 = arith.constant 0 : index
    %c0_137 = arith.constant 0 : index
    %349 = vector.load %arg1[%348, %c0_136, %c0_137] : memref<8x8x512xf32, #tpu.memory_space<vmem>>, vector<1x8x512xf32>
    %350 = vector.shape_cast %349 : vector<1x8x512xf32> to vector<8x512xf32>
    %c0_138 = arith.constant 0 : index
    %c0_139 = arith.constant 0 : index
    %351 = vector.load %arg8[%c0_138, %c0_139] : memref<8x128xf32, #tpu.memory_space<vmem>>, vector<8x128xf32>
    %352 = arith.truncf %351 : vector<8x128xf32> to vector<8x128xbf16>
    %cst_140 = arith.constant dense<0.000000e+00> : vector<8x512xf32>
    %353 = tpu.matmul %352, %3, %cst_140 {dimension_numbers = #tpu.dot_dimension_numbers<[1], [0], [0], [1], [0, 0, 1, 1], [], []>} : vector<8x128xbf16>, vector<128x512xbf16>, vector<8x512xf32> -> vector<8x512xf32>
    %354 = arith.addf %350, %353 : vector<8x512xf32>
    %c0_141 = arith.constant 0 : index
    %c0_142 = arith.constant 0 : index
    %355 = vector.load %arg9[%c0_141, %c0_142] : memref<8x128xf32, #tpu.memory_space<vmem>>, vector<8x128xf32>
    %356 = vector.extract_strided_slice %354 {offsets = [0, 0], sizes = [8, 128], strides = [1, 1]} : vector<8x512xf32> to vector<8x128xf32>
    %357 = arith.negf %356 : vector<8x128xf32>
    %358 = math.exp %357 : vector<8x128xf32>
    %cst_143 = arith.constant 1.000000e+00 : f32
    %359 = vector.broadcast %cst_143 : f32 to vector<8x128xf32>
    %360 = arith.addf %359, %358 : vector<8x128xf32>
    %361 = arith.divf %359, %360 : vector<8x128xf32>
    %362 = vector.extract_strided_slice %354 {offsets = [0, 128], sizes = [8, 128], strides = [1, 1]} : vector<8x512xf32> to vector<8x128xf32>
    %363 = arith.negf %362 : vector<8x128xf32>
    %364 = math.exp %363 : vector<8x128xf32>
    %cst_144 = arith.constant 1.000000e+00 : f32
    %365 = vector.broadcast %cst_144 : f32 to vector<8x128xf32>
    %366 = arith.addf %365, %364 : vector<8x128xf32>
    %367 = arith.divf %365, %366 : vector<8x128xf32>
    %368 = vector.extract_strided_slice %354 {offsets = [0, 256], sizes = [8, 128], strides = [1, 1]} : vector<8x512xf32> to vector<8x128xf32>
    %369 = math.tanh %368 : vector<8x128xf32>
    %370 = vector.extract_strided_slice %354 {offsets = [0, 384], sizes = [8, 128], strides = [1, 1]} : vector<8x512xf32> to vector<8x128xf32>
    %371 = arith.negf %370 : vector<8x128xf32>
    %372 = math.exp %371 : vector<8x128xf32>
    %cst_145 = arith.constant 1.000000e+00 : f32
    %373 = vector.broadcast %cst_145 : f32 to vector<8x128xf32>
    %374 = arith.addf %373, %372 : vector<8x128xf32>
    %375 = arith.divf %373, %374 : vector<8x128xf32>
    %376 = arith.mulf %367, %355 : vector<8x128xf32>
    %377 = arith.mulf %361, %369 : vector<8x128xf32>
    %378 = arith.addf %376, %377 : vector<8x128xf32>
    %379 = math.tanh %378 : vector<8x128xf32>
    %380 = arith.mulf %375, %379 : vector<8x128xf32>
    %c0_146 = arith.constant 0 : index
    %c0_147 = arith.constant 0 : index
    %381 = vector.load %arg8[%c0_146, %c0_147] : memref<8x128xf32, #tpu.memory_space<vmem>>, vector<8x128xf32>
    tpu.vector_store %arg8[%c0_146, %c0_147], %380 {strides = array<i32>} : memref<8x128xf32, #tpu.memory_space<vmem>>, vector<8x128xf32>,
    %c0_148 = arith.constant 0 : index
    %c0_149 = arith.constant 0 : index
    %382 = vector.load %arg9[%c0_148, %c0_149] : memref<8x128xf32, #tpu.memory_space<vmem>>, vector<8x128xf32>
    tpu.vector_store %arg9[%c0_148, %c0_149], %378 {strides = array<i32>} : memref<8x128xf32, #tpu.memory_space<vmem>>, vector<8x128xf32>,
    %c0_150 = arith.constant 0 : index
    %c0_151 = arith.constant 0 : index
    %383 = vector.load %arg10[%c0_150, %c0_151] : memref<8x128xf32, #tpu.memory_space<vmem>>, vector<8x128xf32>
    %384 = tpu.concatenate %380, %383 in 1 : vector<8x128xf32>, vector<8x128xf32> -> vector<8x256xf32>
    %385 = arith.truncf %384 : vector<8x256xf32> to vector<8x256xbf16>
    %cst_152 = arith.constant dense<0.000000e+00> : vector<8x512xf32>
    %386 = tpu.matmul %385, %4, %cst_152 {dimension_numbers = #tpu.dot_dimension_numbers<[1], [0], [0], [1], [0, 0, 1, 1], [], []>} : vector<8x256xbf16>, vector<256x512xbf16>, vector<8x512xf32> -> vector<8x512xf32>
    %387 = arith.addf %386, %7 : vector<8x512xf32>
    %c0_153 = arith.constant 0 : index
    %c0_154 = arith.constant 0 : index
    %388 = vector.load %arg11[%c0_153, %c0_154] : memref<8x128xf32, #tpu.memory_space<vmem>>, vector<8x128xf32>
    %389 = vector.extract_strided_slice %387 {offsets = [0, 0], sizes = [8, 128], strides = [1, 1]} : vector<8x512xf32> to vector<8x128xf32>
    %390 = arith.negf %389 : vector<8x128xf32>
    %391 = math.exp %390 : vector<8x128xf32>
    %cst_155 = arith.constant 1.000000e+00 : f32
    %392 = vector.broadcast %cst_155 : f32 to vector<8x128xf32>
    %393 = arith.addf %392, %391 : vector<8x128xf32>
    %394 = arith.divf %392, %393 : vector<8x128xf32>
    %395 = vector.extract_strided_slice %387 {offsets = [0, 128], sizes = [8, 128], strides = [1, 1]} : vector<8x512xf32> to vector<8x128xf32>
    %396 = arith.negf %395 : vector<8x128xf32>
    %397 = math.exp %396 : vector<8x128xf32>
    %cst_156 = arith.constant 1.000000e+00 : f32
    %398 = vector.broadcast %cst_156 : f32 to vector<8x128xf32>
    %399 = arith.addf %398, %397 : vector<8x128xf32>
    %400 = arith.divf %398, %399 : vector<8x128xf32>
    %401 = vector.extract_strided_slice %387 {offsets = [0, 256], sizes = [8, 128], strides = [1, 1]} : vector<8x512xf32> to vector<8x128xf32>
    %402 = math.tanh %401 : vector<8x128xf32>
    %403 = vector.extract_strided_slice %387 {offsets = [0, 384], sizes = [8, 128], strides = [1, 1]} : vector<8x512xf32> to vector<8x128xf32>
    %404 = arith.negf %403 : vector<8x128xf32>
    %405 = math.exp %404 : vector<8x128xf32>
    %cst_157 = arith.constant 1.000000e+00 : f32
    %406 = vector.broadcast %cst_157 : f32 to vector<8x128xf32>
    %407 = arith.addf %406, %405 : vector<8x128xf32>
    %408 = arith.divf %406, %407 : vector<8x128xf32>
    %409 = arith.mulf %400, %388 : vector<8x128xf32>
    %410 = arith.mulf %394, %402 : vector<8x128xf32>
    %411 = arith.addf %409, %410 : vector<8x128xf32>
    %412 = math.tanh %411 : vector<8x128xf32>
    %413 = arith.mulf %408, %412 : vector<8x128xf32>
    %c0_158 = arith.constant 0 : index
    %c0_159 = arith.constant 0 : index
    %414 = vector.load %arg10[%c0_158, %c0_159] : memref<8x128xf32, #tpu.memory_space<vmem>>, vector<8x128xf32>
    tpu.vector_store %arg10[%c0_158, %c0_159], %413 {strides = array<i32>} : memref<8x128xf32, #tpu.memory_space<vmem>>, vector<8x128xf32>,
    %c0_160 = arith.constant 0 : index
    %c0_161 = arith.constant 0 : index
    %415 = vector.load %arg11[%c0_160, %c0_161] : memref<8x128xf32, #tpu.memory_space<vmem>>, vector<8x128xf32>
    tpu.vector_store %arg11[%c0_160, %c0_161], %411 {strides = array<i32>} : memref<8x128xf32, #tpu.memory_space<vmem>>, vector<8x128xf32>,
    %c6_i32 = arith.constant 6 : i32
    %416 = arith.index_cast %c6_i32 : i32 to index
    %c0_162 = arith.constant 0 : index
    %c0_163 = arith.constant 0 : index
    %417 = vector.load %arg1[%416, %c0_162, %c0_163] : memref<8x8x512xf32, #tpu.memory_space<vmem>>, vector<1x8x512xf32>
    %418 = vector.shape_cast %417 : vector<1x8x512xf32> to vector<8x512xf32>
    %c0_164 = arith.constant 0 : index
    %c0_165 = arith.constant 0 : index
    %419 = vector.load %arg8[%c0_164, %c0_165] : memref<8x128xf32, #tpu.memory_space<vmem>>, vector<8x128xf32>
    %420 = arith.truncf %419 : vector<8x128xf32> to vector<8x128xbf16>
    %cst_166 = arith.constant dense<0.000000e+00> : vector<8x512xf32>
    %421 = tpu.matmul %420, %3, %cst_166 {dimension_numbers = #tpu.dot_dimension_numbers<[1], [0], [0], [1], [0, 0, 1, 1], [], []>} : vector<8x128xbf16>, vector<128x512xbf16>, vector<8x512xf32> -> vector<8x512xf32>
    %422 = arith.addf %418, %421 : vector<8x512xf32>
    %c0_167 = arith.constant 0 : index
    %c0_168 = arith.constant 0 : index
    %423 = vector.load %arg9[%c0_167, %c0_168] : memref<8x128xf32, #tpu.memory_space<vmem>>, vector<8x128xf32>
    %424 = vector.extract_strided_slice %422 {offsets = [0, 0], sizes = [8, 128], strides = [1, 1]} : vector<8x512xf32> to vector<8x128xf32>
    %425 = arith.negf %424 : vector<8x128xf32>
    %426 = math.exp %425 : vector<8x128xf32>
    %cst_169 = arith.constant 1.000000e+00 : f32
    %427 = vector.broadcast %cst_169 : f32 to vector<8x128xf32>
    %428 = arith.addf %427, %426 : vector<8x128xf32>
    %429 = arith.divf %427, %428 : vector<8x128xf32>
    %430 = vector.extract_strided_slice %422 {offsets = [0, 128], sizes = [8, 128], strides = [1, 1]} : vector<8x512xf32> to vector<8x128xf32>
    %431 = arith.negf %430 : vector<8x128xf32>
    %432 = math.exp %431 : vector<8x128xf32>
    %cst_170 = arith.constant 1.000000e+00 : f32
    %433 = vector.broadcast %cst_170 : f32 to vector<8x128xf32>
    %434 = arith.addf %433, %432 : vector<8x128xf32>
    %435 = arith.divf %433, %434 : vector<8x128xf32>
    %436 = vector.extract_strided_slice %422 {offsets = [0, 256], sizes = [8, 128], strides = [1, 1]} : vector<8x512xf32> to vector<8x128xf32>
    %437 = math.tanh %436 : vector<8x128xf32>
    %438 = vector.extract_strided_slice %422 {offsets = [0, 384], sizes = [8, 128], strides = [1, 1]} : vector<8x512xf32> to vector<8x128xf32>
    %439 = arith.negf %438 : vector<8x128xf32>
    %440 = math.exp %439 : vector<8x128xf32>
    %cst_171 = arith.constant 1.000000e+00 : f32
    %441 = vector.broadcast %cst_171 : f32 to vector<8x128xf32>
    %442 = arith.addf %441, %440 : vector<8x128xf32>
    %443 = arith.divf %441, %442 : vector<8x128xf32>
    %444 = arith.mulf %435, %423 : vector<8x128xf32>
    %445 = arith.mulf %429, %437 : vector<8x128xf32>
    %446 = arith.addf %444, %445 : vector<8x128xf32>
    %447 = math.tanh %446 : vector<8x128xf32>
    %448 = arith.mulf %443, %447 : vector<8x128xf32>
    %c0_172 = arith.constant 0 : index
    %c0_173 = arith.constant 0 : index
    %449 = vector.load %arg8[%c0_172, %c0_173] : memref<8x128xf32, #tpu.memory_space<vmem>>, vector<8x128xf32>
    tpu.vector_store %arg8[%c0_172, %c0_173], %448 {strides = array<i32>} : memref<8x128xf32, #tpu.memory_space<vmem>>, vector<8x128xf32>,
    %c0_174 = arith.constant 0 : index
    %c0_175 = arith.constant 0 : index
    %450 = vector.load %arg9[%c0_174, %c0_175] : memref<8x128xf32, #tpu.memory_space<vmem>>, vector<8x128xf32>
    tpu.vector_store %arg9[%c0_174, %c0_175], %446 {strides = array<i32>} : memref<8x128xf32, #tpu.memory_space<vmem>>, vector<8x128xf32>,
    %c0_176 = arith.constant 0 : index
    %c0_177 = arith.constant 0 : index
    %451 = vector.load %arg10[%c0_176, %c0_177] : memref<8x128xf32, #tpu.memory_space<vmem>>, vector<8x128xf32>
    %452 = tpu.concatenate %448, %451 in 1 : vector<8x128xf32>, vector<8x128xf32> -> vector<8x256xf32>
    %453 = arith.truncf %452 : vector<8x256xf32> to vector<8x256xbf16>
    %cst_178 = arith.constant dense<0.000000e+00> : vector<8x512xf32>
    %454 = tpu.matmul %453, %4, %cst_178 {dimension_numbers = #tpu.dot_dimension_numbers<[1], [0], [0], [1], [0, 0, 1, 1], [], []>} : vector<8x256xbf16>, vector<256x512xbf16>, vector<8x512xf32> -> vector<8x512xf32>
    %455 = arith.addf %454, %7 : vector<8x512xf32>
    %c0_179 = arith.constant 0 : index
    %c0_180 = arith.constant 0 : index
    %456 = vector.load %arg11[%c0_179, %c0_180] : memref<8x128xf32, #tpu.memory_space<vmem>>, vector<8x128xf32>
    %457 = vector.extract_strided_slice %455 {offsets = [0, 0], sizes = [8, 128], strides = [1, 1]} : vector<8x512xf32> to vector<8x128xf32>
    %458 = arith.negf %457 : vector<8x128xf32>
    %459 = math.exp %458 : vector<8x128xf32>
    %cst_181 = arith.constant 1.000000e+00 : f32
    %460 = vector.broadcast %cst_181 : f32 to vector<8x128xf32>
    %461 = arith.addf %460, %459 : vector<8x128xf32>
    %462 = arith.divf %460, %461 : vector<8x128xf32>
    %463 = vector.extract_strided_slice %455 {offsets = [0, 128], sizes = [8, 128], strides = [1, 1]} : vector<8x512xf32> to vector<8x128xf32>
    %464 = arith.negf %463 : vector<8x128xf32>
    %465 = math.exp %464 : vector<8x128xf32>
    %cst_182 = arith.constant 1.000000e+00 : f32
    %466 = vector.broadcast %cst_182 : f32 to vector<8x128xf32>
    %467 = arith.addf %466, %465 : vector<8x128xf32>
    %468 = arith.divf %466, %467 : vector<8x128xf32>
    %469 = vector.extract_strided_slice %455 {offsets = [0, 256], sizes = [8, 128], strides = [1, 1]} : vector<8x512xf32> to vector<8x128xf32>
    %470 = math.tanh %469 : vector<8x128xf32>
    %471 = vector.extract_strided_slice %455 {offsets = [0, 384], sizes = [8, 128], strides = [1, 1]} : vector<8x512xf32> to vector<8x128xf32>
    %472 = arith.negf %471 : vector<8x128xf32>
    %473 = math.exp %472 : vector<8x128xf32>
    %cst_183 = arith.constant 1.000000e+00 : f32
    %474 = vector.broadcast %cst_183 : f32 to vector<8x128xf32>
    %475 = arith.addf %474, %473 : vector<8x128xf32>
    %476 = arith.divf %474, %475 : vector<8x128xf32>
    %477 = arith.mulf %468, %456 : vector<8x128xf32>
    %478 = arith.mulf %462, %470 : vector<8x128xf32>
    %479 = arith.addf %477, %478 : vector<8x128xf32>
    %480 = math.tanh %479 : vector<8x128xf32>
    %481 = arith.mulf %476, %480 : vector<8x128xf32>
    %c0_184 = arith.constant 0 : index
    %c0_185 = arith.constant 0 : index
    %482 = vector.load %arg10[%c0_184, %c0_185] : memref<8x128xf32, #tpu.memory_space<vmem>>, vector<8x128xf32>
    tpu.vector_store %arg10[%c0_184, %c0_185], %481 {strides = array<i32>} : memref<8x128xf32, #tpu.memory_space<vmem>>, vector<8x128xf32>,
    %c0_186 = arith.constant 0 : index
    %c0_187 = arith.constant 0 : index
    %483 = vector.load %arg11[%c0_186, %c0_187] : memref<8x128xf32, #tpu.memory_space<vmem>>, vector<8x128xf32>
    tpu.vector_store %arg11[%c0_186, %c0_187], %479 {strides = array<i32>} : memref<8x128xf32, #tpu.memory_space<vmem>>, vector<8x128xf32>,
    %c7_i32 = arith.constant 7 : i32
    %484 = arith.index_cast %c7_i32 : i32 to index
    %c0_188 = arith.constant 0 : index
    %c0_189 = arith.constant 0 : index
    %485 = vector.load %arg1[%484, %c0_188, %c0_189] : memref<8x8x512xf32, #tpu.memory_space<vmem>>, vector<1x8x512xf32>
    %486 = vector.shape_cast %485 : vector<1x8x512xf32> to vector<8x512xf32>
    %c0_190 = arith.constant 0 : index
    %c0_191 = arith.constant 0 : index
    %487 = vector.load %arg8[%c0_190, %c0_191] : memref<8x128xf32, #tpu.memory_space<vmem>>, vector<8x128xf32>
    %488 = arith.truncf %487 : vector<8x128xf32> to vector<8x128xbf16>
    %cst_192 = arith.constant dense<0.000000e+00> : vector<8x512xf32>
    %489 = tpu.matmul %488, %3, %cst_192 {dimension_numbers = #tpu.dot_dimension_numbers<[1], [0], [0], [1], [0, 0, 1, 1], [], []>} : vector<8x128xbf16>, vector<128x512xbf16>, vector<8x512xf32> -> vector<8x512xf32>
    %490 = arith.addf %486, %489 : vector<8x512xf32>
    %c0_193 = arith.constant 0 : index
    %c0_194 = arith.constant 0 : index
    %491 = vector.load %arg9[%c0_193, %c0_194] : memref<8x128xf32, #tpu.memory_space<vmem>>, vector<8x128xf32>
    %492 = vector.extract_strided_slice %490 {offsets = [0, 0], sizes = [8, 128], strides = [1, 1]} : vector<8x512xf32> to vector<8x128xf32>
    %493 = arith.negf %492 : vector<8x128xf32>
    %494 = math.exp %493 : vector<8x128xf32>
    %cst_195 = arith.constant 1.000000e+00 : f32
    %495 = vector.broadcast %cst_195 : f32 to vector<8x128xf32>
    %496 = arith.addf %495, %494 : vector<8x128xf32>
    %497 = arith.divf %495, %496 : vector<8x128xf32>
    %498 = vector.extract_strided_slice %490 {offsets = [0, 128], sizes = [8, 128], strides = [1, 1]} : vector<8x512xf32> to vector<8x128xf32>
    %499 = arith.negf %498 : vector<8x128xf32>
    %500 = math.exp %499 : vector<8x128xf32>
    %cst_196 = arith.constant 1.000000e+00 : f32
    %501 = vector.broadcast %cst_196 : f32 to vector<8x128xf32>
    %502 = arith.addf %501, %500 : vector<8x128xf32>
    %503 = arith.divf %501, %502 : vector<8x128xf32>
    %504 = vector.extract_strided_slice %490 {offsets = [0, 256], sizes = [8, 128], strides = [1, 1]} : vector<8x512xf32> to vector<8x128xf32>
    %505 = math.tanh %504 : vector<8x128xf32>
    %506 = vector.extract_strided_slice %490 {offsets = [0, 384], sizes = [8, 128], strides = [1, 1]} : vector<8x512xf32> to vector<8x128xf32>
    %507 = arith.negf %506 : vector<8x128xf32>
    %508 = math.exp %507 : vector<8x128xf32>
    %cst_197 = arith.constant 1.000000e+00 : f32
    %509 = vector.broadcast %cst_197 : f32 to vector<8x128xf32>
    %510 = arith.addf %509, %508 : vector<8x128xf32>
    %511 = arith.divf %509, %510 : vector<8x128xf32>
    %512 = arith.mulf %503, %491 : vector<8x128xf32>
    %513 = arith.mulf %497, %505 : vector<8x128xf32>
    %514 = arith.addf %512, %513 : vector<8x128xf32>
    %515 = math.tanh %514 : vector<8x128xf32>
    %516 = arith.mulf %511, %515 : vector<8x128xf32>
    %c0_198 = arith.constant 0 : index
    %c0_199 = arith.constant 0 : index
    %517 = vector.load %arg8[%c0_198, %c0_199] : memref<8x128xf32, #tpu.memory_space<vmem>>, vector<8x128xf32>
    tpu.vector_store %arg8[%c0_198, %c0_199], %516 {strides = array<i32>} : memref<8x128xf32, #tpu.memory_space<vmem>>, vector<8x128xf32>,
    %c0_200 = arith.constant 0 : index
    %c0_201 = arith.constant 0 : index
    %518 = vector.load %arg9[%c0_200, %c0_201] : memref<8x128xf32, #tpu.memory_space<vmem>>, vector<8x128xf32>
    tpu.vector_store %arg9[%c0_200, %c0_201], %514 {strides = array<i32>} : memref<8x128xf32, #tpu.memory_space<vmem>>, vector<8x128xf32>,
    %c0_202 = arith.constant 0 : index
    %c0_203 = arith.constant 0 : index
    %519 = vector.load %arg10[%c0_202, %c0_203] : memref<8x128xf32, #tpu.memory_space<vmem>>, vector<8x128xf32>
    %520 = tpu.concatenate %516, %519 in 1 : vector<8x128xf32>, vector<8x128xf32> -> vector<8x256xf32>
    %521 = arith.truncf %520 : vector<8x256xf32> to vector<8x256xbf16>
    %cst_204 = arith.constant dense<0.000000e+00> : vector<8x512xf32>
    %522 = tpu.matmul %521, %4, %cst_204 {dimension_numbers = #tpu.dot_dimension_numbers<[1], [0], [0], [1], [0, 0, 1, 1], [], []>} : vector<8x256xbf16>, vector<256x512xbf16>, vector<8x512xf32> -> vector<8x512xf32>
    %523 = arith.addf %522, %7 : vector<8x512xf32>
    %c0_205 = arith.constant 0 : index
    %c0_206 = arith.constant 0 : index
    %524 = vector.load %arg11[%c0_205, %c0_206] : memref<8x128xf32, #tpu.memory_space<vmem>>, vector<8x128xf32>
    %525 = vector.extract_strided_slice %523 {offsets = [0, 0], sizes = [8, 128], strides = [1, 1]} : vector<8x512xf32> to vector<8x128xf32>
    %526 = arith.negf %525 : vector<8x128xf32>
    %527 = math.exp %526 : vector<8x128xf32>
    %cst_207 = arith.constant 1.000000e+00 : f32
    %528 = vector.broadcast %cst_207 : f32 to vector<8x128xf32>
    %529 = arith.addf %528, %527 : vector<8x128xf32>
    %530 = arith.divf %528, %529 : vector<8x128xf32>
    %531 = vector.extract_strided_slice %523 {offsets = [0, 128], sizes = [8, 128], strides = [1, 1]} : vector<8x512xf32> to vector<8x128xf32>
    %532 = arith.negf %531 : vector<8x128xf32>
    %533 = math.exp %532 : vector<8x128xf32>
    %cst_208 = arith.constant 1.000000e+00 : f32
    %534 = vector.broadcast %cst_208 : f32 to vector<8x128xf32>
    %535 = arith.addf %534, %533 : vector<8x128xf32>
    %536 = arith.divf %534, %535 : vector<8x128xf32>
    %537 = vector.extract_strided_slice %523 {offsets = [0, 256], sizes = [8, 128], strides = [1, 1]} : vector<8x512xf32> to vector<8x128xf32>
    %538 = math.tanh %537 : vector<8x128xf32>
    %539 = vector.extract_strided_slice %523 {offsets = [0, 384], sizes = [8, 128], strides = [1, 1]} : vector<8x512xf32> to vector<8x128xf32>
    %540 = arith.negf %539 : vector<8x128xf32>
    %541 = math.exp %540 : vector<8x128xf32>
    %cst_209 = arith.constant 1.000000e+00 : f32
    %542 = vector.broadcast %cst_209 : f32 to vector<8x128xf32>
    %543 = arith.addf %542, %541 : vector<8x128xf32>
    %544 = arith.divf %542, %543 : vector<8x128xf32>
    %545 = arith.mulf %536, %524 : vector<8x128xf32>
    %546 = arith.mulf %530, %538 : vector<8x128xf32>
    %547 = arith.addf %545, %546 : vector<8x128xf32>
    %548 = math.tanh %547 : vector<8x128xf32>
    %549 = arith.mulf %544, %548 : vector<8x128xf32>
    %c0_210 = arith.constant 0 : index
    %c0_211 = arith.constant 0 : index
    %550 = vector.load %arg10[%c0_210, %c0_211] : memref<8x128xf32, #tpu.memory_space<vmem>>, vector<8x128xf32>
    tpu.vector_store %arg10[%c0_210, %c0_211], %549 {strides = array<i32>} : memref<8x128xf32, #tpu.memory_space<vmem>>, vector<8x128xf32>,
    %c0_212 = arith.constant 0 : index
    %c0_213 = arith.constant 0 : index
    %551 = vector.load %arg11[%c0_212, %c0_213] : memref<8x128xf32, #tpu.memory_space<vmem>>, vector<8x128xf32>
    tpu.vector_store %arg11[%c0_212, %c0_213], %547 {strides = array<i32>} : memref<8x128xf32, #tpu.memory_space<vmem>>, vector<8x128xf32>,
    %c8_i32 = arith.constant 8 : i32
    %c0_i32_214 = arith.constant 0 : i32
    %552 = arith.cmpi eq, %arg0, %c0_i32_214 : i32
    %553 = arith.extui %552 : i1 to i32
    %c0_i32_215 = arith.constant 0 : i32
    %554 = arith.cmpi ne, %553, %c0_i32_215 : i32
    scf.if %554 {
      %c0_216 = arith.constant 0 : index
      %c0_217 = arith.constant 0 : index
      %555 = vector.load %arg10[%c0_216, %c0_217] : memref<8x128xf32, #tpu.memory_space<vmem>>, vector<8x128xf32>
      %556 = arith.truncf %555 : vector<8x128xf32> to vector<8x128xbf16>
      %c0_218 = arith.constant 0 : index
      %c0_219 = arith.constant 0 : index
      %557 = vector.load %arg5[%c0_218, %c0_219] : memref<128x128xbf16, #tpu.memory_space<vmem>>, vector<128x128xbf16>
      %cst_220 = arith.constant dense<0.000000e+00> : vector<8x128xf32>
      %558 = tpu.matmul %556, %557, %cst_220 {dimension_numbers = #tpu.dot_dimension_numbers<[1], [0], [0], [1], [0, 0, 1, 1], [], []>} : vector<8x128xbf16>, vector<128x128xbf16>, vector<8x128xf32> -> vector<8x128xf32>
      %c0_221 = arith.constant 0 : index
      %c0_222 = arith.constant 0 : index
      %559 = vector.load %arg6[%c0_221, %c0_222] : memref<1x128xf32, #tpu.memory_space<vmem>>, vector<1x128xf32>
      %560 = vector.broadcast %559 : vector<1x128xf32> to vector<8x128xf32>
      %561 = arith.addf %558, %560 : vector<8x128xf32>
      %c0_223 = arith.constant 0 : index
      %c0_224 = arith.constant 0 : index
      %562 = vector.load %arg7[%c0_223, %c0_224] : memref<8x128xf32, #tpu.memory_space<vmem>>, vector<8x128xf32>
      tpu.vector_store %arg7[%c0_223, %c0_224], %561 {strides = array<i32>} : memref<8x128xf32, #tpu.memory_space<vmem>>, vector<8x128xf32>,
    } else {
    }
    return
  }
  func.func @transform_0(%arg0: i32) -> (i32, i32, i32) {
    %c0_i32 = arith.constant 0 : i32
    %c0_i32_0 = arith.constant 0 : i32
    %c0_i32_1 = arith.constant 0 : i32
    return %arg0, %c0_i32, %c0_i32_0 : i32, i32, i32
  }
  func.func @transform_1(%arg0: i32) -> (i32, i32) {
    %c0_i32 = arith.constant 0 : i32
    %c0_i32_0 = arith.constant 0 : i32
    %c0_i32_1 = arith.constant 0 : i32
    return %c0_i32, %c0_i32_0 : i32, i32
  }
  func.func @transform_2(%arg0: i32) -> (i32, i32) {
    %c0_i32 = arith.constant 0 : i32
    %c0_i32_0 = arith.constant 0 : i32
    %c0_i32_1 = arith.constant 0 : i32
    return %c0_i32, %c0_i32_0 : i32, i32
  }
  func.func @transform_3(%arg0: i32) -> (i32, i32) {
    %c0_i32 = arith.constant 0 : i32
    %c0_i32_0 = arith.constant 0 : i32
    %c0_i32_1 = arith.constant 0 : i32
    return %c0_i32, %c0_i32_0 : i32, i32
  }
  func.func @transform_4(%arg0: i32) -> (i32, i32) {
    %c0_i32 = arith.constant 0 : i32
    %c0_i32_0 = arith.constant 0 : i32
    %c0_i32_1 = arith.constant 0 : i32
    return %c0_i32, %c0_i32_0 : i32, i32
  }
  func.func @transform_5(%arg0: i32) -> (i32, i32) {
    %c0_i32 = arith.constant 0 : i32
    %c0_i32_0 = arith.constant 0 : i32
    %c0_i32_1 = arith.constant 0 : i32
    return %c0_i32, %c0_i32_0 : i32, i32
  }
  func.func @transform_6(%arg0: i32) -> (i32, i32) {
    %c0_i32 = arith.constant 0 : i32
    %c0_i32_0 = arith.constant 0 : i32
    %c0_i32_1 = arith.constant 0 : i32
    return %c0_i32, %c0_i32_0 : i32, i32
  }
}

</mosaic_0001>

<bundles_post_ra>
// kernel: lstm_model_forward.2
= control target key start
LH: loop header
LB: loop body
LE: loop exit
PB: predicated region body
PF: predicated region fallthrough
CT: control target
= control target key end

     0   :  { %8 = vsyncpa [#allocation3], 0  ;;  %s817_s0 = inlined_call_operand.hbm [shape: bf16[8,8,128], index: 0, kind: input, shape index: {}]   ;;  %s818_s1 = inlined_call_operand.hbm [shape: bf16[128,512], index: 1, kind: input, shape index: {}]   ;;  %s819_s2 = inlined_call_operand.hbm [shape: f32[1,512], index: 2, kind: input, shape index: {}]   ;;  %s820_s3 = inlined_call_operand.hbm [shape: f32[8,8,512], index: 3, kind: output, shape index: {}]  }
   0x1   :  { %9 = vsyncpa [#allocation6], 0 }
   0x2   :  { %10 = vsyncpa [#allocation4], 0  ;;  %s690_s12 = smov [#allocation5]   ;;  %s596_s16 = scalar_lea.hbm %s818_s1, 4096 }
   0x3   :  { %s28_s13 = sshll.u32 %s690_s12, 4  ;;  %p597_p0 = scmp.ne.s32.totalorder %s818_s1, %s596_s16  ;;  %s29_s13 = int_to_ptr.vmem [resolvable:$true] %s28_s13 }
   0x4   :  { %p600_p1 = scmp.lt.u32.totalorder %s596_s16, %s818_s1 }
   0x6   :  { %p602_p2 = pnand %p600_p1, %p597_p0 }
   0x8   :  { %605 = shalt.err (!%p602_p2)
}
   0x9   :  { %s606_s21 = scalar_lea.vmem %s29_s13, 4096  ;;  %p611_p4 = scmp.lt.s32.totalorder %s29_s13, %s29_s13 }
   0xa   :  { %p607_p3 = scmp.ne.s32.totalorder %s29_s13, %s606_s21  ;;  %p612_p5 = scmp.lt.s32.totalorder %s606_s21, %s606_s21 }
   0xc   :  { %p613_p6 = por %p612_p5, %p611_p4 }
   0xe   :  { %p614_p7 = pnand %p613_p6, %p607_p3 }
  0x10   :  { %617 = shalt.err (!%p614_p7)
}
  0x11   :  { %s691_s22 = smov 256   ;;  %s692_s23 = smov 16  }
  0x12   :  { %34 = dma.hbm_to_vmem [thread:$0]  %s818_s1, 4096, %s29_s13, [#allocation6], %s691_s22, %s691_s22, %s692_s23  }
  0x13   :  { %s693_s26 = smov [#allocation2]   ;;  %s618_s30 = scalar_lea.hbm %s817_s0, 512 }
  0x14   :  { %s16_s27 = sshll.u32 %s693_s26, 4  ;;  %p619_p8 = scmp.ne.s32.totalorder %s817_s0, %s618_s30  ;;  %s17_s27 = int_to_ptr.vmem [resolvable:$true] %s16_s27 }
  0x15   :  { %p622_p9 = scmp.lt.u32.totalorder %s618_s30, %s817_s0 }
  0x17   :  { %p624_p10 = pnand %p622_p9, %p619_p8 }
  0x19   :  { %627 = shalt.err (!%p624_p10)
}
  0x1a   :  { %s628_s8 = scalar_lea.vmem %s17_s27, 512  ;;  %p633_p12 = scmp.lt.s32.totalorder %s17_s27, %s17_s27 }
  0x1b   :  { %p629_p11 = scmp.ne.s32.totalorder %s17_s27, %s628_s8  ;;  %p634_p13 = scmp.lt.s32.totalorder %s628_s8, %s628_s8 }
  0x1d   :  { %p635_p0 = por %p634_p13, %p633_p12 }
  0x1f   :  { %p636_p1 = pnand %p635_p0, %p629_p11 }
  0x21   :  { %639 = shalt.err (!%p636_p1)
}
  0x22   :  { %s694_s1 = smov 64   ;;  %s695_s9 = smov 4  }
  0x23   :  { %22 = dma.hbm_to_vmem [thread:$0]  %s817_s0, 512, %s17_s27, [#allocation3], %s694_s1, %s694_s1, %s695_s9  }
  0x24   :  { %s696_s12 = smov [#allocation7]   ;;  %s640_s16 = scalar_lea.hbm %s819_s2, 64 }
  0x25   :  { %s41_s13 = sshll.u32 %s696_s12, 4  ;;  %p641_p2 = scmp.ne.s32.totalorder %s819_s2, %s640_s16  ;;  %s42_s13 = int_to_ptr.vmem [resolvable:$true] %s41_s13 }
  0x26   :  { %p644_p3 = scmp.lt.u32.totalorder %s640_s16, %s819_s2 }
  0x28   :  { %p646_p4 = pnand %p644_p3, %p641_p2 }
  0x2a   :  { %649 = shalt.err (!%p646_p4)
}
  0x2b   :  { %s650_s21 = scalar_lea.vmem %s42_s13, 64  ;;  %p655_p6 = scmp.lt.s32.totalorder %s42_s13, %s42_s13 }
  0x2c   :  { %p651_p5 = scmp.ne.s32.totalorder %s42_s13, %s650_s21  ;;  %p656_p7 = scmp.lt.s32.totalorder %s650_s21, %s650_s21 }
  0x2e   :  { %p657_p8 = por %p656_p7, %p655_p6 }
  0x30   :  { %p658_p9 = pnand %p657_p8, %p651_p5 }
  0x32   :  { %661 = shalt.err (!%p658_p9)
}
  0x33   :  { %44 = dma.hbm_to_vmem [thread:$0]  %s819_s2, 64, %s42_s13, [#allocation6]  }
  0x34   :  { %684 = dma.done.wait [#allocation3], 512  }
  0x35   :  { %685 = vsyncadd [#allocation3], 4294966784 }
  0x36   :  { %686 = dma.done.wait [#allocation6], 4160  }
  0x37   :  { %687 = vsyncadd [#allocation6], 4294963136  ;;  %v697_v0 = vmov 0   ;;  %v544_v1 = vld [vmem:[#allocation5 + $0x4] ss:$16 sps:$4 sm:$0xff]   ;;  %v593_v34 = vld [vmem:[#allocation2 + $0x8] sm:$0xff]   ;;  %v97_v37 = vlaneseq }
  0x38   :  { %333 = vmatprep.mubr.bf16.mxu0 %v697_v0  ;;  %406 = vmatprep.mubr.bf16.mxu1 %v697_v0  ;;  %v546_v2 = vld [vmem:[#allocation5 + $0xc] ss:$16 sps:$4 sm:$0xff]   ;;  %v548_v3 = vld [vmem:[#allocation5] ss:$16 sps:$4 sm:$0xff]   ;;  %v549_v4 = vld [vmem:[#allocation5 + $0x8] ss:$16 sps:$4 sm:$0xff]  }
  0x39   :  { %301 = vmatprep.subr.bf16.mxu0 %v544_v1  ;;  %374 = vmatprep.subr.bf16.mxu1 %v546_v2  ;;  %v550_v5 = vld [vmem:[#allocation5 + $0x24] ss:$16 sps:$4 sm:$0xff]   ;;  %v552_v6 = vld [vmem:[#allocation5 + $0x2c] ss:$16 sps:$4 sm:$0xff]   ;;  %v554_v7 = vld [vmem:[#allocation5 + $0x20] ss:$16 sps:$4 sm:$0xff]  }
  0x3a   :  { %302 = vmatpush1.bf16.msra.mxu0 %v548_v3  ;;  %375 = vmatpush1.bf16.msra.mxu1 %v549_v4  ;;  %v555_v8 = vld [vmem:[#allocation5 + $0x28] ss:$16 sps:$4 sm:$0xff]   ;;  %v556_v9 = vld [vmem:[#allocation5 + $0x44] ss:$16 sps:$4 sm:$0xff]   ;;  %v558_v10 = vld [vmem:[#allocation5 + $0x4c] ss:$16 sps:$4 sm:$0xff]  }
  0x3b   :  { %303 = vmatprep.subr.bf16.mxu0 %v550_v5  ;;  %376 = vmatprep.subr.bf16.mxu1 %v552_v6  ;;  %v560_v11 = vld [vmem:[#allocation5 + $0x40] ss:$16 sps:$4 sm:$0xff]   ;;  %v561_v12 = vld [vmem:[#allocation5 + $0x48] ss:$16 sps:$4 sm:$0xff]   ;;  %v562_v13 = vld [vmem:[#allocation5 + $0x64] ss:$16 sps:$4 sm:$0xff]  }
  0x3c   :  { %v564_v14 = vld [vmem:[#allocation5 + $0x6c] ss:$16 sps:$4 sm:$0xff]   ;;  %v566_v15 = vld [vmem:[#allocation5 + $0x60] ss:$16 sps:$4 sm:$0xff]   ;;  %v567_v16 = vld [vmem:[#allocation5 + $0x68] ss:$16 sps:$4 sm:$0xff]  }
  0x3d   :  { %v568_v17 = vld [vmem:[#allocation5 + $0x84] ss:$16 sps:$4 sm:$0xff]   ;;  %v570_v18 = vld [vmem:[#allocation5 + $0x8c] ss:$16 sps:$4 sm:$0xff]   ;;  %v572_v19 = vld [vmem:[#allocation5 + $0x80] ss:$16 sps:$4 sm:$0xff]  }
  0x3e   :  { %304 = vmatpush1.bf16.msra.mxu0 %v554_v7  ;;  %377 = vmatpush1.bf16.msra.mxu1 %v555_v8  ;;  %v573_v20 = vld [vmem:[#allocation5 + $0x88] ss:$16 sps:$4 sm:$0xff]   ;;  %v574_v21 = vld [vmem:[#allocation5 + $0xa4] ss:$16 sps:$4 sm:$0xff]   ;;  %v576_v22 = vld [vmem:[#allocation5 + $0xac] ss:$16 sps:$4 sm:$0xff]  }
  0x3f   :  { %305 = vmatprep.subr.bf16.mxu0 %v556_v9  ;;  %378 = vmatprep.subr.bf16.mxu1 %v558_v10  ;;  %v578_v23 = vld [vmem:[#allocation5 + $0xa0] ss:$16 sps:$4 sm:$0xff]   ;;  %v579_v24 = vld [vmem:[#allocation5 + $0xa8] ss:$16 sps:$4 sm:$0xff]   ;;  %v580_v25 = vld [vmem:[#allocation5 + $0xc4] ss:$16 sps:$4 sm:$0xff]  }
  0x40   :  { %v582_v26 = vld [vmem:[#allocation5 + $0xcc] ss:$16 sps:$4 sm:$0xff]   ;;  %v584_v27 = vld [vmem:[#allocation5 + $0xc0] ss:$16 sps:$4 sm:$0xff]   ;;  %v585_v28 = vld [vmem:[#allocation5 + $0xc8] ss:$16 sps:$4 sm:$0xff]  }
  0x41   :  { %v586_v29 = vld [vmem:[#allocation5 + $0xe4] ss:$16 sps:$4 sm:$0xff]   ;;  %v588_v30 = vld [vmem:[#allocation5 + $0xec] ss:$16 sps:$4 sm:$0xff]   ;;  %v590_v31 = vld [vmem:[#allocation5 + $0xe0] ss:$16 sps:$4 sm:$0xff]  }
  0x42   :  { %306 = vmatpush1.bf16.msra.mxu0 %v560_v11  ;;  %379 = vmatpush1.bf16.msra.mxu1 %v561_v12  ;;  %v591_v32 = vld [vmem:[#allocation5 + $0xe8] ss:$16 sps:$4 sm:$0xff]   ;;  %v592_v33 = vld [vmem:[#allocation2] sm:$0xff]   ;;  %v594_v35 = vld [vmem:[#allocation2 + $0x10] sm:$0xff]   ;;  %v98_v38 = vshrl.u32 %v97_v37, 7  ;;  %s698_s2 = smov [#allocation8]  }
  0x43   :  { %307 = vmatprep.subr.bf16.mxu0 %v562_v13  ;;  %380 = vmatprep.subr.bf16.mxu1 %v564_v14  ;;  %v595_v36 = vld [vmem:[#allocation2 + $0x18] sm:$0xff]   ;;  %v95_v41 = vld [vmem:[#allocation7] sm:$0xf]  ;;  %s484_s23 = sshll.u32 %s698_s2, 4  ;;  %s485_s23 = int_to_ptr.vmem [resolvable:$true] %s484_s23 }
  0x44   :  { %v99_v39 = vsub.s32 0, %v98_v38  ;;  %v107_v40 = vsub.s32 2, %v98_v38  ;;  %v103_v42 = vsub.s32 1, %v98_v38  ;;  %v111_v43 = vsub.s32 3, %v98_v38  ;;  %s662_s24 = scalar_lea.vmem %s485_s23, 4096  ;;  %p667_p11 = scmp.lt.s32.totalorder %s485_s23, %s485_s23 }
  0x45   :  { %p663_p10 = scmp.ne.s32.totalorder %s485_s23, %s662_s24  ;;  %p668_p12 = scmp.lt.s32.totalorder %s662_s24, %s662_s24 }
  0x46   :  { %308 = vmatpush1.bf16.msra.mxu0 %v566_v15  ;;  %381 = vmatpush1.bf16.msra.mxu1 %v567_v16  ;;  %v765_v44 = vrot.slane %v95_v41, %v99_v39  ;;  %v767_v45 = vrot.slane %v95_v41, %v107_v40  ;;  %v769_v46 = vrot.slane %v95_v41, %v103_v42 }
  0x47   :  { %309 = vmatprep.subr.bf16.mxu0 %v568_v17  ;;  %382 = vmatprep.subr.bf16.mxu1 %v570_v18  ;;  %v771_v47 = vrot.slane %v95_v41, %v111_v43  ;;  %p669_p13 = por %p668_p12, %p667_p11 }
  0x49   :  { %p670_p0 = pnand %p669_p13, %p663_p10 }
  0x4a   :  { %310 = vmatpush1.bf16.msra.mxu0 %v572_v19  ;;  %383 = vmatpush1.bf16.msra.mxu1 %v573_v20 }
  0x4b   :  { %311 = vmatprep.subr.bf16.mxu0 %v574_v21  ;;  %384 = vmatprep.subr.bf16.mxu1 %v576_v22 }
  0x4e   :  { %312 = vmatpush1.bf16.msra.mxu0 %v578_v23  ;;  %385 = vmatpush1.bf16.msra.mxu1 %v579_v24 }
  0x4f   :  { %313 = vmatprep.subr.bf16.mxu0 %v580_v25  ;;  %386 = vmatprep.subr.bf16.mxu1 %v582_v26 }
  0x52   :  { %314 = vmatpush1.bf16.msra.mxu0 %v584_v27  ;;  %387 = vmatpush1.bf16.msra.mxu1 %v585_v28 }
  0x53   :  { %315 = vmatprep.subr.bf16.mxu0 %v586_v29  ;;  %388 = vmatprep.subr.bf16.mxu1 %v588_v30 }
  0x56   :  { %316 = vmatpush1.bf16.msra.mxu0 %v590_v31  ;;  %389 = vmatpush1.bf16.msra.mxu1 %v591_v32 }
  0x59   :  { %334 = vmatmul.mubr.bf16.vlgmr.msra.gmra.mrb[0].mxu0 %v592_v33  ;;  %407 = vmatmul.mubr.bf16.vlgmr.msra.gmra.mrb[0].mxu1 %v592_v33 }
  0x5a   :  { %343 = vmatprep.mubr.bf16.mxu0 %v697_v0  ;;  %416 = vmatprep.mubr.bf16.mxu1 %v697_v0 }
  0x61   :  { %344 = vmatmul.mubr.bf16.gmra.mrb[4].mxu0 %v593_v34  ;;  %417 = vmatmul.mubr.bf16.gmra.mrb[4].mxu1 %v593_v34 }
  0x62   :  { %353 = vmatprep.mubr.bf16.mxu0 %v697_v0  ;;  %426 = vmatprep.mubr.bf16.mxu1 %v697_v0 }
  0x69   :  { %354 = vmatmul.mubr.bf16.gmra.mrb[8].mxu0 %v594_v35  ;;  %427 = vmatmul.mubr.bf16.gmra.mrb[8].mxu1 %v594_v35 }
  0x6a   :  { %363 = vmatprep.mubr.bf16.mxu0 %v697_v0  ;;  %436 = vmatprep.mubr.bf16.mxu1 %v697_v0 }
  0x71   :  { %364 = vmatmul.mubr.bf16.gmra.mrb[12].mxu0 %v595_v36  ;;  %437 = vmatmul.mubr.bf16.gmra.mrb[12].mxu1 %v595_v36 }
 0x12c   :  { %v335_v48 = vpop.f32.mrb[0].mxu0  ;;  %v408_v49 = vpop.f32.mrb[0].mxu1 }
 0x12d   :  { %v336_v50 = vadd.f32 %v335_v48, %v765_v44  ;;  %v409_v51 = vadd.f32 %v408_v49, %v767_v45  ;;  %v337_v52 = vpop.f32.mrb[1].mxu0  ;;  %v410_v53 = vpop.f32.mrb[1].mxu1 }
 0x12e   :  { %v338_v54 = vadd.f32 %v337_v52, %v769_v46  ;;  %v411_v55 = vadd.f32 %v410_v53, %v771_v47  ;;  %v339_v56 = vpop.f32.mrb[2].mxu0  ;;  %v412_v57 = vpop.f32.mrb[2].mxu1 }
 0x12f   :  { %447 = vst [vmem:[#allocation8] sm:$0xff] %v336_v50  ;;  %449 = vst [vmem:[#allocation8 + $0x10] sm:$0xff] %v409_v51  ;;  %v340_v58 = vadd.f32 %v339_v56, %v765_v44  ;;  %v413_v59 = vadd.f32 %v412_v57, %v767_v45  ;;  %v341_v60 = vpop.f32.mrb[3].mxu0  ;;  %v414_v61 = vpop.f32.mrb[3].mxu1 }
 0x130   :  { %448 = vst [vmem:[#allocation8 + $0x8] sm:$0xff] %v338_v54  ;;  %450 = vst [vmem:[#allocation8 + $0x18] sm:$0xff] %v411_v55  ;;  %v342_v62 = vadd.f32 %v341_v60, %v769_v46  ;;  %v415_v63 = vadd.f32 %v414_v61, %v771_v47 }
 0x131   :  { %451 = vst [vmem:[#allocation8 + $0x20] sm:$0xff] %v340_v58  ;;  %453 = vst [vmem:[#allocation8 + $0x30] sm:$0xff] %v413_v59 }
 0x132   :  { %452 = vst [vmem:[#allocation8 + $0x28] sm:$0xff] %v342_v62  ;;  %454 = vst [vmem:[#allocation8 + $0x38] sm:$0xff] %v415_v63 }
 0x134   :  { %v345_v0 = vpop.f32.mrb[4].mxu0  ;;  %v418_v1 = vpop.f32.mrb[4].mxu1 }
 0x135   :  { %v346_v2 = vadd.f32 %v345_v0, %v765_v44  ;;  %v419_v3 = vadd.f32 %v418_v1, %v767_v45  ;;  %v347_v4 = vpop.f32.mrb[5].mxu0  ;;  %v420_v5 = vpop.f32.mrb[5].mxu1 }
 0x136   :  { %v348_v6 = vadd.f32 %v347_v4, %v769_v46  ;;  %v421_v7 = vadd.f32 %v420_v5, %v771_v47  ;;  %v349_v8 = vpop.f32.mrb[6].mxu0  ;;  %v422_v9 = vpop.f32.mrb[6].mxu1 }
 0x137   :  { %455 = vst [vmem:[#allocation8 + $0x40] sm:$0xff] %v346_v2  ;;  %457 = vst [vmem:[#allocation8 + $0x50] sm:$0xff] %v419_v3  ;;  %v350_v10 = vadd.f32 %v349_v8, %v765_v44  ;;  %v423_v11 = vadd.f32 %v422_v9, %v767_v45  ;;  %v351_v12 = vpop.f32.mrb[7].mxu0  ;;  %v424_v13 = vpop.f32.mrb[7].mxu1 }
 0x138   :  { %456 = vst [vmem:[#allocation8 + $0x48] sm:$0xff] %v348_v6  ;;  %458 = vst [vmem:[#allocation8 + $0x58] sm:$0xff] %v421_v7  ;;  %v352_v14 = vadd.f32 %v351_v12, %v769_v46  ;;  %v425_v15 = vadd.f32 %v424_v13, %v771_v47 }
 0x139   :  { %459 = vst [vmem:[#allocation8 + $0x60] sm:$0xff] %v350_v10  ;;  %461 = vst [vmem:[#allocation8 + $0x70] sm:$0xff] %v423_v11 }
 0x13a   :  { %460 = vst [vmem:[#allocation8 + $0x68] sm:$0xff] %v352_v14  ;;  %462 = vst [vmem:[#allocation8 + $0x78] sm:$0xff] %v425_v15 }
 0x13c   :  { %v355_v16 = vpop.f32.mrb[8].mxu0  ;;  %v428_v17 = vpop.f32.mrb[8].mxu1 }
 0x13d   :  { %v356_v18 = vadd.f32 %v355_v16, %v765_v44  ;;  %v429_v19 = vadd.f32 %v428_v17, %v767_v45  ;;  %v357_v20 = vpop.f32.mrb[9].mxu0  ;;  %v430_v21 = vpop.f32.mrb[9].mxu1 }
 0x13e   :  { %v358_v22 = vadd.f32 %v357_v20, %v769_v46  ;;  %v431_v23 = vadd.f32 %v430_v21, %v771_v47  ;;  %v359_v24 = vpop.f32.mrb[10].mxu0  ;;  %v432_v25 = vpop.f32.mrb[10].mxu1 }
 0x13f   :  { %463 = vst [vmem:[#allocation8 + $0x80] sm:$0xff] %v356_v18  ;;  %465 = vst [vmem:[#allocation8 + $0x90] sm:$0xff] %v429_v19  ;;  %v360_v26 = vadd.f32 %v359_v24, %v765_v44  ;;  %v433_v27 = vadd.f32 %v432_v25, %v767_v45  ;;  %v361_v28 = vpop.f32.mrb[11].mxu0  ;;  %v434_v29 = vpop.f32.mrb[11].mxu1 }
 0x140   :  { %464 = vst [vmem:[#allocation8 + $0x88] sm:$0xff] %v358_v22  ;;  %466 = vst [vmem:[#allocation8 + $0x98] sm:$0xff] %v431_v23  ;;  %v362_v30 = vadd.f32 %v361_v28, %v769_v46  ;;  %v435_v31 = vadd.f32 %v434_v29, %v771_v47 }
 0x141   :  { %467 = vst [vmem:[#allocation8 + $0xa0] sm:$0xff] %v360_v26  ;;  %469 = vst [vmem:[#allocation8 + $0xb0] sm:$0xff] %v433_v27 }
 0x142   :  { %468 = vst [vmem:[#allocation8 + $0xa8] sm:$0xff] %v362_v30  ;;  %470 = vst [vmem:[#allocation8 + $0xb8] sm:$0xff] %v435_v31 }
 0x144   :  { %v365_v32 = vpop.f32.mrb[12].mxu0  ;;  %v438_v33 = vpop.f32.mrb[12].mxu1 }
 0x145   :  { %v366_v34 = vadd.f32 %v365_v32, %v765_v44  ;;  %v439_v35 = vadd.f32 %v438_v33, %v767_v45  ;;  %v367_v36 = vpop.f32.mrb[13].mxu0  ;;  %v440_v37 = vpop.f32.mrb[13].mxu1 }
 0x146   :  { %v368_v38 = vadd.f32 %v367_v36, %v769_v46  ;;  %v441_v39 = vadd.f32 %v440_v37, %v771_v47  ;;  %v369_v40 = vpop.f32.mrb[14].mxu0  ;;  %v442_v41 = vpop.f32.mrb[14].mxu1 }
 0x147   :  { %471 = vst [vmem:[#allocation8 + $0xc0] sm:$0xff] %v366_v34  ;;  %473 = vst [vmem:[#allocation8 + $0xd0] sm:$0xff] %v439_v35  ;;  %v370_v42 = vadd.f32 %v369_v40, %v765_v44  ;;  %v443_v43 = vadd.f32 %v442_v41, %v767_v45  ;;  %v371_v48 = vpop.f32.mrb[15].mxu0  ;;  %v444_v49 = vpop.f32.mrb[15].mxu1 }
 0x148   :  { %472 = vst [vmem:[#allocation8 + $0xc8] sm:$0xff] %v368_v38  ;;  %474 = vst [vmem:[#allocation8 + $0xd8] sm:$0xff] %v441_v39  ;;  %v372_v50 = vadd.f32 %v371_v48, %v769_v46  ;;  %v445_v51 = vadd.f32 %v444_v49, %v771_v47 }
 0x149   :  { %475 = vst [vmem:[#allocation8 + $0xe0] sm:$0xff] %v370_v42  ;;  %477 = vst [vmem:[#allocation8 + $0xf0] sm:$0xff] %v443_v43 }
 0x14a   :  { %476 = vst [vmem:[#allocation8 + $0xe8] sm:$0xff] %v372_v50  ;;  %478 = vst [vmem:[#allocation8 + $0xf8] sm:$0xff] %v445_v51 }
 0x14b   :  { %673 = shalt.err (!%p670_p0)
}
 0x14c   :  { %s674_s27 = scalar_lea.hbm %s820_s3, 4096 }
 0x14d   :  { %p675_p1 = scmp.ne.s32.totalorder %s820_s3, %s674_s27  ;;  %p678_p2 = scmp.lt.u32.totalorder %s674_s27, %s820_s3 }
 0x14f   :  { %p680_p3 = pnand %p678_p2, %p675_p1 }
 0x151   :  { %683 = shalt.err (!%p680_p3)
}
 0x152   :  { %s699_s5 = smov 512   ;;  %s700_s6 = smov 32  }
 0x153   :  { %490 = dma.vmem_to_hbm [thread:$0]  %s485_s23, 4096, %s820_s3, [#allocation4], %s699_s5, %s699_s5, %s700_s6  }
 0x154   :  { %688 = dma.done.wait [#allocation4], 4096  }
 0x155   :  { %689 = vsyncadd [#allocation4], 4294963200 }
 0x156   :  { %494 = vsyncpa [#allocation3], 1 }
 0x157   :  { %495 = vsyncpa [#allocation6], 1 }
 0x158   :  { %496 = vsyncpa [#allocation4], 1 }

// kernel: lstm_model_forward.3
= control target key start
LH: loop header
LB: loop body
LE: loop exit
PB: predicated region body
PF: predicated region fallthrough
CT: control target
= control target key end

     0   :  { %11 = vsyncpa [#allocation7], 0  ;;  %s5260_s0 = inlined_call_operand.hbm [shape: f32[8,8,512], index: 0, kind: input, shape index: {}]   ;;  %s5261_s1 = inlined_call_operand.hbm [shape: bf16[128,512], index: 1, kind: input, shape index: {}]   ;;  %s5262_s2 = inlined_call_operand.hbm [shape: bf16[256,512], index: 2, kind: input, shape index: {}]   ;;  %s5263_s3 = inlined_call_operand.hbm [shape: f32[1,512], index: 3, kind: input, shape index: {}]   ;;  %s5264_s4 = inlined_call_operand.hbm [shape: bf16[128,128], index: 4, kind: input, shape index: {}]   ;;  %s5265_s5 = inlined_call_operand.hbm [shape: f32[1,128], index: 5, kind: input, shape index: {}]   ;;  %s5266_s6 = inlined_call_operand.hbm [shape: f32[8,128], index: 6, kind: output, shape index: {}]  }
   0x1   :  { %12 = vsyncpa [#allocation10], 0 }
   0x2   :  { %13 = vsyncpa [#allocation13], 0 }
   0x3   :  { %14 = vsyncpa [#allocation16], 0 }
   0x4   :  { %15 = vsyncpa [#allocation8], 0  ;;  %s3662_s21 = smov [#allocation9]   ;;  %s3498_s25 = scalar_lea.hbm %s5261_s1, 4096 }
   0x5   :  { %s33_s22 = sshll.u32 %s3662_s21, 4  ;;  %p3499_p0 = scmp.ne.s32.totalorder %s5261_s1, %s3498_s25  ;;  %s34_s22 = int_to_ptr.vmem [resolvable:$true] %s33_s22 }
   0x6   :  { %p3502_p1 = scmp.lt.u32.totalorder %s3498_s25, %s5261_s1 }
   0x8   :  { %p3504_p2 = pnand %p3502_p1, %p3499_p0 }
   0xa   :  { %3507 = shalt.err (!%p3504_p2)
}
   0xb   :  { %s3508_s30 = scalar_lea.vmem %s34_s22, 4096  ;;  %p3513_p4 = scmp.lt.s32.totalorder %s34_s22, %s34_s22 }
   0xc   :  { %p3509_p3 = scmp.ne.s32.totalorder %s34_s22, %s3508_s30  ;;  %p3514_p5 = scmp.lt.s32.totalorder %s3508_s30, %s3508_s30 }
   0xe   :  { %p3515_p6 = por %p3514_p5, %p3513_p4 }
  0x10   :  { %p3516_p7 = pnand %p3515_p6, %p3509_p3 }
  0x12   :  { %3519 = shalt.err (!%p3516_p7)
}
  0x13   :  { %s3663_s7 = smov 256   ;;  %s3664_s8 = smov 16  }
  0x14   :  { %39 = dma.hbm_to_vmem [thread:$0]  %s5261_s1, 4096, %s34_s22, [#allocation10], %s3663_s7, %s3663_s7, %s3664_s8  }
  0x15   :  { %s3665_s11 = smov [#allocation12]   ;;  %s3666_s13 = smov [#allocation6]  }
  0x16   :  { %s58_s12 = sshll.u32 %s3665_s11, 4  ;;  %s21_s14 = sshll.u32 %s3666_s13, 4  ;;  %s59_s12 = int_to_ptr.vmem [resolvable:$true] %s58_s12  ;;  %s22_s14 = int_to_ptr.vmem [resolvable:$true] %s21_s14 }
  0x17   :  { %s3520_s17 = scalar_lea.hbm %s5263_s3, 64 }
  0x18   :  { %p3521_p8 = scmp.ne.s32.totalorder %s5263_s3, %s3520_s17  ;;  %p3524_p9 = scmp.lt.u32.totalorder %s3520_s17, %s5263_s3 }
  0x1a   :  { %p3526_p10 = pnand %p3524_p9, %p3521_p8 }
  0x1c   :  { %3529 = shalt.err (!%p3526_p10)
}
  0x1d   :  { %s3530_s1 = scalar_lea.vmem %s59_s12, 64  ;;  %p3535_p12 = scmp.lt.s32.totalorder %s59_s12, %s59_s12 }
  0x1e   :  { %p3531_p11 = scmp.ne.s32.totalorder %s59_s12, %s3530_s1  ;;  %p3536_p13 = scmp.lt.s32.totalorder %s3530_s1, %s3530_s1 }
  0x20   :  { %p3537_p0 = por %p3536_p13, %p3535_p12 }
  0x22   :  { %p3538_p1 = pnand %p3537_p0, %p3531_p11 }
  0x24   :  { %3541 = shalt.err (!%p3538_p1)
}
  0x25   :  { %61 = dma.hbm_to_vmem [thread:$0]  %s5263_s3, 64, %s59_s12, [#allocation13]  }
  0x26   :  { %s3542_s26 = scalar_lea.hbm %s5260_s0, 4096 }
  0x27   :  { %p3543_p2 = scmp.ne.s32.totalorder %s5260_s0, %s3542_s26  ;;  %p3546_p3 = scmp.lt.u32.totalorder %s3542_s26, %s5260_s0 }
  0x29   :  { %p3548_p4 = pnand %p3546_p3, %p3543_p2 }
  0x2b   :  { %3551 = shalt.err (!%p3548_p4)
}
  0x2c   :  { %s3552_s9 = scalar_lea.vmem %s22_s14, 4096  ;;  %p3557_p6 = scmp.lt.s32.totalorder %s22_s14, %s22_s14 }
  0x2d   :  { %p3553_p5 = scmp.ne.s32.totalorder %s22_s14, %s3552_s9  ;;  %p3558_p7 = scmp.lt.s32.totalorder %s3552_s9, %s3552_s9 }
  0x2f   :  { %p3559_p8 = por %p3558_p7, %p3557_p6 }
  0x31   :  { %p3560_p9 = pnand %p3559_p8, %p3553_p5 }
  0x33   :  { %3563 = shalt.err (!%p3560_p9)
}
  0x34   :  { %s3667_s3 = smov 512   ;;  %s3668_s10 = smov 32  }
  0x35   :  { %27 = dma.hbm_to_vmem [thread:$0]  %s5260_s0, 4096, %s22_s14, [#allocation7], %s3667_s3, %s3667_s3, %s3668_s10  }
  0x36   :  { %s3669_s13 = smov [#allocation11]   ;;  %s3670_s16 = smov [#allocation14]  }
  0x37   :  { %s45_s15 = sshll.u32 %s3669_s13, 4  ;;  %s67_s17 = sshll.u32 %s3670_s16, 4  ;;  %s46_s15 = int_to_ptr.vmem [resolvable:$true] %s45_s15  ;;  %s68_s17 = int_to_ptr.vmem [resolvable:$true] %s67_s17 }
  0x38   :  { %s3564_s20 = scalar_lea.hbm %s5262_s2, 8192 }
  0x39   :  { %p3565_p10 = scmp.ne.s32.totalorder %s5262_s2, %s3564_s20  ;;  %p3568_p11 = scmp.lt.u32.totalorder %s3564_s20, %s5262_s2 }
  0x3b   :  { %p3570_p12 = pnand %p3568_p11, %p3565_p10 }
  0x3d   :  { %3573 = shalt.err (!%p3570_p12)
}
  0x3e   :  { %s3574_s0 = scalar_lea.vmem %s46_s15, 8192  ;;  %p3579_p0 = scmp.lt.s32.totalorder %s46_s15, %s46_s15 }
  0x3f   :  { %p3575_p13 = scmp.ne.s32.totalorder %s46_s15, %s3574_s0  ;;  %p3580_p1 = scmp.lt.s32.totalorder %s3574_s0, %s3574_s0 }
  0x41   :  { %p3581_p2 = por %p3580_p1, %p3579_p0 }
  0x43   :  { %p3582_p3 = pnand %p3581_p2, %p3575_p13 }
  0x45   :  { %3585 = shalt.err (!%p3582_p3)
}
  0x46   :  { %51 = dma.hbm_to_vmem [thread:$0]  %s5262_s2, 8192, %s46_s15, [#allocation10], %s3663_s7, %s3663_s7, %s3664_s8  }
  0x47   :  { %s3586_s27 = scalar_lea.hbm %s5264_s4, 1024 }
  0x48   :  { %p3587_p4 = scmp.ne.s32.totalorder %s5264_s4, %s3586_s27  ;;  %p3590_p5 = scmp.lt.u32.totalorder %s3586_s27, %s5264_s4 }
  0x4a   :  { %p3592_p6 = pnand %p3590_p5, %p3587_p4 }
  0x4c   :  { %3595 = shalt.err (!%p3592_p6)
}
  0x4d   :  { %s3596_s3 = scalar_lea.vmem %s68_s17, 1024  ;;  %p3601_p8 = scmp.lt.s32.totalorder %s68_s17, %s68_s17 }
  0x4e   :  { %p3597_p7 = scmp.ne.s32.totalorder %s68_s17, %s3596_s3  ;;  %p3602_p9 = scmp.lt.s32.totalorder %s3596_s3, %s3596_s3 }
  0x50   :  { %p3603_p10 = por %p3602_p9, %p3601_p8 }
  0x52   :  { %p3604_p11 = pnand %p3603_p10, %p3597_p7 }
  0x54   :  { %3607 = shalt.err (!%p3604_p11)
}
  0x55   :  { %s3671_s2 = smov 64   ;;  %s3672_s7 = smov 4  }
  0x56   :  { %73 = dma.hbm_to_vmem [thread:$0]  %s5264_s4, 1024, %s68_s17, [#allocation13], %s3671_s2, %s3671_s2, %s3672_s7  }
  0x57   :  { %s3673_s11 = smov [#allocation15]   ;;  %s3608_s16 = scalar_lea.hbm %s5265_s5, 16 }
  0x58   :  { %s80_s12 = sshll.u32 %s3673_s11, 4  ;;  %p3609_p12 = scmp.ne.s32.totalorder %s5265_s5, %s3608_s16  ;;  %s81_s12 = int_to_ptr.vmem [resolvable:$true] %s80_s12 }
  0x59   :  { %p3612_p13 = scmp.lt.u32.totalorder %s3608_s16, %s5265_s5 }
  0x5b   :  { %p3614_p0 = pnand %p3612_p13, %p3609_p12 }
  0x5d   :  { %3617 = shalt.err (!%p3614_p0)
}
  0x5e   :  { %s3618_s1 = scalar_lea.vmem %s81_s12, 16  ;;  %s3622_s4 = scalar_lea.vmem %s81_s12, 32 }
  0x5f   :  { %p3619_p1 = scmp.ne.s32.totalorder %s81_s12, %s3618_s1  ;;  %p3623_p2 = scmp.lt.s32.totalorder %s81_s12, %s81_s12 }
  0x60   :  { %p3624_p3 = scmp.lt.s32.totalorder %s3622_s4, %s3618_s1 }
  0x62   :  { %p3625_p4 = por %p3624_p3, %p3623_p2 }
  0x64   :  { %p3626_p5 = pnand %p3625_p4, %p3619_p1 }
  0x66   :  { %3629 = shalt.err (!%p3626_p5)
}
  0x67   :  { %83 = dma.hbm_to_vmem [thread:$0]  %s5265_s5, 16, %s81_s12, [#allocation16]  }
  0x68   :  { %3652 = dma.done.wait [#allocation7], 4096  }
  0x69   :  { %3653 = vsyncadd [#allocation7], 4294963200 }
  0x6a   :  { %3654 = dma.done.wait [#allocation10], 12288  }
  0x6b   :  { %3655 = vsyncadd [#allocation10], 4294955008 }
  0x6c   :  { %3656 = dma.done.wait [#allocation13], 1088  }
  0x6d   :  { %3657 = vsyncadd [#allocation13], 4294966208 }
  0x6e   :  { %3658 = dma.done.wait [#allocation16], 16  }
  0x6f   :  { %3659 = vsyncadd [#allocation16], 4294967280  ;;  %v5267_v0 = vmov 0   ;;  %v3794_v1 = vld [vmem:[#allocation9 + $0x4] ss:$16 sps:$4 sm:$0xff]   ;;  %v3675_v38 = vmov 0.0|0.0  }
  0x70   :  { %427 = vmatprep.mubr.bf16.mxu0 %v5267_v0  ;;  %468 = vmatprep.mubr.bf16.mxu1 %v5267_v0  ;;  %5552 = vst [vmem:[#allocation23_spill] sm:$0xff] %v3794_v1  ;;  %v3796_v2 = vld [vmem:[#allocation9] ss:$16 sps:$4 sm:$0xff]   ;;  %v3799_v3 = vld [vmem:[#allocation9 + $0x24] ss:$16 sps:$4 sm:$0xff]   ;;  %vm3677_vm0 = vmmov 0  }
  0x71   :  { %395 = vmatprep.subr.bf16.mxu0 %v3794_v1  ;;  %v3802_v4 = vld [vmem:[#allocation9 + $0x20] ss:$16 sps:$4 sm:$0xff]   ;;  %v3805_v5 = vld [vmem:[#allocation9 + $0x44] ss:$16 sps:$4 sm:$0xff]   ;;  %v3807_v6 = vld [vmem:[#allocation9 + $0xc] ss:$16 sps:$4 sm:$0xff]  }
  0x72   :  { %396 = vmatpush1.bf16.msra.mxu0 %v3796_v2  ;;  %5553 = vst [vmem:[#allocation24_spill] sm:$0xff] %v3807_v6  ;;  %v3809_v7 = vld [vmem:[#allocation9 + $0x8] ss:$16 sps:$4 sm:$0xff]   ;;  %v3812_v8 = vld [vmem:[#allocation9 + $0x40] ss:$16 sps:$4 sm:$0xff]   ;;  %436 = vmatprep.subr.bf16.mxu1 %v3807_v6  ;;  %s3678_s5 = smov [#allocation17]  }
  0x73   :  { %397 = vmatprep.subr.bf16.mxu0 %v3799_v3  ;;  %v3816_v9 = vld [vmem:[#allocation9 + $0x64] ss:$16 sps:$4 sm:$0xff]   ;;  %437 = vmatpush1.bf16.msra.mxu1 %v3809_v7  ;;  %v3819_v10 = vld [vmem:[#allocation9 + $0x2c] ss:$16 sps:$4 sm:$0xff]   ;;  %v3821_v11 = vld [vmem:[#allocation9 + $0x28] ss:$16 sps:$4 sm:$0xff]  }
  0x74   :  { %438 = vmatprep.subr.bf16.mxu1 %v3819_v10  ;;  %v3825_v12 = vld [vmem:[#allocation9 + $0x60] ss:$16 sps:$4 sm:$0xff]   ;;  %v3827_v13 = vld [vmem:[#allocation9 + $0x84] ss:$16 sps:$4 sm:$0xff]   ;;  %v3829_v14 = vld [vmem:[#allocation9 + $0x4c] ss:$16 sps:$4 sm:$0xff]  }
  0x75   :  { %v3833_v15 = vld [vmem:[#allocation9 + $0x48] ss:$16 sps:$4 sm:$0xff]   ;;  %v3836_v16 = vld [vmem:[#allocation9 + $0x6c] ss:$16 sps:$4 sm:$0xff]   ;;  %v3839_v17 = vld [vmem:[#allocation9 + $0x80] ss:$16 sps:$4 sm:$0xff]  }
  0x76   :  { %398 = vmatpush1.bf16.msra.mxu0 %v3802_v4  ;;  %v3842_v18 = vld [vmem:[#allocation9 + $0xa4] ss:$16 sps:$4 sm:$0xff]   ;;  %v3845_v19 = vld [vmem:[#allocation9 + $0x68] ss:$16 sps:$4 sm:$0xff]   ;;  %v3848_v20 = vld [vmem:[#allocation9 + $0x8c] ss:$16 sps:$4 sm:$0xff]  }
  0x77   :  { %399 = vmatprep.subr.bf16.mxu0 %v3805_v5  ;;  %439 = vmatpush1.bf16.msra.mxu1 %v3821_v11  ;;  %v3851_v21 = vld [vmem:[#allocation9 + $0xa0] ss:$16 sps:$4 sm:$0xff]   ;;  %v3853_v22 = vld [vmem:[#allocation9 + $0xc4] ss:$16 sps:$4 sm:$0xff]   ;;  %v3857_v23 = vld [vmem:[#allocation9 + $0x88] ss:$16 sps:$4 sm:$0xff]  }
  0x78   :  { %440 = vmatprep.subr.bf16.mxu1 %v3829_v14  ;;  %v3860_v24 = vld [vmem:[#allocation9 + $0xac] ss:$16 sps:$4 sm:$0xff]   ;;  %v3863_v25 = vld [vmem:[#allocation9 + $0xc0] ss:$16 sps:$4 sm:$0xff]   ;;  %v3865_v26 = vld [vmem:[#allocation9 + $0xe4] ss:$16 sps:$4 sm:$0xff]  }
  0x79   :  { %v3869_v27 = vld [vmem:[#allocation9 + $0xa8] ss:$16 sps:$4 sm:$0xff]   ;;  %v3872_v28 = vld [vmem:[#allocation9 + $0xcc] ss:$16 sps:$4 sm:$0xff]   ;;  %v3875_v29 = vld [vmem:[#allocation9 + $0xe0] ss:$16 sps:$4 sm:$0xff]  }
  0x7a   :  { %400 = vmatpush1.bf16.msra.mxu0 %v3812_v8  ;;  %v3879_v30 = vld [vmem:[#allocation9 + $0xc8] ss:$16 sps:$4 sm:$0xff]   ;;  %v3881_v31 = vld [vmem:[#allocation11 + $0x4] ss:$16 sps:$4 sm:$0xff]   ;;  %v3884_v32 = vld [vmem:[#allocation9 + $0xec] ss:$16 sps:$4 sm:$0xff]  }
  0x7b   :  { %401 = vmatprep.subr.bf16.mxu0 %v3816_v9  ;;  %441 = vmatpush1.bf16.msra.mxu1 %v3833_v15  ;;  %v3887_v33 = vld [vmem:[#allocation9 + $0xe8] ss:$16 sps:$4 sm:$0xff]   ;;  %v3889_v34 = vld [vmem:[#allocation11 + $0xc] ss:$16 sps:$4 sm:$0xff]   ;;  %v3891_v35 = vld [vmem:[#allocation11] ss:$16 sps:$4 sm:$0xff]  }
  0x7c   :  { %442 = vmatprep.subr.bf16.mxu1 %v3836_v16  ;;  %v3895_v36 = vld [vmem:[#allocation11 + $0x24] ss:$16 sps:$4 sm:$0xff]   ;;  %v3898_v37 = vld [vmem:[#allocation11 + $0x20] ss:$16 sps:$4 sm:$0xff]   ;;  %v3900_v39 = vld [vmem:[#allocation11 + $0x8] ss:$16 sps:$4 sm:$0xff]  }
  0x7d   :  { %v3902_v40 = vld [vmem:[#allocation11 + $0x44] ss:$16 sps:$4 sm:$0xff]   ;;  %v3905_v41 = vld [vmem:[#allocation11 + $0x2c] ss:$16 sps:$4 sm:$0xff]   ;;  %v3910_v42 = vld [vmem:[#allocation11 + $0x40] ss:$16 sps:$4 sm:$0xff]  }
  0x7e   :  { %402 = vmatpush1.bf16.msra.mxu0 %v3825_v12  ;;  %v3912_v43 = vld [vmem:[#allocation11 + $0x28] ss:$16 sps:$4 sm:$0xff]   ;;  %v3914_v44 = vld [vmem:[#allocation11 + $0x64] ss:$16 sps:$4 sm:$0xff]   ;;  %v3917_v45 = vld [vmem:[#allocation11 + $0x4c] ss:$16 sps:$4 sm:$0xff]  }
  0x7f   :  { %403 = vmatprep.subr.bf16.mxu0 %v3827_v13  ;;  %443 = vmatpush1.bf16.msra.mxu1 %v3845_v19  ;;  %v3922_v46 = vld [vmem:[#allocation11 + $0x60] ss:$16 sps:$4 sm:$0xff]   ;;  %v3924_v47 = vld [vmem:[#allocation11 + $0x48] ss:$16 sps:$4 sm:$0xff]   ;;  %v3927_v48 = vld [vmem:[#allocation11 + $0x6c] ss:$16 sps:$4 sm:$0xff]  }
  0x80   :  { %444 = vmatprep.subr.bf16.mxu1 %v3848_v20  ;;  %5554 = vst [vmem:[#allocation25_spill] sm:$0xff] %v3922_v46  ;;  %v3932_v49 = vld [vmem:[#allocation11 + $0x68] ss:$16 sps:$4 sm:$0xff]   ;;  %v3938_v50 = vld [vmem:[#allocation11 + $0x84] ss:$16 sps:$4 sm:$0xff]   ;;  %s2687_s23 = sshll.u32 %s3678_s5, 4  ;;  %s2688_s23 = int_to_ptr.vmem [resolvable:$true] %s2687_s23 }
  0x81   :  { %5555 = vst [vmem:[#allocation26_spill] sm:$0xff] %v3932_v49  ;;  %5556 = vst [vmem:[#allocation27_spill] sm:$0xff] %v3938_v50  ;;  %v3940_v51 = vld [vmem:[#allocation11 + $0x8c] ss:$16 sps:$4 sm:$0xff]   ;;  %v3942_v52 = vld [vmem:[#allocation11 + $0x80] ss:$16 sps:$4 sm:$0xff]   ;;  %p3635_p7 = scmp.lt.s32.totalorder %s2688_s23, %s2688_s23 }
  0x82   :  { %404 = vmatpush1.bf16.msra.mxu0 %v3839_v17  ;;  %5557 = vst [vmem:[#allocation28_spill] sm:$0xff] %v3940_v51  ;;  %5558 = vst [vmem:[#allocation29_spill] sm:$0xff] %v3942_v52  ;;  %v3944_v53 = vld [vmem:[#allocation11 + $0x88] ss:$16 sps:$4 sm:$0xff]   ;;  %v3950_v54 = vld [vmem:[#allocation11 + $0xa4] ss:$16 sps:$4 sm:$0xff]  }
  0x83   :  { %405 = vmatprep.subr.bf16.mxu0 %v3842_v18  ;;  %445 = vmatpush1.bf16.msra.mxu1 %v3857_v23  ;;  %5559 = vst [vmem:[#allocation30_spill] sm:$0xff] %v3944_v53  ;;  %5560 = vst [vmem:[#allocation31_spill] sm:$0xff] %v3950_v54  ;;  %v3952_v55 = vld [vmem:[#allocation11 + $0xac] ss:$16 sps:$4 sm:$0xff]   ;;  %v3954_v56 = vld [vmem:[#allocation11 + $0xa0] ss:$16 sps:$4 sm:$0xff]  }
  0x84   :  { %446 = vmatprep.subr.bf16.mxu1 %v3860_v24  ;;  %5561 = vst [vmem:[#allocation32_spill] sm:$0xff] %v3952_v55  ;;  %5562 = vst [vmem:[#allocation33_spill] sm:$0xff] %v3954_v56  ;;  %v3956_v57 = vld [vmem:[#allocation11 + $0xa8] ss:$16 sps:$4 sm:$0xff]   ;;  %v3962_v58 = vld [vmem:[#allocation11 + $0xc4] ss:$16 sps:$4 sm:$0xff]  }
  0x85   :  { %5563 = vst [vmem:[#allocation34_spill] sm:$0xff] %v3956_v57  ;;  %5564 = vst [vmem:[#allocation35_spill] sm:$0xff] %v3962_v58  ;;  %v3964_v59 = vld [vmem:[#allocation11 + $0xcc] ss:$16 sps:$4 sm:$0xff]   ;;  %v3966_v60 = vld [vmem:[#allocation11 + $0xc0] ss:$16 sps:$4 sm:$0xff]  }
  0x86   :  { %406 = vmatpush1.bf16.msra.mxu0 %v3851_v21  ;;  %5565 = vst [vmem:[#allocation36_spill] sm:$0xff] %v3964_v59  ;;  %5566 = vst [vmem:[#allocation37_spill] sm:$0xff] %v3966_v60  ;;  %v3968_v61 = vld [vmem:[#allocation11 + $0xc8] ss:$16 sps:$4 sm:$0xff]   ;;  %v3974_v62 = vld [vmem:[#allocation11 + $0xe4] ss:$16 sps:$4 sm:$0xff]  }
  0x87   :  { %407 = vmatprep.subr.bf16.mxu0 %v3853_v22  ;;  %447 = vmatpush1.bf16.msra.mxu1 %v3869_v27  ;;  %5567 = vst [vmem:[#allocation38_spill] sm:$0xff] %v3968_v61  ;;  %5568 = vst [vmem:[#allocation39_spill] sm:$0xff] %v3974_v62  ;;  %v3976_v63 = vld [vmem:[#allocation11 + $0xec] ss:$16 sps:$4 sm:$0xff]   ;;  %v3980_v0 = vld [vmem:[#allocation11 + $0xe8] ss:$16 sps:$4 sm:$0xff]  }
  0x88   :  { %448 = vmatprep.subr.bf16.mxu1 %v3872_v28  ;;  %5569 = vst [vmem:[#allocation40_spill] sm:$0xff] %v3976_v63  ;;  %5571 = vst [vmem:[#allocation42_spill] sm:$0xff] %v3980_v0  ;;  %s3630_s0 = scalar_lea.vmem %s2688_s23, 128 }
  0x89   :  { %p3631_p6 = scmp.ne.s32.totalorder %s2688_s23, %s3630_s0  ;;  %p3636_p8 = scmp.lt.s32.totalorder %s3630_s0, %s3630_s0 }
  0x8a   :  { %408 = vmatpush1.bf16.msra.mxu0 %v3863_v25 }
  0x8b   :  { %409 = vmatprep.subr.bf16.mxu0 %v3865_v26  ;;  %449 = vmatpush1.bf16.msra.mxu1 %v3879_v30  ;;  %p3637_p9 = por %p3636_p8, %p3635_p7 }
  0x8c   :  { %450 = vmatprep.subr.bf16.mxu1 %v3884_v32 }
  0x8d   :  { %p3638_p10 = pnand %p3637_p9, %p3631_p6 }
  0x8e   :  { %410 = vmatpush1.bf16.msra.mxu0 %v3875_v29 }
  0x8f   :  { %831 = vmatprep.subr.bf16.mxu0 %v3881_v31  ;;  %451 = vmatpush1.bf16.msra.mxu1 %v3887_v33 }
  0x90   :  { %872 = vmatprep.subr.bf16.mxu1 %v3889_v34 }
  0x91   :  { %428 = vmatmul.mubr.bf16.vlgmr.msra.gmra.mrb[0].mxu0 %v3675_v38 }
  0x92   :  { %832 = vmatpush1.bf16.msra.mxu0 %v3891_v35  ;;  %863 = vmatprep.mubr.bf16.mxu0 %v3675_v38 }
  0x93   :  { %833 = vmatprep.subr.bf16.mxu0 %v3895_v36  ;;  %469 = vmatmul.mubr.bf16.vlgmr.msra.gmra.mrb[0].mxu1 %v3675_v38 }
  0x94   :  { %873 = vmatpush1.bf16.msra.mxu1 %v3900_v39  ;;  %904 = vmatprep.mubr.bf16.mxu1 %v3675_v38  ;;  %v3978_v38 = vld [vmem:[#allocation11 + $0xe0] ss:$16 sps:$4 sm:$0xff]  }
  0x95   :  { %874 = vmatprep.subr.bf16.mxu1 %v3905_v41  ;;  %5570 = vst [vmem:[#allocation41_spill] sm:$0xff] %v3978_v38 }
  0x96   :  { %834 = vmatpush1.bf16.msra.mxu0 %v3898_v37 }
  0x97   :  { %835 = vmatprep.subr.bf16.mxu0 %v3902_v40 }
  0x98   :  { %875 = vmatpush1.bf16.msra.mxu1 %v3912_v43 }
  0x99   :  { %876 = vmatprep.subr.bf16.mxu1 %v3917_v45 }
  0x9a   :  { %836 = vmatpush1.bf16.msra.mxu0 %v3910_v42 }
  0x9b   :  { %837 = vmatprep.subr.bf16.mxu0 %v3914_v44 }
  0x9c   :  { %877 = vmatpush1.bf16.msra.mxu1 %v3924_v47 }
  0x9d   :  { %878 = vmatprep.subr.bf16.mxu1 %v3927_v48 }
  0x9e   :  { %838 = vmatpush1.bf16.msra.mxu0 %v3922_v46 }
  0x9f   :  { %839 = vmatprep.subr.bf16.mxu0 %v3938_v50  ;;  %v231_v50 = vld [vmem:[#allocation6 + $0x10] sm:$0xff] }
  0xa0   :  { %879 = vmatpush1.bf16.msra.mxu1 %v3932_v49 }
  0xa1   :  { %880 = vmatprep.subr.bf16.mxu1 %v3940_v51 }
  0xa2   :  { %840 = vmatpush1.bf16.msra.mxu0 %v3942_v52  ;;  %v232_v52 = vld [vmem:[#allocation6 + $0x18] sm:$0xff] }
  0xa3   :  { %841 = vmatprep.subr.bf16.mxu0 %v3950_v54 }
  0xa4   :  { %881 = vmatpush1.bf16.msra.mxu1 %v3944_v53 }
  0xa5   :  { %882 = vmatprep.subr.bf16.mxu1 %v3952_v55 }
  0xa6   :  { %842 = vmatpush1.bf16.msra.mxu0 %v3954_v56  ;;  %v4056_v56 = vld [vmem:[#allocation11 + $0x1cc] ss:$16 sps:$4 sm:$0xff]  }
  0xa7   :  { %843 = vmatprep.subr.bf16.mxu0 %v3962_v58  ;;  %v3994_v58 = vld [vmem:[#allocation11 + $0x108] ss:$16 sps:$4 sm:$0xff]   ;;  %5597 = vst [vmem:[#allocation68_spill] sm:$0xff] %v4056_v56 }
  0xa8   :  { %883 = vmatpush1.bf16.msra.mxu1 %v3956_v57  ;;  %5575 = vst [vmem:[#allocation46_spill] sm:$0xff] %v3994_v58  ;;  %v4054_v57 = vld [vmem:[#allocation11 + $0x1c4] ss:$16 sps:$4 sm:$0xff]  }
  0xa9   :  { %884 = vmatprep.subr.bf16.mxu1 %v3964_v59  ;;  %v3986_v59 = vld [vmem:[#allocation11 + $0x104] ss:$16 sps:$4 sm:$0xff]   ;;  %5596 = vst [vmem:[#allocation67_spill] sm:$0xff] %v4054_v57 }
  0xaa   :  { %844 = vmatpush1.bf16.msra.mxu0 %v3966_v60  ;;  %5572 = vst [vmem:[#allocation43_spill] sm:$0xff] %v3986_v59  ;;  %v3988_v60 = vld [vmem:[#allocation11 + $0x10c] ss:$16 sps:$4 sm:$0xff]  }
  0xab   :  { %845 = vmatprep.subr.bf16.mxu0 %v3974_v62  ;;  %5573 = vst [vmem:[#allocation44_spill] sm:$0xff] %v3988_v60  ;;  %v4004_v62 = vld [vmem:[#allocation11 + $0x128] ss:$16 sps:$4 sm:$0xff]  }
  0xac   :  { %885 = vmatpush1.bf16.msra.mxu1 %v3968_v61  ;;  %v3990_v61 = vld [vmem:[#allocation11 + $0x100] ss:$16 sps:$4 sm:$0xff]   ;;  %5579 = vst [vmem:[#allocation50_spill] sm:$0xff] %v4004_v62 }
  0xad   :  { %886 = vmatprep.subr.bf16.mxu1 %v3976_v63  ;;  %5574 = vst [vmem:[#allocation45_spill] sm:$0xff] %v3990_v61  ;;  %v3998_v63 = vld [vmem:[#allocation11 + $0x124] ss:$16 sps:$4 sm:$0xff]  }
  0xae   :  { %846 = vmatpush1.bf16.msra.mxu0 %v3978_v38  ;;  %5576 = vst [vmem:[#allocation47_spill] sm:$0xff] %v3998_v63  ;;  %v4000_v38 = vld [vmem:[#allocation11 + $0x12c] ss:$16 sps:$4 sm:$0xff]  }
  0xaf   :  { %847 = vmatprep.subr.bf16.mxu0 %v3986_v59  ;;  %5577 = vst [vmem:[#allocation48_spill] sm:$0xff] %v4000_v38  ;;  %v4016_v59 = vld [vmem:[#allocation11 + $0x148] ss:$16 sps:$4 sm:$0xff]  }
  0xb0   :  { %887 = vmatpush1.bf16.msra.mxu1 %v3980_v0  ;;  %v4002_v0 = vld [vmem:[#allocation11 + $0x120] ss:$16 sps:$4 sm:$0xff]   ;;  %5583 = vst [vmem:[#allocation54_spill] sm:$0xff] %v4016_v59 }
  0xb1   :  { %888 = vmatprep.subr.bf16.mxu1 %v3988_v60  ;;  %5578 = vst [vmem:[#allocation49_spill] sm:$0xff] %v4002_v0  ;;  %v4010_v60 = vld [vmem:[#allocation11 + $0x144] ss:$16 sps:$4 sm:$0xff]  }
  0xb2   :  { %848 = vmatpush1.bf16.msra.mxu0 %v3990_v61  ;;  %5580 = vst [vmem:[#allocation51_spill] sm:$0xff] %v4010_v60  ;;  %v4012_v61 = vld [vmem:[#allocation11 + $0x14c] ss:$16 sps:$4 sm:$0xff]  }
  0xb3   :  { %849 = vmatprep.subr.bf16.mxu0 %v3998_v63  ;;  %5581 = vst [vmem:[#allocation52_spill] sm:$0xff] %v4012_v61  ;;  %v4028_v63 = vld [vmem:[#allocation11 + $0x168] ss:$16 sps:$4 sm:$0xff]  }
  0xb4   :  { %889 = vmatpush1.bf16.msra.mxu1 %v3994_v58  ;;  %v4014_v58 = vld [vmem:[#allocation11 + $0x140] ss:$16 sps:$4 sm:$0xff]   ;;  %5587 = vst [vmem:[#allocation58_spill] sm:$0xff] %v4028_v63 }
  0xb5   :  { %890 = vmatprep.subr.bf16.mxu1 %v4000_v38  ;;  %5582 = vst [vmem:[#allocation53_spill] sm:$0xff] %v4014_v58  ;;  %v4022_v38 = vld [vmem:[#allocation11 + $0x164] ss:$16 sps:$4 sm:$0xff]  }
  0xb6   :  { %850 = vmatpush1.bf16.msra.mxu0 %v4002_v0  ;;  %5584 = vst [vmem:[#allocation55_spill] sm:$0xff] %v4022_v38  ;;  %v4024_v0 = vld [vmem:[#allocation11 + $0x16c] ss:$16 sps:$4 sm:$0xff]  }
  0xb7   :  { %851 = vmatprep.subr.bf16.mxu0 %v4010_v60  ;;  %5585 = vst [vmem:[#allocation56_spill] sm:$0xff] %v4024_v0  ;;  %v4040_v60 = vld [vmem:[#allocation11 + $0x188] ss:$16 sps:$4 sm:$0xff]  }
  0xb8   :  { %891 = vmatpush1.bf16.msra.mxu1 %v4004_v62  ;;  %v4026_v62 = vld [vmem:[#allocation11 + $0x160] ss:$16 sps:$4 sm:$0xff]   ;;  %5591 = vst [vmem:[#allocation62_spill] sm:$0xff] %v4040_v60 }
  0xb9   :  { %892 = vmatprep.subr.bf16.mxu1 %v4012_v61  ;;  %5586 = vst [vmem:[#allocation57_spill] sm:$0xff] %v4026_v62  ;;  %v4034_v61 = vld [vmem:[#allocation11 + $0x184] ss:$16 sps:$4 sm:$0xff]  }
  0xba   :  { %852 = vmatpush1.bf16.msra.mxu0 %v4014_v58  ;;  %5588 = vst [vmem:[#allocation59_spill] sm:$0xff] %v4034_v61  ;;  %v4036_v58 = vld [vmem:[#allocation11 + $0x18c] ss:$16 sps:$4 sm:$0xff]  }
  0xbb   :  { %853 = vmatprep.subr.bf16.mxu0 %v4022_v38  ;;  %5589 = vst [vmem:[#allocation60_spill] sm:$0xff] %v4036_v58  ;;  %v4052_v38 = vld [vmem:[#allocation11 + $0x1a8] ss:$16 sps:$4 sm:$0xff]  }
  0xbc   :  { %893 = vmatpush1.bf16.msra.mxu1 %v4016_v59  ;;  %v4038_v59 = vld [vmem:[#allocation11 + $0x180] ss:$16 sps:$4 sm:$0xff]   ;;  %5595 = vst [vmem:[#allocation66_spill] sm:$0xff] %v4052_v38 }
  0xbd   :  { %894 = vmatprep.subr.bf16.mxu1 %v4024_v0  ;;  %5590 = vst [vmem:[#allocation61_spill] sm:$0xff] %v4038_v59  ;;  %v4046_v0 = vld [vmem:[#allocation11 + $0x1a4] ss:$16 sps:$4 sm:$0xff]  }
  0xbe   :  { %854 = vmatpush1.bf16.msra.mxu0 %v4026_v62  ;;  %5592 = vst [vmem:[#allocation63_spill] sm:$0xff] %v4046_v0  ;;  %v4048_v62 = vld [vmem:[#allocation11 + $0x1ac] ss:$16 sps:$4 sm:$0xff]  }
  0xbf   :  { %855 = vmatprep.subr.bf16.mxu0 %v4034_v61  ;;  %5593 = vst [vmem:[#allocation64_spill] sm:$0xff] %v4048_v62  ;;  %v4070_v61 = vld [vmem:[#allocation11 + $0x1ec] ss:$16 sps:$4 sm:$0xff]  }
  0xc0   :  { %895 = vmatpush1.bf16.msra.mxu1 %v4028_v63  ;;  %v4050_v63 = vld [vmem:[#allocation11 + $0x1a0] ss:$16 sps:$4 sm:$0xff]   ;;  %5601 = vst [vmem:[#allocation72_spill] sm:$0xff] %v4070_v61 }
  0xc1   :  { %896 = vmatprep.subr.bf16.mxu1 %v4036_v58  ;;  %5594 = vst [vmem:[#allocation65_spill] sm:$0xff] %v4050_v63  ;;  %v4067_v58 = vld [vmem:[#allocation11 + $0x1e4] ss:$16 sps:$4 sm:$0xff]  }
  0xc2   :  { %856 = vmatpush1.bf16.msra.mxu0 %v4038_v59  ;;  %v4061_v59 = vld [vmem:[#allocation11 + $0x1c0] ss:$16 sps:$4 sm:$0xff]   ;;  %5600 = vst [vmem:[#allocation71_spill] sm:$0xff] %v4067_v58 }
  0xc3   :  { %857 = vmatprep.subr.bf16.mxu0 %v4046_v0  ;;  %5598 = vst [vmem:[#allocation69_spill] sm:$0xff] %v4061_v59  ;;  %v4073_v0 = vld [vmem:[#allocation11 + $0x1e0] ss:$16 sps:$4 sm:$0xff]  }
  0xc4   :  { %897 = vmatpush1.bf16.msra.mxu1 %v4040_v60  ;;  %v4065_v60 = vld [vmem:[#allocation11 + $0x1c8] ss:$16 sps:$4 sm:$0xff]   ;;  %5602 = vst [vmem:[#allocation73_spill] sm:$0xff] %v4073_v0 }
  0xc5   :  { %898 = vmatprep.subr.bf16.mxu1 %v4048_v62  ;;  %5599 = vst [vmem:[#allocation70_spill] sm:$0xff] %v4065_v60 }
  0xc6   :  { %858 = vmatpush1.bf16.msra.mxu0 %v4050_v63  ;;  %v4077_v63 = vld [vmem:[#allocation11 + $0x1e8] ss:$16 sps:$4 sm:$0xff]  }
  0xc7   :  { %859 = vmatprep.subr.bf16.mxu0 %v4054_v57  ;;  %5603 = vst [vmem:[#allocation74_spill] sm:$0xff] %v4077_v63 }
  0xc8   :  { %899 = vmatpush1.bf16.msra.mxu1 %v4052_v38 }
  0xc9   :  { %900 = vmatprep.subr.bf16.mxu1 %v4056_v56  ;;  %v229_v56 = vld [vmem:[#allocation6] sm:$0xff] }
  0xca   :  { %860 = vmatpush1.bf16.msra.mxu0 %v4061_v59  ;;  %v230_v59 = vld [vmem:[#allocation6 + $0x8] sm:$0xff] }
  0xcb   :  { %861 = vmatprep.subr.bf16.mxu0 %v4067_v58 }
  0xcc   :  { %901 = vmatpush1.bf16.msra.mxu1 %v4065_v60 }
  0xcd   :  { %902 = vmatprep.subr.bf16.mxu1 %v4070_v61 }
  0xce   :  { %862 = vmatpush1.bf16.msra.mxu0 %v4073_v0 }
  0xcf   :  { %947 = vmatprep.subr.bf16.mxu0 %v3794_v1 }
  0xd0   :  { %903 = vmatpush1.bf16.msra.mxu1 %v4077_v63 }
  0xd1   :  { %988 = vmatprep.subr.bf16.mxu1 %v3807_v6 }
 0x164   :  { %v429_v57 = vpop.f32.mrb[0].mxu0 }
 0x165   :  { %v477_v38 = vadd.f32 %v429_v57, %v229_v56  ;;  %v431_v62 = vpop.f32.mrb[1].mxu0 }
 0x166   :  { %v478_v60 = vadd.f32 %v431_v62, %v230_v59  ;;  %v433_v55 = vpop.f32.mrb[2].mxu0  ;;  %v470_v61 = vpop.f32.mrb[0].mxu1 }
 0x167   :  { %v2731_v58 = vmul.f32 -1.442695, %v477_v38  ;;  %v434_v54 = vpop.f32.mrb[3].mxu0  ;;  %v472_v0 = vpop.f32.mrb[1].mxu1  ;;  %v479_v49 = vadd.f32 %v470_v61, %v231_v50  ;;  %v5622_v61 = vld [vmem:[#allocation42_spill] sm:$0xff]  ;;  %v5624_v38 = vld [vmem:[#allocation44_spill] sm:$0xff] }
 0x168   :  { %v2732_v53 = vmul.f32 -1.442695, %v478_v60  ;;  %v480_v63 = vadd.f32 %v472_v0, %v232_v52  ;;  %v474_v51 = vpop.f32.mrb[2].mxu1  ;;  %v5621_v52 = vld [vmem:[#allocation41_spill] sm:$0xff] }
 0x169   :  { %3050 = vpow2.f32 %v2731_v58  ;;  %v475_v1 = vpop.f32.mrb[3].mxu1 }
 0x16a   :  { %3052 = vpow2.f32 %v2732_v53  ;;  %v2733_v6 = vmul.f32 -1.442695, %v480_v63  ;;  %v5623_v63 = vld [vmem:[#allocation43_spill] sm:$0xff] }
 0x16c   :  { %3054 = vpow2.f32 %v2733_v6 }
 0x16d   :  { %3056 = vtanh.f32 %v479_v49  ;;  %v5604_v49 = vmov 0  }
 0x173   :  { %v3051_v46 = vpop.eup %3050 }
 0x174   :  { %v3053_v56 = vpop.eup %3052  ;;  %v485_v57 = vadd.f32 1.0, %v3051_v46 }
 0x175   :  { %v491_v55 = vadd.f32 1.0, %v3053_v56  ;;  %v5625_v56 = vld [vmem:[#allocation45_spill] sm:$0xff] }
 0x176   :  { %3058 = vrcp.f32 %v485_v57  ;;  %v3055_v54 = vpop.eup %3054  ;;  %v5626_v57 = vld [vmem:[#allocation46_spill] sm:$0xff] }
 0x177   :  { %3060 = vrcp.f32 %v491_v55  ;;  %v3057_v59 = vpop.eup %3056  ;;  %v498_v60 = vadd.f32 1.0, %v3055_v54  ;;  %v5627_v55 = vld [vmem:[#allocation47_spill] sm:$0xff]  ;;  %v5628_v54 = vld [vmem:[#allocation48_spill] sm:$0xff] }
 0x179   :  { %3062 = vrcp.f32 %v498_v60  ;;  %v5631_v60 = vld [vmem:[#allocation51_spill] sm:$0xff] }
 0x180   :  { %v3059_v58 = vpop.eup %3058 }
 0x181   :  { %v3061_v53 = vpop.eup %3060  ;;  %v502_v62 = vmul.f32 %v3059_v58, %v3057_v59  ;;  %v5629_v59 = vld [vmem:[#allocation49_spill] sm:$0xff]  ;;  %v5630_v58 = vld [vmem:[#allocation50_spill] sm:$0xff] }
 0x182   :  { %v501_v0 = vmul.f32 0.0, %v3061_v53  ;;  %v5632_v53 = vld [vmem:[#allocation52_spill] sm:$0xff] }
 0x183   :  { %v3063_v1 = vpop.eup %3062 }
 0x184   :  { %v4084_v51 = vadd.f32 %v502_v62, %v501_v0  ;;  %v5633_v62 = vld [vmem:[#allocation53_spill] sm:$0xff]  ;;  %v5634_v0 = vld [vmem:[#allocation54_spill] sm:$0xff] }
 0x186   :  { %3064 = vtanh.f32 %v4084_v51 }
 0x190   :  { %v3065_v6 = vpop.eup %3064 }
 0x191   :  { %v505_v50 = vmul.f32 %v3065_v6, %v3063_v1  ;;  %v5635_v1 = vld [vmem:[#allocation55_spill] sm:$0xff]  ;;  %v5636_v6 = vld [vmem:[#allocation56_spill] sm:$0xff] }
 0x193   :  { %v509_v46 = vpack.c.bf16 %v505_v50, %v505_v50  ;;  %v5637_v50 = vld [vmem:[#allocation57_spill] sm:$0xff] }
 0x195   :  { %864 = vmatmul.mubr.bf16.vlgmr.msra.gmra.mrb[4].mxu0 %v509_v46  ;;  %905 = vmatmul.mubr.bf16.vlgmr.msra.gmra.mrb[4].mxu1 %v509_v46 }
 0x196   :  { %948 = vmatpush1.bf16.msra.mxu0 %v3796_v2  ;;  %989 = vmatpush1.bf16.msra.mxu1 %v3809_v7  ;;  %v5605_v2 = vld [vmem:[#allocation25_spill] sm:$0xff] }
 0x197   :  { %949 = vmatprep.subr.bf16.mxu0 %v3799_v3  ;;  %990 = vmatprep.subr.bf16.mxu1 %v3819_v10  ;;  %v5606_v3 = vld [vmem:[#allocation26_spill] sm:$0xff]  ;;  %v5609_v7 = vld [vmem:[#allocation29_spill] sm:$0xff]  ;;  %v5612_v10 = vld [vmem:[#allocation32_spill] sm:$0xff] }
 0x198   :  { %979 = vmatprep.mubr.bf16.mxu0 %v5604_v49  ;;  %1020 = vmatprep.mubr.bf16.mxu1 %v5604_v49 }
 0x19a   :  { %950 = vmatpush1.bf16.msra.mxu0 %v3802_v4  ;;  %991 = vmatpush1.bf16.msra.mxu1 %v3821_v11  ;;  %v5607_v4 = vld [vmem:[#allocation27_spill] sm:$0xff]  ;;  %v5613_v11 = vld [vmem:[#allocation33_spill] sm:$0xff] }
 0x19b   :  { %951 = vmatprep.subr.bf16.mxu0 %v3805_v5  ;;  %992 = vmatprep.subr.bf16.mxu1 %v3829_v14  ;;  %v5608_v5 = vld [vmem:[#allocation28_spill] sm:$0xff] }
 0x19c   :  { %v5616_v14 = vld [vmem:[#allocation36_spill] sm:$0xff] }
 0x19e   :  { %952 = vmatpush1.bf16.msra.mxu0 %v3812_v8  ;;  %993 = vmatpush1.bf16.msra.mxu1 %v3833_v15  ;;  %v5610_v8 = vld [vmem:[#allocation30_spill] sm:$0xff]  ;;  %v5617_v15 = vld [vmem:[#allocation37_spill] sm:$0xff] }
 0x19f   :  { %953 = vmatprep.subr.bf16.mxu0 %v3816_v9  ;;  %994 = vmatprep.subr.bf16.mxu1 %v3836_v16  ;;  %v5611_v9 = vld [vmem:[#allocation31_spill] sm:$0xff]  ;;  %v5618_v16 = vld [vmem:[#allocation38_spill] sm:$0xff] }
 0x1a2   :  { %954 = vmatpush1.bf16.msra.mxu0 %v3825_v12  ;;  %995 = vmatpush1.bf16.msra.mxu1 %v3845_v19  ;;  %v5614_v12 = vld [vmem:[#allocation34_spill] sm:$0xff] }
 0x1a3   :  { %955 = vmatprep.subr.bf16.mxu0 %v3827_v13  ;;  %996 = vmatprep.subr.bf16.mxu1 %v3848_v20  ;;  %v5615_v13 = vld [vmem:[#allocation35_spill] sm:$0xff] }
 0x1a6   :  { %956 = vmatpush1.bf16.msra.mxu0 %v3839_v17  ;;  %997 = vmatpush1.bf16.msra.mxu1 %v3857_v23  ;;  %v5619_v17 = vld [vmem:[#allocation39_spill] sm:$0xff] }
 0x1a7   :  { %957 = vmatprep.subr.bf16.mxu0 %v3842_v18  ;;  %998 = vmatprep.subr.bf16.mxu1 %v3860_v24  ;;  %v5620_v18 = vld [vmem:[#allocation40_spill] sm:$0xff] }
 0x1aa   :  { %958 = vmatpush1.bf16.msra.mxu0 %v3851_v21  ;;  %999 = vmatpush1.bf16.msra.mxu1 %v3869_v27 }
 0x1ab   :  { %959 = vmatprep.subr.bf16.mxu0 %v3853_v22  ;;  %1000 = vmatprep.subr.bf16.mxu1 %v3872_v28 }
 0x1ae   :  { %960 = vmatpush1.bf16.msra.mxu0 %v3863_v25  ;;  %1001 = vmatpush1.bf16.msra.mxu1 %v3879_v30 }
 0x1af   :  { %961 = vmatprep.subr.bf16.mxu0 %v3865_v26  ;;  %1002 = vmatprep.subr.bf16.mxu1 %v3884_v32 }
 0x1b2   :  { %962 = vmatpush1.bf16.msra.mxu0 %v3875_v29  ;;  %1003 = vmatpush1.bf16.msra.mxu1 %v3887_v33 }
 0x1b3   :  { %1063 = vmatprep.subr.bf16.mxu0 %v3881_v31  ;;  %1104 = vmatprep.subr.bf16.mxu1 %v3889_v34 }
 0x1b5   :  { %980 = vmatmul.mubr.bf16.vlgmr.msra.gmra.mrb[8].mxu0 %v509_v46  ;;  %1021 = vmatmul.mubr.bf16.vlgmr.msra.gmra.mrb[8].mxu1 %v509_v46  ;;  %v5638_v46 = vld [vmem:[#allocation58_spill] sm:$0xff] }
 0x1b6   :  { %1064 = vmatpush1.bf16.msra.mxu0 %v3891_v35  ;;  %1105 = vmatpush1.bf16.msra.mxu1 %v3900_v39 }
 0x1b7   :  { %1065 = vmatprep.subr.bf16.mxu0 %v3895_v36  ;;  %1106 = vmatprep.subr.bf16.mxu1 %v3905_v41 }
 0x1ba   :  { %1066 = vmatpush1.bf16.msra.mxu0 %v3898_v37  ;;  %1107 = vmatpush1.bf16.msra.mxu1 %v3912_v43 }
 0x1bb   :  { %1067 = vmatprep.subr.bf16.mxu0 %v3902_v40  ;;  %1108 = vmatprep.subr.bf16.mxu1 %v3917_v45 }
 0x1be   :  { %1068 = vmatpush1.bf16.msra.mxu0 %v3910_v42  ;;  %1109 = vmatpush1.bf16.msra.mxu1 %v3924_v47 }
 0x1bf   :  { %1069 = vmatprep.subr.bf16.mxu0 %v3914_v44  ;;  %1110 = vmatprep.subr.bf16.mxu1 %v3927_v48 }
 0x1c2   :  { %1070 = vmatpush1.bf16.msra.mxu0 %v5605_v2  ;;  %1111 = vmatpush1.bf16.msra.mxu1 %v5606_v3 }
 0x1c3   :  { %1071 = vmatprep.subr.bf16.mxu0 %v5607_v4  ;;  %1112 = vmatprep.subr.bf16.mxu1 %v5608_v5 }
 0x1c6   :  { %1072 = vmatpush1.bf16.msra.mxu0 %v5609_v7  ;;  %1113 = vmatpush1.bf16.msra.mxu1 %v5610_v8 }
 0x1c7   :  { %1073 = vmatprep.subr.bf16.mxu0 %v5611_v9  ;;  %1114 = vmatprep.subr.bf16.mxu1 %v5612_v10 }
 0x1ca   :  { %1074 = vmatpush1.bf16.msra.mxu0 %v5613_v11  ;;  %1115 = vmatpush1.bf16.msra.mxu1 %v5614_v12 }
 0x1cb   :  { %1075 = vmatprep.subr.bf16.mxu0 %v5615_v13  ;;  %1116 = vmatprep.subr.bf16.mxu1 %v5616_v14 }
 0x1ce   :  { %1076 = vmatpush1.bf16.msra.mxu0 %v5617_v15  ;;  %1117 = vmatpush1.bf16.msra.mxu1 %v5618_v16 }
 0x1cf   :  { %1077 = vmatprep.subr.bf16.mxu0 %v5619_v17  ;;  %1118 = vmatprep.subr.bf16.mxu1 %v5620_v18 }
 0x1d2   :  { %1078 = vmatpush1.bf16.msra.mxu0 %v5621_v52  ;;  %1119 = vmatpush1.bf16.msra.mxu1 %v5622_v61 }
 0x1d3   :  { %1079 = vmatprep.subr.bf16.mxu0 %v5623_v63  ;;  %1120 = vmatprep.subr.bf16.mxu1 %v5624_v38 }
 0x1d6   :  { %1080 = vmatpush1.bf16.msra.mxu0 %v5625_v56  ;;  %1121 = vmatpush1.bf16.msra.mxu1 %v5626_v57 }
 0x1d7   :  { %1081 = vmatprep.subr.bf16.mxu0 %v5627_v55  ;;  %1122 = vmatprep.subr.bf16.mxu1 %v5628_v54  ;;  %v5639_v54 = vld [vmem:[#allocation59_spill] sm:$0xff] }
 0x1da   :  { %1082 = vmatpush1.bf16.msra.mxu0 %v5629_v59  ;;  %1123 = vmatpush1.bf16.msra.mxu1 %v5630_v58  ;;  %v5640_v59 = vld [vmem:[#allocation60_spill] sm:$0xff]  ;;  %v5641_v58 = vld [vmem:[#allocation61_spill] sm:$0xff] }
 0x1db   :  { %1083 = vmatprep.subr.bf16.mxu0 %v5631_v60  ;;  %1124 = vmatprep.subr.bf16.mxu1 %v5632_v53  ;;  %v5642_v60 = vld [vmem:[#allocation62_spill] sm:$0xff]  ;;  %v5643_v53 = vld [vmem:[#allocation63_spill] sm:$0xff] }
 0x1de   :  { %1084 = vmatpush1.bf16.msra.mxu0 %v5633_v62  ;;  %1125 = vmatpush1.bf16.msra.mxu1 %v5634_v0  ;;  %v5644_v62 = vld [vmem:[#allocation64_spill] sm:$0xff]  ;;  %v5645_v0 = vld [vmem:[#allocation65_spill] sm:$0xff] }
 0x1df   :  { %1085 = vmatprep.subr.bf16.mxu0 %v5635_v1  ;;  %1126 = vmatprep.subr.bf16.mxu1 %v5636_v6  ;;  %v5646_v1 = vld [vmem:[#allocation66_spill] sm:$0xff]  ;;  %v5647_v6 = vld [vmem:[#allocation67_spill] sm:$0xff] }
 0x1e2   :  { %1086 = vmatpush1.bf16.msra.mxu0 %v5637_v50  ;;  %1127 = vmatpush1.bf16.msra.mxu1 %v5638_v46  ;;  %v5648_v50 = vld [vmem:[#allocation68_spill] sm:$0xff]  ;;  %v5649_v46 = vld [vmem:[#allocation69_spill] sm:$0xff] }
 0x1e3   :  { %1087 = vmatprep.subr.bf16.mxu0 %v5639_v54  ;;  %1128 = vmatprep.subr.bf16.mxu1 %v5640_v59  ;;  %v5650_v54 = vld [vmem:[#allocation70_spill] sm:$0xff]  ;;  %v5651_v59 = vld [vmem:[#allocation71_spill] sm:$0xff] }
 0x1e6   :  { %1088 = vmatpush1.bf16.msra.mxu0 %v5641_v58  ;;  %1129 = vmatpush1.bf16.msra.mxu1 %v5642_v60  ;;  %v5652_v58 = vld [vmem:[#allocation72_spill] sm:$0xff]  ;;  %v5653_v60 = vld [vmem:[#allocation73_spill] sm:$0xff] }
 0x1e7   :  { %1089 = vmatprep.subr.bf16.mxu0 %v5643_v53  ;;  %1130 = vmatprep.subr.bf16.mxu1 %v5644_v62  ;;  %v5654_v53 = vld [vmem:[#allocation74_spill] sm:$0xff]  ;;  %v5655_v62 = vld [vmem:[#allocation23_spill] sm:$0xff] }
 0x1ea   :  { %1090 = vmatpush1.bf16.msra.mxu0 %v5645_v0  ;;  %1131 = vmatpush1.bf16.msra.mxu1 %v5646_v1  ;;  %v5656_v0 = vld [vmem:[#allocation24_spill] sm:$0xff]  ;;  %v209_v1 = vlaneseq }
 0x1eb   :  { %1091 = vmatprep.subr.bf16.mxu0 %v5647_v6  ;;  %1132 = vmatprep.subr.bf16.mxu1 %v5648_v50  ;;  %v207_v50 = vld [vmem:[#allocation12] sm:$0xf] }
 0x1ec   :  { %v210_v6 = vshrl.u32 %v209_v1, 7 }
 0x1ee   :  { %1092 = vmatpush1.bf16.msra.mxu0 %v5649_v46  ;;  %1133 = vmatpush1.bf16.msra.mxu1 %v5650_v54  ;;  %v211_v55 = vsub.s32 0, %v210_v6  ;;  %v215_v57 = vsub.s32 1, %v210_v6 }
 0x1ef   :  { %1093 = vmatprep.subr.bf16.mxu0 %v5651_v59  ;;  %1134 = vmatprep.subr.bf16.mxu1 %v5652_v58  ;;  %v223_v58 = vsub.s32 3, %v210_v6 }
 0x1f0   :  { %v4185_v46 = vrot.slane %v207_v50, %v211_v55  ;;  %v4187_v54 = vrot.slane %v207_v50, %v215_v57  ;;  %v219_v57 = vsub.s32 2, %v210_v6 }
 0x1f1   :  { %v4191_v17 = vrot.slane %v207_v50, %v223_v58 }
 0x1f2   :  { %1094 = vmatpush1.bf16.msra.mxu0 %v5653_v60  ;;  %1135 = vmatpush1.bf16.msra.mxu1 %v5654_v53  ;;  %5657 = vst [vmem:[#allocation25_spill] sm:$0xff] %v4185_v46  ;;  %5658 = vst [vmem:[#allocation26_spill] sm:$0xff] %v4187_v54  ;;  %v4194_v16 = vrot.slane %v207_v50, %v219_v57  ;;  %v941_v50 = vld [vmem:[#allocation6 + $0x20] sm:$0xff] }
 0x1f3   :  { %1179 = vmatprep.subr.bf16.mxu0 %v5655_v62  ;;  %1220 = vmatprep.subr.bf16.mxu1 %v5656_v0  ;;  %5659 = vst [vmem:[#allocation27_spill] sm:$0xff] %v4191_v17 }
 0x1f4   :  { %5660 = vst [vmem:[#allocation28_spill] sm:$0xff] %v4194_v16 }
 0x268   :  { %v865_v59 = vpop.f32.mrb[4].mxu0  ;;  %v906_v56 = vpop.f32.mrb[4].mxu1 }
 0x269   :  { %v866_v60 = vadd.f32 %v865_v59, %v4185_v46  ;;  %v867_v38 = vpop.f32.mrb[5].mxu0  ;;  %v908_v53 = vpop.f32.mrb[5].mxu1  ;;  %v907_v46 = vadd.f32 %v906_v56, %v4194_v16 }
 0x26a   :  { %v868_v62 = vadd.f32 %v867_v38, %v4187_v54  ;;  %v869_v63 = vpop.f32.mrb[6].mxu0  ;;  %v910_v0 = vpop.f32.mrb[6].mxu1  ;;  %v909_v55 = vadd.f32 %v908_v53, %v4191_v17 }
 0x26b   :  { %v2798_v61 = vmul.f32 -1.442695, %v866_v60  ;;  %v870_v1 = vpop.f32.mrb[7].mxu0  ;;  %v911_v52 = vpop.f32.mrb[7].mxu1  ;;  %v942_v0 = vld [vmem:[#allocation6 + $0x28] sm:$0xff] }
 0x26c   :  { %v2799_v18 = vmul.f32 -1.442695, %v868_v62  ;;  %v2800_v59 = vmul.f32 -1.442695, %v909_v55 }
 0x26d   :  { %3066 = vpow2.f32 %v2798_v61 }
 0x26e   :  { %3068 = vpow2.f32 %v2799_v18 }
 0x26f   :  { %3070 = vpow2.f32 %v2800_v59 }
 0x270   :  { %3072 = vtanh.f32 %v907_v46 }
 0x277   :  { %v3067_v15 = vpop.eup %3066 }
 0x278   :  { %v3069_v38 = vpop.eup %3068  ;;  %v917_v63 = vadd.f32 1.0, %v3067_v15 }
 0x279   :  { %v923_v60 = vadd.f32 1.0, %v3069_v38  ;;  %v3071_v52 = vpop.eup %3070 }
 0x27a   :  { %3074 = vrcp.f32 %v917_v63  ;;  %v3073_v58 = vpop.eup %3072  ;;  %v930_v62 = vadd.f32 1.0, %v3071_v52 }
 0x27b   :  { %3076 = vrcp.f32 %v923_v60 }
 0x27c   :  { %3078 = vrcp.f32 %v930_v62 }
 0x284   :  { %v3075_v61 = vpop.eup %3074 }
 0x285   :  { %v3077_v6 = vpop.eup %3076  ;;  %v934_v18 = vmul.f32 %v3075_v61, %v3073_v58  ;;  %v944_v61 = vld [vmem:[#allocation6 + $0x38] sm:$0xff] }
 0x286   :  { %v933_v53 = vmul.f32 0.0, %v3077_v6 }
 0x288   :  { %v4197_v1 = vadd.f32 %v934_v18, %v933_v53  ;;  %v981_v56 = vpop.f32.mrb[8].mxu0  ;;  %v1022_v57 = vpop.f32.mrb[8].mxu1  ;;  %v943_v18 = vld [vmem:[#allocation6 + $0x30] sm:$0xff] }
 0x289   :  { %v1029_v15 = vadd.f32 %v981_v56, %v941_v50  ;;  %v983_v55 = vpop.f32.mrb[9].mxu0  ;;  %v1024_v46 = vpop.f32.mrb[9].mxu1  ;;  %v1031_v50 = vadd.f32 %v1022_v57, %v943_v18  ;;  %v4221_v18 = vld [vmem:[#allocation9 + $0x28] ss:$16 sps:$4 sm:$0xff]  }
 0x28a   :  { %5661 = vst [vmem:[#allocation29_spill] sm:$0xff] %v4197_v1  ;;  %3080 = vtanh.f32 %v4197_v1  ;;  %v1030_v59 = vadd.f32 %v983_v55, %v942_v0  ;;  %v985_v38 = vpop.f32.mrb[10].mxu0  ;;  %v1026_v63 = vpop.f32.mrb[10].mxu1  ;;  %v1032_v6 = vadd.f32 %v1024_v46, %v944_v61  ;;  %v4213_v61 = vld [vmem:[#allocation9 + $0x2c] ss:$16 sps:$4 sm:$0xff]  }
 0x28b   :  { %v2801_v60 = vmul.f32 -1.442695, %v1029_v15  ;;  %v986_v16 = vpop.f32.mrb[11].mxu0  ;;  %v1027_v58 = vpop.f32.mrb[11].mxu1 }
 0x28c   :  { %v2802_v52 = vmul.f32 -1.442695, %v1030_v59  ;;  %v3079_v53 = vpop.eup %3078  ;;  %v2803_v62 = vmul.f32 -1.442695, %v1032_v6  ;;  %v4218_v6 = vld [vmem:[#allocation9 + $0x20] ss:$16 sps:$4 sm:$0xff]  }
 0x28d   :  { %3082 = vpow2.f32 %v2801_v60 }
 0x28e   :  { %3084 = vpow2.f32 %v2802_v52  ;;  %v4207_v52 = vld [vmem:[#allocation9 + $0x8] ss:$16 sps:$4 sm:$0xff]  }
 0x28f   :  { %3086 = vpow2.f32 %v2803_v62  ;;  %v4227_v62 = vld [vmem:[#allocation9 + $0x4c] ss:$16 sps:$4 sm:$0xff]  }
 0x290   :  { %3088 = vtanh.f32 %v1031_v50  ;;  %v4230_v50 = vld [vmem:[#allocation9 + $0x40] ss:$16 sps:$4 sm:$0xff]  }
 0x294   :  { %v3081_v17 = vpop.eup %3080 }
 0x295   :  { %v937_v56 = vmul.f32 %v3081_v17, %v3079_v53  ;;  %v4224_v53 = vld [vmem:[#allocation9 + $0x44] ss:$16 sps:$4 sm:$0xff]  }
 0x297   :  { %v3083_v54 = vpop.eup %3082  ;;  %v1062_v14 = vpack.c.bf16 %v937_v56, %v937_v56  ;;  %v4233_v56 = vld [vmem:[#allocation9 + $0x48] ss:$16 sps:$4 sm:$0xff]  }
 0x298   :  { %v3085_v1 = vpop.eup %3084  ;;  %v1037_v0 = vadd.f32 1.0, %v3083_v54 }
 0x299   :  { %v1043_v15 = vadd.f32 1.0, %v3085_v1  ;;  %1095 = vmatprep.mubr.bf16.mxu0 %v1062_v14  ;;  %1136 = vmatprep.mubr.bf16.mxu1 %v1062_v14  ;;  %v3087_v16 = vpop.eup %3086  ;;  %v4204_v14 = vld [vmem:[#allocation9] ss:$16 sps:$4 sm:$0xff]  }
 0x29a   :  { %3090 = vrcp.f32 %v1037_v0  ;;  %v3089_v55 = vpop.eup %3088  ;;  %v1050_v63 = vadd.f32 1.0, %v3087_v16  ;;  %v4236_v0 = vld [vmem:[#allocation9 + $0x64] ss:$16 sps:$4 sm:$0xff]   ;;  %v4242_v16 = vld [vmem:[#allocation9 + $0x60] ss:$16 sps:$4 sm:$0xff]  }
 0x29b   :  { %3092 = vrcp.f32 %v1043_v15  ;;  %v4239_v15 = vld [vmem:[#allocation9 + $0x6c] ss:$16 sps:$4 sm:$0xff]  }
 0x29c   :  { %3094 = vrcp.f32 %v1050_v63  ;;  %v4335_v63 = vld [vmem:[#allocation9 + $0xc] ss:$16 sps:$4 sm:$0xff]  }
 0x29d   :  { %5702 = vst [vmem:[#allocation31_spill] sm:$0xff] %v4335_v63 }
 0x2a4   :  { %v3091_v46 = vpop.eup %3090 }
 0x2a5   :  { %v3093_v59 = vpop.eup %3092  ;;  %v1054_v38 = vmul.f32 %v3091_v46, %v3089_v55  ;;  %v4246_v55 = vld [vmem:[#allocation9 + $0x84] ss:$16 sps:$4 sm:$0xff]   ;;  %v4250_v46 = vld [vmem:[#allocation9 + $0x80] ss:$16 sps:$4 sm:$0xff]  }
 0x2a6   :  { %v1053_v57 = vmul.f32 %v3093_v59, %v4084_v51  ;;  %v3095_v54 = vpop.eup %3094  ;;  %v4210_v51 = vld [vmem:[#allocation9 + $0x24] ss:$16 sps:$4 sm:$0xff]  }
 0x2a7   :  { %v4254_v59 = vld [vmem:[#allocation9 + $0xa4] ss:$16 sps:$4 sm:$0xff]  }
 0x2a8   :  { %v4201_v17 = vadd.f32 %v1054_v38, %v1053_v57  ;;  %v4332_v38 = vld [vmem:[#allocation9 + $0x4] ss:$16 sps:$4 sm:$0xff]  }
 0x2a9   :  { %5701 = vst [vmem:[#allocation30_spill] sm:$0xff] %v4332_v38 }
 0x2aa   :  { %3096 = vtanh.f32 %v4201_v17 }
 0x2b4   :  { %v3097_v60 = vpop.eup %3096 }
 0x2b5   :  { %v1057_v1 = vmul.f32 %v3097_v60, %v3095_v54  ;;  %v5703_v60 = vld [vmem:[#allocation25_spill] sm:$0xff] }
 0x2b7   :  { %v1061_v58 = vpack.c.bf16 %v1057_v1, %v1057_v1 }
 0x2b9   :  { %1096 = vmatmul.mubr.bf16.vlgmr.msra.gmra.mrb[12].mxu0 %v1061_v58  ;;  %1137 = vmatmul.mubr.bf16.vlgmr.msra.gmra.mrb[12].mxu1 %v1061_v58 }
 0x2ba   :  { %1180 = vmatpush1.bf16.msra.mxu0 %v4204_v14  ;;  %1221 = vmatpush1.bf16.msra.mxu1 %v4207_v52 }
 0x2bb   :  { %1181 = vmatprep.subr.bf16.mxu0 %v4210_v51  ;;  %1222 = vmatprep.subr.bf16.mxu1 %v4213_v61 }
 0x2bc   :  { %1211 = vmatprep.mubr.bf16.mxu0 %v5604_v49  ;;  %1252 = vmatprep.mubr.bf16.mxu1 %v5604_v49 }
 0x2be   :  { %1182 = vmatpush1.bf16.msra.mxu0 %v4218_v6  ;;  %1223 = vmatpush1.bf16.msra.mxu1 %v4221_v18 }
 0x2bf   :  { %1183 = vmatprep.subr.bf16.mxu0 %v4224_v53  ;;  %1224 = vmatprep.subr.bf16.mxu1 %v4227_v62 }
 0x2c2   :  { %1184 = vmatpush1.bf16.msra.mxu0 %v4230_v50  ;;  %1225 = vmatpush1.bf16.msra.mxu1 %v4233_v56 }
 0x2c3   :  { %1185 = vmatprep.subr.bf16.mxu0 %v4236_v0  ;;  %1226 = vmatprep.subr.bf16.mxu1 %v4239_v15 }
 0x2c6   :  { %1186 = vmatpush1.bf16.msra.mxu0 %v4242_v16  ;;  %1227 = vmatpush1.bf16.msra.mxu1 %v3845_v19  ;;  %v5662_v19 = vld [vmem:[#allocation36_spill] sm:$0xff] }
 0x2c7   :  { %1187 = vmatprep.subr.bf16.mxu0 %v4246_v55  ;;  %1228 = vmatprep.subr.bf16.mxu1 %v3848_v20  ;;  %v5663_v20 = vld [vmem:[#allocation37_spill] sm:$0xff] }
 0x2ca   :  { %1188 = vmatpush1.bf16.msra.mxu0 %v4250_v46  ;;  %1229 = vmatpush1.bf16.msra.mxu1 %v3857_v23  ;;  %v5666_v23 = vld [vmem:[#allocation40_spill] sm:$0xff] }
 0x2cb   :  { %1189 = vmatprep.subr.bf16.mxu0 %v4254_v59  ;;  %1230 = vmatprep.subr.bf16.mxu1 %v3860_v24  ;;  %v5667_v24 = vld [vmem:[#allocation41_spill] sm:$0xff] }
 0x2ce   :  { %1190 = vmatpush1.bf16.msra.mxu0 %v3851_v21  ;;  %1231 = vmatpush1.bf16.msra.mxu1 %v3869_v27  ;;  %v5664_v21 = vld [vmem:[#allocation38_spill] sm:$0xff]  ;;  %v5670_v27 = vld [vmem:[#allocation44_spill] sm:$0xff] }
 0x2cf   :  { %1191 = vmatprep.subr.bf16.mxu0 %v3853_v22  ;;  %1232 = vmatprep.subr.bf16.mxu1 %v3872_v28  ;;  %v5665_v22 = vld [vmem:[#allocation39_spill] sm:$0xff]  ;;  %v5671_v28 = vld [vmem:[#allocation45_spill] sm:$0xff] }
 0x2d2   :  { %1192 = vmatpush1.bf16.msra.mxu0 %v3863_v25  ;;  %1233 = vmatpush1.bf16.msra.mxu1 %v3879_v30  ;;  %v5668_v25 = vld [vmem:[#allocation42_spill] sm:$0xff]  ;;  %v5673_v30 = vld [vmem:[#allocation47_spill] sm:$0xff] }
 0x2d3   :  { %1193 = vmatprep.subr.bf16.mxu0 %v3865_v26  ;;  %1234 = vmatprep.subr.bf16.mxu1 %v3884_v32  ;;  %v5669_v26 = vld [vmem:[#allocation43_spill] sm:$0xff]  ;;  %v5675_v32 = vld [vmem:[#allocation49_spill] sm:$0xff] }
 0x2d6   :  { %1194 = vmatpush1.bf16.msra.mxu0 %v3875_v29  ;;  %1235 = vmatpush1.bf16.msra.mxu1 %v3887_v33  ;;  %v5672_v29 = vld [vmem:[#allocation46_spill] sm:$0xff] }
 0x2d7   :  { %1295 = vmatprep.subr.bf16.mxu0 %v3881_v31  ;;  %1336 = vmatprep.subr.bf16.mxu1 %v3889_v34  ;;  %v5674_v31 = vld [vmem:[#allocation48_spill] sm:$0xff]  ;;  %v5676_v33 = vld [vmem:[#allocation50_spill] sm:$0xff]  ;;  %v5677_v34 = vld [vmem:[#allocation51_spill] sm:$0xff] }
 0x2d9   :  { %1212 = vmatmul.mubr.bf16.vlgmr.msra.gmra.mrb[16].mxu0 %v1061_v58  ;;  %1253 = vmatmul.mubr.bf16.vlgmr.msra.gmra.mrb[16].mxu1 %v1061_v58 }
 0x2da   :  { %1296 = vmatpush1.bf16.msra.mxu0 %v3891_v35  ;;  %1337 = vmatpush1.bf16.msra.mxu1 %v3900_v39  ;;  %v5678_v35 = vld [vmem:[#allocation52_spill] sm:$0xff]  ;;  %v5681_v39 = vld [vmem:[#allocation55_spill] sm:$0xff] }
 0x2db   :  { %1297 = vmatprep.subr.bf16.mxu0 %v3895_v36  ;;  %1338 = vmatprep.subr.bf16.mxu1 %v3905_v41  ;;  %v5679_v36 = vld [vmem:[#allocation53_spill] sm:$0xff] }
 0x2dc   :  { %v5683_v41 = vld [vmem:[#allocation57_spill] sm:$0xff] }
 0x2de   :  { %1298 = vmatpush1.bf16.msra.mxu0 %v3898_v37  ;;  %1339 = vmatpush1.bf16.msra.mxu1 %v3912_v43  ;;  %v5680_v37 = vld [vmem:[#allocation54_spill] sm:$0xff]  ;;  %v5685_v43 = vld [vmem:[#allocation59_spill] sm:$0xff] }
 0x2df   :  { %1299 = vmatprep.subr.bf16.mxu0 %v3902_v40  ;;  %1340 = vmatprep.subr.bf16.mxu1 %v3917_v45  ;;  %v5682_v40 = vld [vmem:[#allocation56_spill] sm:$0xff]  ;;  %v5687_v45 = vld [vmem:[#allocation61_spill] sm:$0xff] }
 0x2e2   :  { %1300 = vmatpush1.bf16.msra.mxu0 %v3910_v42  ;;  %1341 = vmatpush1.bf16.msra.mxu1 %v3924_v47  ;;  %v5684_v42 = vld [vmem:[#allocation58_spill] sm:$0xff] }
 0x2e3   :  { %1301 = vmatprep.subr.bf16.mxu0 %v3914_v44  ;;  %1342 = vmatprep.subr.bf16.mxu1 %v3927_v48  ;;  %v5686_v44 = vld [vmem:[#allocation60_spill] sm:$0xff]  ;;  %v5688_v47 = vld [vmem:[#allocation62_spill] sm:$0xff]  ;;  %v5689_v48 = vld [vmem:[#allocation63_spill] sm:$0xff] }
 0x2e6   :  { %1302 = vmatpush1.bf16.msra.mxu0 %v5605_v2  ;;  %1343 = vmatpush1.bf16.msra.mxu1 %v5606_v3  ;;  %v5690_v2 = vld [vmem:[#allocation64_spill] sm:$0xff]  ;;  %v5691_v3 = vld [vmem:[#allocation65_spill] sm:$0xff] }
 0x2e7   :  { %1303 = vmatprep.subr.bf16.mxu0 %v5607_v4  ;;  %1344 = vmatprep.subr.bf16.mxu1 %v5608_v5  ;;  %v5692_v4 = vld [vmem:[#allocation66_spill] sm:$0xff]  ;;  %v5693_v5 = vld [vmem:[#allocation67_spill] sm:$0xff] }
 0x2ea   :  { %1304 = vmatpush1.bf16.msra.mxu0 %v5609_v7  ;;  %1345 = vmatpush1.bf16.msra.mxu1 %v5610_v8  ;;  %v5694_v7 = vld [vmem:[#allocation68_spill] sm:$0xff]  ;;  %v5695_v8 = vld [vmem:[#allocation69_spill] sm:$0xff] }
 0x2eb   :  { %1305 = vmatprep.subr.bf16.mxu0 %v5611_v9  ;;  %1346 = vmatprep.subr.bf16.mxu1 %v5612_v10  ;;  %v5696_v9 = vld [vmem:[#allocation70_spill] sm:$0xff]  ;;  %v5697_v10 = vld [vmem:[#allocation71_spill] sm:$0xff] }
 0x2ee   :  { %1306 = vmatpush1.bf16.msra.mxu0 %v5613_v11  ;;  %1347 = vmatpush1.bf16.msra.mxu1 %v5614_v12  ;;  %v5698_v11 = vld [vmem:[#allocation72_spill] sm:$0xff]  ;;  %v5699_v12 = vld [vmem:[#allocation73_spill] sm:$0xff] }
 0x2ef   :  { %1307 = vmatprep.subr.bf16.mxu0 %v5615_v13  ;;  %1348 = vmatprep.subr.bf16.mxu1 %v5662_v19  ;;  %v5700_v13 = vld [vmem:[#allocation74_spill] sm:$0xff] }
 0x2f2   :  { %1308 = vmatpush1.bf16.msra.mxu0 %v5663_v20  ;;  %1349 = vmatpush1.bf16.msra.mxu1 %v5664_v21  ;;  %v5704_v20 = vld [vmem:[#allocation26_spill] sm:$0xff] }
 0x2f3   :  { %1309 = vmatprep.subr.bf16.mxu0 %v5665_v22  ;;  %1350 = vmatprep.subr.bf16.mxu1 %v5666_v23 }
 0x2f6   :  { %1310 = vmatpush1.bf16.msra.mxu0 %v5667_v24  ;;  %1351 = vmatpush1.bf16.msra.mxu1 %v5668_v25 }
 0x2f7   :  { %1311 = vmatprep.subr.bf16.mxu0 %v5669_v26  ;;  %1352 = vmatprep.subr.bf16.mxu1 %v5670_v27 }
 0x2fa   :  { %1312 = vmatpush1.bf16.msra.mxu0 %v5671_v28  ;;  %1353 = vmatpush1.bf16.msra.mxu1 %v5672_v29  ;;  %v5705_v28 = vld [vmem:[#allocation27_spill] sm:$0xff] }
 0x2fb   :  { %1313 = vmatprep.subr.bf16.mxu0 %v5673_v30  ;;  %1354 = vmatprep.subr.bf16.mxu1 %v5674_v31  ;;  %v5706_v31 = vld [vmem:[#allocation28_spill] sm:$0xff] }
 0x2fe   :  { %1314 = vmatpush1.bf16.msra.mxu0 %v5675_v32  ;;  %1355 = vmatpush1.bf16.msra.mxu1 %v5676_v33 }
 0x2ff   :  { %1315 = vmatprep.subr.bf16.mxu0 %v5677_v34  ;;  %1356 = vmatprep.subr.bf16.mxu1 %v5678_v35 }
 0x302   :  { %1316 = vmatpush1.bf16.msra.mxu0 %v5679_v36  ;;  %1357 = vmatpush1.bf16.msra.mxu1 %v5680_v37 }
 0x303   :  { %1317 = vmatprep.subr.bf16.mxu0 %v5681_v39  ;;  %1358 = vmatprep.subr.bf16.mxu1 %v5682_v40 }
 0x306   :  { %1318 = vmatpush1.bf16.msra.mxu0 %v5683_v41  ;;  %1359 = vmatpush1.bf16.msra.mxu1 %v5684_v42 }
 0x307   :  { %1319 = vmatprep.subr.bf16.mxu0 %v5685_v43  ;;  %1360 = vmatprep.subr.bf16.mxu1 %v5686_v44  ;;  %v5707_v44 = vld [vmem:[#allocation29_spill] sm:$0xff] }
 0x30a   :  { %1320 = vmatpush1.bf16.msra.mxu0 %v5687_v45  ;;  %1361 = vmatpush1.bf16.msra.mxu1 %v5688_v47  ;;  %v1173_v47 = vld [vmem:[#allocation6 + $0x40] sm:$0xff] }
 0x30b   :  { %1321 = vmatprep.subr.bf16.mxu0 %v5689_v48  ;;  %1362 = vmatprep.subr.bf16.mxu1 %v5690_v2  ;;  %v1174_v48 = vld [vmem:[#allocation6 + $0x48] sm:$0xff] }
 0x30e   :  { %1322 = vmatpush1.bf16.msra.mxu0 %v5691_v3  ;;  %1363 = vmatpush1.bf16.msra.mxu1 %v5692_v4 }
 0x30f   :  { %1323 = vmatprep.subr.bf16.mxu0 %v5693_v5  ;;  %1364 = vmatprep.subr.bf16.mxu1 %v5694_v7 }
 0x312   :  { %1324 = vmatpush1.bf16.msra.mxu0 %v5695_v8  ;;  %1365 = vmatpush1.bf16.msra.mxu1 %v5696_v9 }
 0x313   :  { %1325 = vmatprep.subr.bf16.mxu0 %v5697_v10  ;;  %1366 = vmatprep.subr.bf16.mxu1 %v5698_v11 }
 0x316   :  { %1326 = vmatpush1.bf16.msra.mxu0 %v5699_v12  ;;  %1367 = vmatpush1.bf16.msra.mxu1 %v5700_v13 }
 0x317   :  { %1411 = vmatprep.subr.bf16.mxu0 %v4332_v38  ;;  %1452 = vmatprep.subr.bf16.mxu1 %v4335_v63 }
 0x38c   :  { %v1097_v57 = vpop.f32.mrb[12].mxu0  ;;  %v1138_v54 = vpop.f32.mrb[12].mxu1 }
 0x38d   :  { %v1098_v1 = vadd.f32 %v1097_v57, %v5703_v60  ;;  %v1099_v58 = vpop.f32.mrb[13].mxu0  ;;  %v1140_v19 = vpop.f32.mrb[13].mxu1  ;;  %v1139_v32 = vadd.f32 %v1138_v54, %v5706_v31 }
 0x38e   :  { %v1100_v21 = vadd.f32 %v1099_v58, %v5704_v20  ;;  %v1101_v22 = vpop.f32.mrb[14].mxu0  ;;  %v1142_v23 = vpop.f32.mrb[14].mxu1  ;;  %v1141_v29 = vadd.f32 %v1140_v19, %v5705_v28  ;;  %v1175_v19 = vld [vmem:[#allocation6 + $0x50] sm:$0xff] }
 0x38f   :  { %v2804_v24 = vmul.f32 -1.442695, %v1098_v1  ;;  %v1102_v25 = vpop.f32.mrb[15].mxu0  ;;  %v1143_v26 = vpop.f32.mrb[15].mxu1  ;;  %v1176_v1 = vld [vmem:[#allocation6 + $0x58] sm:$0xff] }
 0x390   :  { %v2805_v27 = vmul.f32 -1.442695, %v1100_v21  ;;  %v2806_v30 = vmul.f32 -1.442695, %v1141_v29 }
 0x391   :  { %3098 = vpow2.f32 %v2804_v24 }
 0x392   :  { %3100 = vpow2.f32 %v2805_v27 }
 0x393   :  { %3102 = vpow2.f32 %v2806_v30 }
 0x394   :  { %3104 = vtanh.f32 %v1139_v32 }
 0x39b   :  { %v3099_v33 = vpop.eup %3098 }
 0x39c   :  { %v3101_v34 = vpop.eup %3100  ;;  %v1149_v35 = vadd.f32 1.0, %v3099_v33 }
 0x39d   :  { %v1155_v36 = vadd.f32 1.0, %v3101_v34  ;;  %v3103_v37 = vpop.eup %3102 }
 0x39e   :  { %3106 = vrcp.f32 %v1149_v35  ;;  %v3105_v39 = vpop.eup %3104  ;;  %v1162_v43 = vadd.f32 1.0, %v3103_v37 }
 0x39f   :  { %3108 = vrcp.f32 %v1155_v36 }
 0x3a0   :  { %3110 = vrcp.f32 %v1162_v43 }
 0x3a8   :  { %v3107_v40 = vpop.eup %3106 }
 0x3a9   :  { %v3109_v41 = vpop.eup %3108  ;;  %v1166_v42 = vmul.f32 %v3107_v40, %v3105_v39 }
 0x3aa   :  { %v1165_v45 = vmul.f32 %v3109_v41, %v5707_v44  ;;  %v3111_v21 = vpop.eup %3110 }
 0x3ac   :  { %v1213_v2 = vpop.f32.mrb[16].mxu0  ;;  %v1254_v3 = vpop.f32.mrb[16].mxu1  ;;  %v4343_v4 = vadd.f32 %v1166_v42, %v1165_v45 }
 0x3ad   :  { %v1261_v5 = vadd.f32 %v1213_v2, %v1173_v47  ;;  %v1215_v7 = vpop.f32.mrb[17].mxu0  ;;  %v1256_v8 = vpop.f32.mrb[17].mxu1  ;;  %v1263_v24 = vadd.f32 %v1254_v3, %v1175_v19  ;;  %v4369_v47 = vld [vmem:[#allocation9 + $0x8c] ss:$16 sps:$4 sm:$0xff]   ;;  %v4380_v3 = vld [vmem:[#allocation9 + $0xa0] ss:$16 sps:$4 sm:$0xff]  }
 0x3ae   :  { %v1262_v9 = vadd.f32 %v1215_v7, %v1174_v48  ;;  %v1217_v10 = vpop.f32.mrb[18].mxu0  ;;  %v1258_v11 = vpop.f32.mrb[18].mxu1  ;;  %3112 = vtanh.f32 %v4343_v4  ;;  %v1264_v58 = vadd.f32 %v1256_v8, %v1176_v1  ;;  %v4373_v48 = vld [vmem:[#allocation9 + $0x88] ss:$16 sps:$4 sm:$0xff]   ;;  %v4377_v2 = vld [vmem:[#allocation9 + $0xac] ss:$16 sps:$4 sm:$0xff]  }
 0x3af   :  { %v2807_v12 = vmul.f32 -1.442695, %v1261_v5  ;;  %v1218_v13 = vpop.f32.mrb[19].mxu0  ;;  %v1259_v57 = vpop.f32.mrb[19].mxu1  ;;  %v4383_v5 = vld [vmem:[#allocation9 + $0xa8] ss:$16 sps:$4 sm:$0xff]  }
 0x3b0   :  { %v2808_v54 = vmul.f32 -1.442695, %v1262_v9  ;;  %v2809_v23 = vmul.f32 -1.442695, %v1264_v58  ;;  %v4386_v7 = vld [vmem:[#allocation9 + $0xc4] ss:$16 sps:$4 sm:$0xff]  }
 0x3b1   :  { %3114 = vpow2.f32 %v2807_v12  ;;  %v4389_v8 = vld [vmem:[#allocation9 + $0xcc] ss:$16 sps:$4 sm:$0xff]   ;;  %v4392_v9 = vld [vmem:[#allocation9 + $0xc0] ss:$16 sps:$4 sm:$0xff]   ;;  %v4395_v10 = vld [vmem:[#allocation9 + $0xc8] ss:$16 sps:$4 sm:$0xff]  }
 0x3b2   :  { %3116 = vpow2.f32 %v2808_v54  ;;  %v4398_v11 = vld [vmem:[#allocation9 + $0xe4] ss:$16 sps:$4 sm:$0xff]   ;;  %v4401_v12 = vld [vmem:[#allocation9 + $0xec] ss:$16 sps:$4 sm:$0xff]   ;;  %v4404_v13 = vld [vmem:[#allocation9 + $0xe0] ss:$16 sps:$4 sm:$0xff]  }
 0x3b3   :  { %3118 = vpow2.f32 %v2809_v23  ;;  %v4407_v57 = vld [vmem:[#allocation9 + $0xe8] ss:$16 sps:$4 sm:$0xff]   ;;  %v4410_v54 = vld [vmem:[#allocation11 + $0x4] ss:$16 sps:$4 sm:$0xff]   ;;  %v4413_v1 = vld [vmem:[#allocation11 + $0xc] ss:$16 sps:$4 sm:$0xff]  }
 0x3b4   :  { %3120 = vtanh.f32 %v1263_v24  ;;  %v4416_v58 = vld [vmem:[#allocation11] ss:$16 sps:$4 sm:$0xff]   ;;  %v4419_v19 = vld [vmem:[#allocation11 + $0x8] ss:$16 sps:$4 sm:$0xff]  }
 0x3b5   :  { %v4428_v23 = vld [vmem:[#allocation11 + $0x20] ss:$16 sps:$4 sm:$0xff]   ;;  %v4431_v24 = vld [vmem:[#allocation11 + $0x28] ss:$16 sps:$4 sm:$0xff]  }
 0x3b8   :  { %v3113_v22 = vpop.eup %3112 }
 0x3b9   :  { %v1169_v25 = vmul.f32 %v3113_v22, %v3111_v21  ;;  %v4422_v21 = vld [vmem:[#allocation11 + $0x24] ss:$16 sps:$4 sm:$0xff]   ;;  %v4425_v22 = vld [vmem:[#allocation11 + $0x2c] ss:$16 sps:$4 sm:$0xff]  }
 0x3bb   :  { %v3115_v26 = vpop.eup %3114  ;;  %v1294_v27 = vpack.c.bf16 %v1169_v25, %v1169_v25  ;;  %v4434_v25 = vld [vmem:[#allocation11 + $0x44] ss:$16 sps:$4 sm:$0xff]  }
 0x3bc   :  { %v3117_v29 = vpop.eup %3116  ;;  %v1269_v30 = vadd.f32 1.0, %v3115_v26  ;;  %v4437_v26 = vld [vmem:[#allocation11 + $0x4c] ss:$16 sps:$4 sm:$0xff]  }
 0x3bd   :  { %v1275_v32 = vadd.f32 1.0, %v3117_v29  ;;  %1327 = vmatprep.mubr.bf16.mxu0 %v1294_v27  ;;  %1368 = vmatprep.mubr.bf16.mxu1 %v1294_v27  ;;  %v3119_v33 = vpop.eup %3118  ;;  %v4440_v27 = vld [vmem:[#allocation11 + $0x40] ss:$16 sps:$4 sm:$0xff]   ;;  %v4443_v29 = vld [vmem:[#allocation11 + $0x48] ss:$16 sps:$4 sm:$0xff]  }
 0x3be   :  { %3122 = vrcp.f32 %v1269_v30  ;;  %v3121_v34 = vpop.eup %3120  ;;  %v1282_v39 = vadd.f32 1.0, %v3119_v33  ;;  %5708 = vst [vmem:[#allocation32_spill] sm:$0xff] %v4440_v27  ;;  %5709 = vst [vmem:[#allocation33_spill] sm:$0xff] %v4443_v29  ;;  %v4446_v30 = vld [vmem:[#allocation11 + $0x64] ss:$16 sps:$4 sm:$0xff]  }
 0x3bf   :  { %3124 = vrcp.f32 %v1275_v32  ;;  %5710 = vst [vmem:[#allocation34_spill] sm:$0xff] %v4446_v30  ;;  %v4449_v32 = vld [vmem:[#allocation11 + $0x6c] ss:$16 sps:$4 sm:$0xff]   ;;  %v4452_v33 = vld [vmem:[#allocation11 + $0x60] ss:$16 sps:$4 sm:$0xff]  }
 0x3c0   :  { %3126 = vrcp.f32 %v1282_v39  ;;  %5711 = vst [vmem:[#allocation35_spill] sm:$0xff] %v4449_v32  ;;  %5712 = vst [vmem:[#allocation23_spill] sm:$0xff] %v4452_v33  ;;  %v4467_v39 = vld [vmem:[#allocation11 + $0x88] ss:$16 sps:$4 sm:$0xff]  }
 0x3c1   :  { %5717 = vst [vmem:[#allocation39_spill] sm:$0xff] %v4467_v39 }
 0x3c8   :  { %v3123_v35 = vpop.eup %3122 }
 0x3c9   :  { %v3125_v36 = vpop.eup %3124  ;;  %v1286_v37 = vmul.f32 %v3123_v35, %v3121_v34  ;;  %v4455_v34 = vld [vmem:[#allocation11 + $0x68] ss:$16 sps:$4 sm:$0xff]   ;;  %v4458_v35 = vld [vmem:[#allocation11 + $0x84] ss:$16 sps:$4 sm:$0xff]  }
 0x3ca   :  { %v1285_v40 = vmul.f32 %v3125_v36, %v4201_v17  ;;  %v3127_v42 = vpop.eup %3126  ;;  %v4365_v17 = vld [vmem:[#allocation9 + $0x68] ss:$16 sps:$4 sm:$0xff]   ;;  %5713 = vst [vmem:[#allocation24_spill] sm:$0xff] %v4455_v34  ;;  %5714 = vst [vmem:[#allocation36_spill] sm:$0xff] %v4458_v35  ;;  %v4461_v36 = vld [vmem:[#allocation11 + $0x8c] ss:$16 sps:$4 sm:$0xff]  }
 0x3cb   :  { %5715 = vst [vmem:[#allocation37_spill] sm:$0xff] %v4461_v36 }
 0x3cc   :  { %v4347_v41 = vadd.f32 %v1286_v37, %v1285_v40  ;;  %v4464_v37 = vld [vmem:[#allocation11 + $0x80] ss:$16 sps:$4 sm:$0xff]   ;;  %v4470_v40 = vld [vmem:[#allocation11 + $0xa4] ss:$16 sps:$4 sm:$0xff]  }
 0x3cd   :  { %5716 = vst [vmem:[#allocation38_spill] sm:$0xff] %v4464_v37  ;;  %5718 = vst [vmem:[#allocation40_spill] sm:$0xff] %v4470_v40 }
 0x3ce   :  { %3128 = vtanh.f32 %v4347_v41 }
 0x3d8   :  { %v3129_v43 = vpop.eup %3128 }
 0x3d9   :  { %v1289_v44 = vmul.f32 %v3129_v43, %v3127_v42  ;;  %v4473_v42 = vld [vmem:[#allocation11 + $0xac] ss:$16 sps:$4 sm:$0xff]   ;;  %v4476_v43 = vld [vmem:[#allocation11 + $0xa0] ss:$16 sps:$4 sm:$0xff]  }
 0x3da   :  { %5719 = vst [vmem:[#allocation41_spill] sm:$0xff] %v4473_v42  ;;  %5720 = vst [vmem:[#allocation42_spill] sm:$0xff] %v4476_v43 }
 0x3db   :  { %v1293_v45 = vpack.c.bf16 %v1289_v44, %v1289_v44  ;;  %v4479_v44 = vld [vmem:[#allocation11 + $0xa8] ss:$16 sps:$4 sm:$0xff]  }
 0x3dc   :  { %5721 = vst [vmem:[#allocation43_spill] sm:$0xff] %v4479_v44 }
 0x3dd   :  { %1328 = vmatmul.mubr.bf16.vlgmr.msra.gmra.mrb[20].mxu0 %v1293_v45  ;;  %1369 = vmatmul.mubr.bf16.vlgmr.msra.gmra.mrb[20].mxu1 %v1293_v45 }
 0x3de   :  { %1412 = vmatpush1.bf16.msra.mxu0 %v4204_v14  ;;  %1453 = vmatpush1.bf16.msra.mxu1 %v4207_v52 }
 0x3df   :  { %1413 = vmatprep.subr.bf16.mxu0 %v4210_v51  ;;  %1454 = vmatprep.subr.bf16.mxu1 %v4213_v61 }
 0x3e0   :  { %1443 = vmatprep.mubr.bf16.mxu0 %v5604_v49  ;;  %1484 = vmatprep.mubr.bf16.mxu1 %v5604_v49 }
 0x3e2   :  { %1414 = vmatpush1.bf16.msra.mxu0 %v4218_v6  ;;  %1455 = vmatpush1.bf16.msra.mxu1 %v4221_v18 }
 0x3e3   :  { %1415 = vmatprep.subr.bf16.mxu0 %v4224_v53  ;;  %1456 = vmatprep.subr.bf16.mxu1 %v4227_v62 }
 0x3e6   :  { %1416 = vmatpush1.bf16.msra.mxu0 %v4230_v50  ;;  %1457 = vmatpush1.bf16.msra.mxu1 %v4233_v56 }
 0x3e7   :  { %1417 = vmatprep.subr.bf16.mxu0 %v4236_v0  ;;  %1458 = vmatprep.subr.bf16.mxu1 %v4239_v15 }
 0x3ea   :  { %1418 = vmatpush1.bf16.msra.mxu0 %v4242_v16  ;;  %1459 = vmatpush1.bf16.msra.mxu1 %v4365_v17 }
 0x3eb   :  { %1419 = vmatprep.subr.bf16.mxu0 %v4246_v55  ;;  %1460 = vmatprep.subr.bf16.mxu1 %v4369_v47 }
 0x3ee   :  { %1420 = vmatpush1.bf16.msra.mxu0 %v4250_v46  ;;  %1461 = vmatpush1.bf16.msra.mxu1 %v4373_v48 }
 0x3ef   :  { %1421 = vmatprep.subr.bf16.mxu0 %v4254_v59  ;;  %1462 = vmatprep.subr.bf16.mxu1 %v4377_v2 }
 0x3f2   :  { %1422 = vmatpush1.bf16.msra.mxu0 %v4380_v3  ;;  %1463 = vmatpush1.bf16.msra.mxu1 %v4383_v5 }
 0x3f3   :  { %1423 = vmatprep.subr.bf16.mxu0 %v4386_v7  ;;  %1464 = vmatprep.subr.bf16.mxu1 %v4389_v8 }
 0x3f6   :  { %1424 = vmatpush1.bf16.msra.mxu0 %v4392_v9  ;;  %1465 = vmatpush1.bf16.msra.mxu1 %v4395_v10 }
 0x3f7   :  { %1425 = vmatprep.subr.bf16.mxu0 %v4398_v11  ;;  %1466 = vmatprep.subr.bf16.mxu1 %v4401_v12 }
 0x3fa   :  { %1426 = vmatpush1.bf16.msra.mxu0 %v4404_v13  ;;  %1467 = vmatpush1.bf16.msra.mxu1 %v4407_v57 }
 0x3fb   :  { %1527 = vmatprep.subr.bf16.mxu0 %v4410_v54  ;;  %1568 = vmatprep.subr.bf16.mxu1 %v4413_v1 }
 0x3fd   :  { %1444 = vmatmul.mubr.bf16.vlgmr.msra.gmra.mrb[24].mxu0 %v1293_v45  ;;  %1485 = vmatmul.mubr.bf16.vlgmr.msra.gmra.mrb[24].mxu1 %v1293_v45  ;;  %v4482_v45 = vld [vmem:[#allocation11 + $0xc4] ss:$16 sps:$4 sm:$0xff]  }
 0x3fe   :  { %1528 = vmatpush1.bf16.msra.mxu0 %v4416_v58  ;;  %1569 = vmatpush1.bf16.msra.mxu1 %v4419_v19  ;;  %5722 = vst [vmem:[#allocation44_spill] sm:$0xff] %v4482_v45 }
 0x3ff   :  { %1529 = vmatprep.subr.bf16.mxu0 %v4422_v21  ;;  %1570 = vmatprep.subr.bf16.mxu1 %v4425_v22 }
 0x402   :  { %1530 = vmatpush1.bf16.msra.mxu0 %v4428_v23  ;;  %1571 = vmatpush1.bf16.msra.mxu1 %v4431_v24 }
 0x403   :  { %1531 = vmatprep.subr.bf16.mxu0 %v4434_v25  ;;  %1572 = vmatprep.subr.bf16.mxu1 %v4437_v26 }
 0x406   :  { %1532 = vmatpush1.bf16.msra.mxu0 %v4440_v27  ;;  %1573 = vmatpush1.bf16.msra.mxu1 %v4443_v29 }
 0x407   :  { %1533 = vmatprep.subr.bf16.mxu0 %v4446_v30  ;;  %1574 = vmatprep.subr.bf16.mxu1 %v4449_v32 }
 0x40a   :  { %1534 = vmatpush1.bf16.msra.mxu0 %v4452_v33  ;;  %1575 = vmatpush1.bf16.msra.mxu1 %v4455_v34 }
 0x40b   :  { %1535 = vmatprep.subr.bf16.mxu0 %v4458_v35  ;;  %1576 = vmatprep.subr.bf16.mxu1 %v4461_v36 }
 0x40e   :  { %1536 = vmatpush1.bf16.msra.mxu0 %v4464_v37  ;;  %1577 = vmatpush1.bf16.msra.mxu1 %v4467_v39  ;;  %v4485_v39 = vld [vmem:[#allocation11 + $0xcc] ss:$16 sps:$4 sm:$0xff]  }
 0x40f   :  { %1537 = vmatprep.subr.bf16.mxu0 %v4470_v40  ;;  %1578 = vmatprep.subr.bf16.mxu1 %v4473_v42  ;;  %5723 = vst [vmem:[#allocation45_spill] sm:$0xff] %v4485_v39  ;;  %v4488_v40 = vld [vmem:[#allocation11 + $0xc0] ss:$16 sps:$4 sm:$0xff]   ;;  %v4491_v42 = vld [vmem:[#allocation11 + $0xc8] ss:$16 sps:$4 sm:$0xff]  }
 0x410   :  { %5724 = vst [vmem:[#allocation46_spill] sm:$0xff] %v4488_v40  ;;  %5725 = vst [vmem:[#allocation47_spill] sm:$0xff] %v4491_v42 }
 0x412   :  { %1538 = vmatpush1.bf16.msra.mxu0 %v4476_v43  ;;  %1579 = vmatpush1.bf16.msra.mxu1 %v4479_v44  ;;  %v4494_v43 = vld [vmem:[#allocation11 + $0xe4] ss:$16 sps:$4 sm:$0xff]   ;;  %v4497_v44 = vld [vmem:[#allocation11 + $0xec] ss:$16 sps:$4 sm:$0xff]  }
 0x413   :  { %1539 = vmatprep.subr.bf16.mxu0 %v4482_v45  ;;  %1580 = vmatprep.subr.bf16.mxu1 %v4485_v39  ;;  %5726 = vst [vmem:[#allocation48_spill] sm:$0xff] %v4494_v43  ;;  %5727 = vst [vmem:[#allocation49_spill] sm:$0xff] %v4497_v44  ;;  %v4500_v45 = vld [vmem:[#allocation11 + $0xe0] ss:$16 sps:$4 sm:$0xff]   ;;  %v4503_v39 = vld [vmem:[#allocation11 + $0xe8] ss:$16 sps:$4 sm:$0xff]  }
 0x414   :  { %5728 = vst [vmem:[#allocation50_spill] sm:$0xff] %v4500_v45  ;;  %5729 = vst [vmem:[#allocation51_spill] sm:$0xff] %v4503_v39 }
 0x416   :  { %1540 = vmatpush1.bf16.msra.mxu0 %v4488_v40  ;;  %1581 = vmatpush1.bf16.msra.mxu1 %v4491_v42  ;;  %v4506_v40 = vld [vmem:[#allocation11 + $0x104] ss:$16 sps:$4 sm:$0xff]   ;;  %v4509_v42 = vld [vmem:[#allocation11 + $0x10c] ss:$16 sps:$4 sm:$0xff]  }
 0x417   :  { %1541 = vmatprep.subr.bf16.mxu0 %v4494_v43  ;;  %1582 = vmatprep.subr.bf16.mxu1 %v4497_v44  ;;  %5730 = vst [vmem:[#allocation52_spill] sm:$0xff] %v4506_v40  ;;  %5731 = vst [vmem:[#allocation53_spill] sm:$0xff] %v4509_v42  ;;  %v4512_v43 = vld [vmem:[#allocation11 + $0x100] ss:$16 sps:$4 sm:$0xff]   ;;  %v4515_v44 = vld [vmem:[#allocation11 + $0x108] ss:$16 sps:$4 sm:$0xff]  }
 0x418   :  { %5732 = vst [vmem:[#allocation54_spill] sm:$0xff] %v4512_v43  ;;  %5733 = vst [vmem:[#allocation55_spill] sm:$0xff] %v4515_v44 }
 0x41a   :  { %1542 = vmatpush1.bf16.msra.mxu0 %v4500_v45  ;;  %1583 = vmatpush1.bf16.msra.mxu1 %v4503_v39  ;;  %v4518_v45 = vld [vmem:[#allocation11 + $0x124] ss:$16 sps:$4 sm:$0xff]   ;;  %v4521_v39 = vld [vmem:[#allocation11 + $0x12c] ss:$16 sps:$4 sm:$0xff]  }
 0x41b   :  { %1543 = vmatprep.subr.bf16.mxu0 %v4506_v40  ;;  %1584 = vmatprep.subr.bf16.mxu1 %v4509_v42  ;;  %5734 = vst [vmem:[#allocation56_spill] sm:$0xff] %v4518_v45  ;;  %5735 = vst [vmem:[#allocation57_spill] sm:$0xff] %v4521_v39  ;;  %v4524_v40 = vld [vmem:[#allocation11 + $0x120] ss:$16 sps:$4 sm:$0xff]   ;;  %v4527_v42 = vld [vmem:[#allocation11 + $0x128] ss:$16 sps:$4 sm:$0xff]  }
 0x41c   :  { %5736 = vst [vmem:[#allocation58_spill] sm:$0xff] %v4524_v40  ;;  %5737 = vst [vmem:[#allocation59_spill] sm:$0xff] %v4527_v42 }
 0x41e   :  { %1544 = vmatpush1.bf16.msra.mxu0 %v4512_v43  ;;  %1585 = vmatpush1.bf16.msra.mxu1 %v4515_v44  ;;  %v4530_v43 = vld [vmem:[#allocation11 + $0x144] ss:$16 sps:$4 sm:$0xff]   ;;  %v4533_v44 = vld [vmem:[#allocation11 + $0x14c] ss:$16 sps:$4 sm:$0xff]  }
 0x41f   :  { %1545 = vmatprep.subr.bf16.mxu0 %v4518_v45  ;;  %1586 = vmatprep.subr.bf16.mxu1 %v4521_v39  ;;  %5738 = vst [vmem:[#allocation60_spill] sm:$0xff] %v4530_v43  ;;  %5739 = vst [vmem:[#allocation61_spill] sm:$0xff] %v4533_v44  ;;  %v4536_v45 = vld [vmem:[#allocation11 + $0x140] ss:$16 sps:$4 sm:$0xff]   ;;  %v4539_v39 = vld [vmem:[#allocation11 + $0x148] ss:$16 sps:$4 sm:$0xff]  }
 0x420   :  { %5740 = vst [vmem:[#allocation62_spill] sm:$0xff] %v4536_v45  ;;  %5741 = vst [vmem:[#allocation63_spill] sm:$0xff] %v4539_v39 }
 0x422   :  { %1546 = vmatpush1.bf16.msra.mxu0 %v4524_v40  ;;  %1587 = vmatpush1.bf16.msra.mxu1 %v4527_v42  ;;  %v4542_v40 = vld [vmem:[#allocation11 + $0x164] ss:$16 sps:$4 sm:$0xff]   ;;  %v4545_v42 = vld [vmem:[#allocation11 + $0x16c] ss:$16 sps:$4 sm:$0xff]  }
 0x423   :  { %1547 = vmatprep.subr.bf16.mxu0 %v4530_v43  ;;  %1588 = vmatprep.subr.bf16.mxu1 %v4533_v44  ;;  %5742 = vst [vmem:[#allocation64_spill] sm:$0xff] %v4542_v40  ;;  %5743 = vst [vmem:[#allocation65_spill] sm:$0xff] %v4545_v42  ;;  %v4548_v43 = vld [vmem:[#allocation11 + $0x160] ss:$16 sps:$4 sm:$0xff]   ;;  %v4551_v44 = vld [vmem:[#allocation11 + $0x168] ss:$16 sps:$4 sm:$0xff]  }
 0x424   :  { %5744 = vst [vmem:[#allocation66_spill] sm:$0xff] %v4548_v43  ;;  %5745 = vst [vmem:[#allocation67_spill] sm:$0xff] %v4551_v44 }
 0x426   :  { %1548 = vmatpush1.bf16.msra.mxu0 %v4536_v45  ;;  %1589 = vmatpush1.bf16.msra.mxu1 %v4539_v39  ;;  %v4554_v45 = vld [vmem:[#allocation11 + $0x184] ss:$16 sps:$4 sm:$0xff]   ;;  %v4557_v39 = vld [vmem:[#allocation11 + $0x18c] ss:$16 sps:$4 sm:$0xff]  }
 0x427   :  { %1549 = vmatprep.subr.bf16.mxu0 %v4542_v40  ;;  %1590 = vmatprep.subr.bf16.mxu1 %v4545_v42  ;;  %5746 = vst [vmem:[#allocation68_spill] sm:$0xff] %v4554_v45  ;;  %5747 = vst [vmem:[#allocation69_spill] sm:$0xff] %v4557_v39  ;;  %v4560_v40 = vld [vmem:[#allocation11 + $0x180] ss:$16 sps:$4 sm:$0xff]   ;;  %v4563_v42 = vld [vmem:[#allocation11 + $0x188] ss:$16 sps:$4 sm:$0xff]  }
 0x428   :  { %5748 = vst [vmem:[#allocation70_spill] sm:$0xff] %v4560_v40  ;;  %5749 = vst [vmem:[#allocation71_spill] sm:$0xff] %v4563_v42 }
 0x42a   :  { %1550 = vmatpush1.bf16.msra.mxu0 %v4548_v43  ;;  %1591 = vmatpush1.bf16.msra.mxu1 %v4551_v44  ;;  %v4566_v43 = vld [vmem:[#allocation11 + $0x1a4] ss:$16 sps:$4 sm:$0xff]   ;;  %v4569_v44 = vld [vmem:[#allocation11 + $0x1ac] ss:$16 sps:$4 sm:$0xff]  }
 0x42b   :  { %1551 = vmatprep.subr.bf16.mxu0 %v4554_v45  ;;  %1592 = vmatprep.subr.bf16.mxu1 %v4557_v39  ;;  %5750 = vst [vmem:[#allocation72_spill] sm:$0xff] %v4566_v43  ;;  %5751 = vst [vmem:[#allocation73_spill] sm:$0xff] %v4569_v44  ;;  %v4572_v45 = vld [vmem:[#allocation11 + $0x1a0] ss:$16 sps:$4 sm:$0xff]   ;;  %v4575_v39 = vld [vmem:[#allocation11 + $0x1a8] ss:$16 sps:$4 sm:$0xff]  }
 0x42c   :  { %5752 = vst [vmem:[#allocation74_spill] sm:$0xff] %v4572_v45  ;;  %5753 = vst [vmem:[#allocation29_spill] sm:$0xff] %v4575_v39 }
 0x42e   :  { %1552 = vmatpush1.bf16.msra.mxu0 %v4560_v40  ;;  %1593 = vmatpush1.bf16.msra.mxu1 %v4563_v42  ;;  %v4578_v40 = vld [vmem:[#allocation11 + $0x1c4] ss:$16 sps:$4 sm:$0xff]   ;;  %v4581_v42 = vld [vmem:[#allocation11 + $0x1cc] ss:$16 sps:$4 sm:$0xff]  }
 0x42f   :  { %1553 = vmatprep.subr.bf16.mxu0 %v4566_v43  ;;  %1594 = vmatprep.subr.bf16.mxu1 %v4569_v44  ;;  %5754 = vst [vmem:[#allocation75_spill] sm:$0xff] %v4578_v40  ;;  %5755 = vst [vmem:[#allocation76_spill] sm:$0xff] %v4581_v42  ;;  %v4584_v43 = vld [vmem:[#allocation11 + $0x1c0] ss:$16 sps:$4 sm:$0xff]   ;;  %v4587_v44 = vld [vmem:[#allocation11 + $0x1c8] ss:$16 sps:$4 sm:$0xff]  }
 0x430   :  { %5756 = vst [vmem:[#allocation77_spill] sm:$0xff] %v4584_v43  ;;  %5757 = vst [vmem:[#allocation78_spill] sm:$0xff] %v4587_v44 }
 0x432   :  { %1554 = vmatpush1.bf16.msra.mxu0 %v4572_v45  ;;  %1595 = vmatpush1.bf16.msra.mxu1 %v4575_v39  ;;  %v4590_v45 = vld [vmem:[#allocation11 + $0x1e4] ss:$16 sps:$4 sm:$0xff]   ;;  %v4593_v39 = vld [vmem:[#allocation11 + $0x1ec] ss:$16 sps:$4 sm:$0xff]  }
 0x433   :  { %1555 = vmatprep.subr.bf16.mxu0 %v4578_v40  ;;  %1596 = vmatprep.subr.bf16.mxu1 %v4581_v42  ;;  %5758 = vst [vmem:[#allocation79_spill] sm:$0xff] %v4590_v45  ;;  %5759 = vst [vmem:[#allocation80_spill] sm:$0xff] %v4593_v39  ;;  %v4596_v40 = vld [vmem:[#allocation11 + $0x1e0] ss:$16 sps:$4 sm:$0xff]   ;;  %v4599_v42 = vld [vmem:[#allocation11 + $0x1e8] ss:$16 sps:$4 sm:$0xff]  }
 0x434   :  { %5760 = vst [vmem:[#allocation81_spill] sm:$0xff] %v4596_v40  ;;  %5761 = vst [vmem:[#allocation82_spill] sm:$0xff] %v4599_v42 }
 0x436   :  { %1556 = vmatpush1.bf16.msra.mxu0 %v4584_v43  ;;  %1597 = vmatpush1.bf16.msra.mxu1 %v4587_v44 }
 0x437   :  { %1557 = vmatprep.subr.bf16.mxu0 %v4590_v45  ;;  %1598 = vmatprep.subr.bf16.mxu1 %v4593_v39 }
 0x43a   :  { %1558 = vmatpush1.bf16.msra.mxu0 %v4596_v40  ;;  %1599 = vmatpush1.bf16.msra.mxu1 %v4599_v42 }
 0x43b   :  { %1643 = vmatprep.subr.bf16.mxu0 %v4332_v38  ;;  %1684 = vmatprep.subr.bf16.mxu1 %v4335_v63 }
 0x4b0   :  { %v1329_v44 = vpop.f32.mrb[20].mxu0  ;;  %v1370_v43 = vpop.f32.mrb[20].mxu1 }
 0x4b1   :  { %v1330_v45 = vadd.f32 %v1329_v44, %v5703_v60  ;;  %v1331_v37 = vpop.f32.mrb[21].mxu0  ;;  %v1372_v36 = vpop.f32.mrb[21].mxu1  ;;  %v1371_v63 = vadd.f32 %v1370_v43, %v5706_v31 }
 0x4b2   :  { %v1332_v39 = vadd.f32 %v1331_v37, %v5704_v20  ;;  %v1333_v35 = vpop.f32.mrb[22].mxu0  ;;  %v1374_v34 = vpop.f32.mrb[22].mxu1  ;;  %v1373_v38 = vadd.f32 %v1372_v36, %v5705_v28  ;;  %v1405_v36 = vld [vmem:[#allocation6 + $0x60] sm:$0xff]  ;;  %v1407_v28 = vld [vmem:[#allocation6 + $0x70] sm:$0xff] }
 0x4b3   :  { %v2810_v33 = vmul.f32 -1.442695, %v1330_v45  ;;  %v1334_v40 = vpop.f32.mrb[23].mxu0  ;;  %v1375_v32 = vpop.f32.mrb[23].mxu1 }
 0x4b4   :  { %v2811_v30 = vmul.f32 -1.442695, %v1332_v39  ;;  %v2812_v42 = vmul.f32 -1.442695, %v1373_v38  ;;  %v1406_v38 = vld [vmem:[#allocation6 + $0x68] sm:$0xff] }
 0x4b5   :  { %3130 = vpow2.f32 %v2810_v33 }
 0x4b6   :  { %3132 = vpow2.f32 %v2811_v30 }
 0x4b7   :  { %3134 = vpow2.f32 %v2812_v42 }
 0x4b8   :  { %3136 = vtanh.f32 %v1371_v63 }
 0x4bf   :  { %v3131_v29 = vpop.eup %3130 }
 0x4c0   :  { %v3133_v27 = vpop.eup %3132  ;;  %v1381_v44 = vadd.f32 1.0, %v3131_v29 }
 0x4c1   :  { %v1387_v60 = vadd.f32 1.0, %v3133_v27  ;;  %v3135_v34 = vpop.eup %3134 }
 0x4c2   :  { %3138 = vrcp.f32 %v1381_v44  ;;  %v3137_v35 = vpop.eup %3136  ;;  %v1394_v33 = vadd.f32 1.0, %v3135_v34 }
 0x4c3   :  { %3140 = vrcp.f32 %v1387_v60 }
 0x4c4   :  { %3142 = vrcp.f32 %v1394_v33 }
 0x4cc   :  { %v3139_v37 = vpop.eup %3138 }
 0x4cd   :  { %v3141_v32 = vpop.eup %3140  ;;  %v1398_v39 = vmul.f32 %v3139_v37, %v3137_v35 }
 0x4ce   :  { %v1397_v30 = vmul.f32 %v3141_v32, %v4343_v4  ;;  %v1408_v4 = vld [vmem:[#allocation6 + $0x78] sm:$0xff] }
 0x4d0   :  { %v1445_v40 = vpop.f32.mrb[24].mxu0  ;;  %v1486_v43 = vpop.f32.mrb[24].mxu1  ;;  %v4609_v45 = vadd.f32 %v1398_v39, %v1397_v30 }
 0x4d1   :  { %v1493_v29 = vadd.f32 %v1445_v40, %v1405_v36  ;;  %v1447_v63 = vpop.f32.mrb[25].mxu0  ;;  %v1488_v27 = vpop.f32.mrb[25].mxu1  ;;  %v1495_v36 = vadd.f32 %v1486_v43, %v1407_v28 }
 0x4d2   :  { %v1494_v42 = vadd.f32 %v1447_v63, %v1406_v38  ;;  %v1449_v60 = vpop.f32.mrb[26].mxu0  ;;  %v1490_v44 = vpop.f32.mrb[26].mxu1  ;;  %3144 = vtanh.f32 %v4609_v45  ;;  %v1496_v32 = vadd.f32 %v1488_v27, %v1408_v4 }
 0x4d3   :  { %v2813_v31 = vmul.f32 -1.442695, %v1493_v29  ;;  %v1450_v35 = vpop.f32.mrb[27].mxu0  ;;  %v1491_v34 = vpop.f32.mrb[27].mxu1 }
 0x4d4   :  { %v2814_v37 = vmul.f32 -1.442695, %v1494_v42  ;;  %v3143_v39 = vpop.eup %3142  ;;  %v2815_v33 = vmul.f32 -1.442695, %v1496_v32 }
 0x4d5   :  { %3146 = vpow2.f32 %v2813_v31 }
 0x4d6   :  { %3148 = vpow2.f32 %v2814_v37 }
 0x4d7   :  { %3150 = vpow2.f32 %v2815_v33  ;;  %v5781_v33 = vld [vmem:[#allocation49_spill] sm:$0xff] }
 0x4d8   :  { %3152 = vtanh.f32 %v1495_v36  ;;  %v5782_v36 = vld [vmem:[#allocation50_spill] sm:$0xff] }
 0x4dc   :  { %v3145_v30 = vpop.eup %3144 }
 0x4dd   :  { %v1401_v40 = vmul.f32 %v3145_v30, %v3143_v39  ;;  %v5779_v39 = vld [vmem:[#allocation47_spill] sm:$0xff]  ;;  %v5780_v30 = vld [vmem:[#allocation48_spill] sm:$0xff] }
 0x4df   :  { %v3147_v20 = vpop.eup %3146  ;;  %v1526_v38 = vpack.c.bf16 %v1401_v40, %v1401_v40  ;;  %v5783_v40 = vld [vmem:[#allocation51_spill] sm:$0xff] }
 0x4e0   :  { %v3149_v63 = vpop.eup %3148  ;;  %v1501_v60 = vadd.f32 1.0, %v3147_v20 }
 0x4e1   :  { %v1507_v29 = vadd.f32 1.0, %v3149_v63  ;;  %1559 = vmatprep.mubr.bf16.mxu0 %v1526_v38  ;;  %1600 = vmatprep.mubr.bf16.mxu1 %v1526_v38  ;;  %v3151_v31 = vpop.eup %3150  ;;  %v5784_v38 = vld [vmem:[#allocation52_spill] sm:$0xff]  ;;  %v5785_v63 = vld [vmem:[#allocation53_spill] sm:$0xff] }
 0x4e2   :  { %3154 = vrcp.f32 %v1501_v60  ;;  %v3153_v42 = vpop.eup %3152  ;;  %v1514_v34 = vadd.f32 1.0, %v3151_v31  ;;  %v5786_v60 = vld [vmem:[#allocation54_spill] sm:$0xff]  ;;  %v5788_v31 = vld [vmem:[#allocation56_spill] sm:$0xff] }
 0x4e3   :  { %3156 = vrcp.f32 %v1507_v29  ;;  %v5787_v29 = vld [vmem:[#allocation55_spill] sm:$0xff] }
 0x4e4   :  { %3158 = vrcp.f32 %v1514_v34  ;;  %v5793_v34 = vld [vmem:[#allocation61_spill] sm:$0xff] }
 0x4ec   :  { %v3155_v27 = vpop.eup %3154 }
 0x4ed   :  { %v3157_v44 = vpop.eup %3156  ;;  %v1518_v35 = vmul.f32 %v3155_v27, %v3153_v42  ;;  %v5789_v42 = vld [vmem:[#allocation57_spill] sm:$0xff]  ;;  %v5790_v27 = vld [vmem:[#allocation58_spill] sm:$0xff] }
 0x4ee   :  { %v1517_v28 = vmul.f32 %v3157_v44, %v4347_v41  ;;  %v3159_v20 = vpop.eup %3158  ;;  %v5778_v41 = vld [vmem:[#allocation46_spill] sm:$0xff]  ;;  %v5791_v44 = vld [vmem:[#allocation59_spill] sm:$0xff] }
 0x4f0   :  { %v4613_v43 = vadd.f32 %v1518_v35, %v1517_v28  ;;  %v5792_v35 = vld [vmem:[#allocation60_spill] sm:$0xff]  ;;  %v5794_v28 = vld [vmem:[#allocation62_spill] sm:$0xff] }
 0x4f2   :  { %3160 = vtanh.f32 %v4613_v43 }
 0x4fc   :  { %v3161_v37 = vpop.eup %3160 }
 0x4fd   :  { %v1521_v4 = vmul.f32 %v3161_v37, %v3159_v20  ;;  %v5795_v20 = vld [vmem:[#allocation63_spill] sm:$0xff]  ;;  %v5796_v37 = vld [vmem:[#allocation64_spill] sm:$0xff] }
 0x4ff   :  { %v1525_v32 = vpack.c.bf16 %v1521_v4, %v1521_v4  ;;  %v5797_v4 = vld [vmem:[#allocation65_spill] sm:$0xff] }
 0x501   :  { %1560 = vmatmul.mubr.bf16.vlgmr.msra.gmra.mrb[28].mxu0 %v1525_v32  ;;  %1601 = vmatmul.mubr.bf16.vlgmr.msra.gmra.mrb[28].mxu1 %v1525_v32 }
 0x502   :  { %1644 = vmatpush1.bf16.msra.mxu0 %v4204_v14  ;;  %1685 = vmatpush1.bf16.msra.mxu1 %v4207_v52  ;;  %v5762_v14 = vld [vmem:[#allocation32_spill] sm:$0xff]  ;;  %v5763_v52 = vld [vmem:[#allocation33_spill] sm:$0xff] }
 0x503   :  { %1645 = vmatprep.subr.bf16.mxu0 %v4210_v51  ;;  %1686 = vmatprep.subr.bf16.mxu1 %v4213_v61  ;;  %v5764_v51 = vld [vmem:[#allocation34_spill] sm:$0xff]  ;;  %v5765_v61 = vld [vmem:[#allocation35_spill] sm:$0xff] }
 0x504   :  { %1675 = vmatprep.mubr.bf16.mxu0 %v5604_v49  ;;  %1716 = vmatprep.mubr.bf16.mxu1 %v5604_v49 }
 0x506   :  { %1646 = vmatpush1.bf16.msra.mxu0 %v4218_v6  ;;  %1687 = vmatpush1.bf16.msra.mxu1 %v4221_v18  ;;  %v5766_v6 = vld [vmem:[#allocation23_spill] sm:$0xff]  ;;  %v5767_v18 = vld [vmem:[#allocation24_spill] sm:$0xff] }
 0x507   :  { %1647 = vmatprep.subr.bf16.mxu0 %v4224_v53  ;;  %1688 = vmatprep.subr.bf16.mxu1 %v4227_v62  ;;  %v5768_v53 = vld [vmem:[#allocation36_spill] sm:$0xff]  ;;  %v5769_v62 = vld [vmem:[#allocation37_spill] sm:$0xff] }
 0x50a   :  { %1648 = vmatpush1.bf16.msra.mxu0 %v4230_v50  ;;  %1689 = vmatpush1.bf16.msra.mxu1 %v4233_v56  ;;  %v5770_v50 = vld [vmem:[#allocation38_spill] sm:$0xff]  ;;  %v5771_v56 = vld [vmem:[#allocation39_spill] sm:$0xff] }
 0x50b   :  { %1649 = vmatprep.subr.bf16.mxu0 %v4236_v0  ;;  %1690 = vmatprep.subr.bf16.mxu1 %v4239_v15  ;;  %v5772_v0 = vld [vmem:[#allocation40_spill] sm:$0xff]  ;;  %v5773_v15 = vld [vmem:[#allocation41_spill] sm:$0xff] }
 0x50e   :  { %1650 = vmatpush1.bf16.msra.mxu0 %v4242_v16  ;;  %1691 = vmatpush1.bf16.msra.mxu1 %v4365_v17  ;;  %v5774_v16 = vld [vmem:[#allocation42_spill] sm:$0xff] }
 0x50f   :  { %1651 = vmatprep.subr.bf16.mxu0 %v4246_v55  ;;  %1692 = vmatprep.subr.bf16.mxu1 %v4369_v47  ;;  %v5775_v55 = vld [vmem:[#allocation43_spill] sm:$0xff] }
 0x512   :  { %1652 = vmatpush1.bf16.msra.mxu0 %v4250_v46  ;;  %1693 = vmatpush1.bf16.msra.mxu1 %v4373_v48  ;;  %v5776_v46 = vld [vmem:[#allocation44_spill] sm:$0xff] }
 0x513   :  { %1653 = vmatprep.subr.bf16.mxu0 %v4254_v59  ;;  %1694 = vmatprep.subr.bf16.mxu1 %v4377_v2  ;;  %v5777_v59 = vld [vmem:[#allocation45_spill] sm:$0xff] }
 0x516   :  { %1654 = vmatpush1.bf16.msra.mxu0 %v4380_v3  ;;  %1695 = vmatpush1.bf16.msra.mxu1 %v4383_v5 }
 0x517   :  { %1655 = vmatprep.subr.bf16.mxu0 %v4386_v7  ;;  %1696 = vmatprep.subr.bf16.mxu1 %v4389_v8 }
 0x51a   :  { %1656 = vmatpush1.bf16.msra.mxu0 %v4392_v9  ;;  %1697 = vmatpush1.bf16.msra.mxu1 %v4395_v10 }
 0x51b   :  { %1657 = vmatprep.subr.bf16.mxu0 %v4398_v11  ;;  %1698 = vmatprep.subr.bf16.mxu1 %v4401_v12 }
 0x51e   :  { %1658 = vmatpush1.bf16.msra.mxu0 %v4404_v13  ;;  %1699 = vmatpush1.bf16.msra.mxu1 %v4407_v57 }
 0x51f   :  { %1759 = vmatprep.subr.bf16.mxu0 %v4410_v54  ;;  %1800 = vmatprep.subr.bf16.mxu1 %v4413_v1 }
 0x521   :  { %1676 = vmatmul.mubr.bf16.vlgmr.msra.gmra.mrb[32].mxu0 %v1525_v32  ;;  %1717 = vmatmul.mubr.bf16.vlgmr.msra.gmra.mrb[32].mxu1 %v1525_v32  ;;  %v5798_v32 = vld [vmem:[#allocation66_spill] sm:$0xff] }
 0x522   :  { %1760 = vmatpush1.bf16.msra.mxu0 %v4416_v58  ;;  %1801 = vmatpush1.bf16.msra.mxu1 %v4419_v19 }
 0x523   :  { %1761 = vmatprep.subr.bf16.mxu0 %v4422_v21  ;;  %1802 = vmatprep.subr.bf16.mxu1 %v4425_v22 }
 0x526   :  { %1762 = vmatpush1.bf16.msra.mxu0 %v4428_v23  ;;  %1803 = vmatpush1.bf16.msra.mxu1 %v4431_v24 }
 0x527   :  { %1763 = vmatprep.subr.bf16.mxu0 %v4434_v25  ;;  %1804 = vmatprep.subr.bf16.mxu1 %v4437_v26 }
 0x52a   :  { %1764 = vmatpush1.bf16.msra.mxu0 %v5762_v14  ;;  %1805 = vmatpush1.bf16.msra.mxu1 %v5763_v52 }
 0x52b   :  { %1765 = vmatprep.subr.bf16.mxu0 %v5764_v51  ;;  %1806 = vmatprep.subr.bf16.mxu1 %v5765_v61 }
 0x52e   :  { %1766 = vmatpush1.bf16.msra.mxu0 %v5766_v6  ;;  %1807 = vmatpush1.bf16.msra.mxu1 %v5767_v18 }
 0x52f   :  { %1767 = vmatprep.subr.bf16.mxu0 %v5768_v53  ;;  %1808 = vmatprep.subr.bf16.mxu1 %v5769_v62 }
 0x532   :  { %1768 = vmatpush1.bf16.msra.mxu0 %v5770_v50  ;;  %1809 = vmatpush1.bf16.msra.mxu1 %v5771_v56 }
 0x533   :  { %1769 = vmatprep.subr.bf16.mxu0 %v5772_v0  ;;  %1810 = vmatprep.subr.bf16.mxu1 %v5773_v15 }
 0x536   :  { %1770 = vmatpush1.bf16.msra.mxu0 %v5774_v16  ;;  %1811 = vmatpush1.bf16.msra.mxu1 %v5775_v55 }
 0x537   :  { %1771 = vmatprep.subr.bf16.mxu0 %v5776_v46  ;;  %1812 = vmatprep.subr.bf16.mxu1 %v5777_v59 }
 0x53a   :  { %1772 = vmatpush1.bf16.msra.mxu0 %v5778_v41  ;;  %1813 = vmatpush1.bf16.msra.mxu1 %v5779_v39 }
 0x53b   :  { %1773 = vmatprep.subr.bf16.mxu0 %v5780_v30  ;;  %1814 = vmatprep.subr.bf16.mxu1 %v5781_v33 }
 0x53e   :  { %1774 = vmatpush1.bf16.msra.mxu0 %v5782_v36  ;;  %1815 = vmatpush1.bf16.msra.mxu1 %v5783_v40 }
 0x53f   :  { %1775 = vmatprep.subr.bf16.mxu0 %v5784_v38  ;;  %1816 = vmatprep.subr.bf16.mxu1 %v5785_v63  ;;  %v5819_v63 = vld [vmem:[#allocation26_spill] sm:$0xff] }
 0x542   :  { %1776 = vmatpush1.bf16.msra.mxu0 %v5786_v60  ;;  %1817 = vmatpush1.bf16.msra.mxu1 %v5787_v29  ;;  %v5818_v29 = vld [vmem:[#allocation25_spill] sm:$0xff] }
 0x543   :  { %1777 = vmatprep.subr.bf16.mxu0 %v5788_v31  ;;  %1818 = vmatprep.subr.bf16.mxu1 %v5789_v42  ;;  %v5799_v31 = vld [vmem:[#allocation67_spill] sm:$0xff]  ;;  %v5800_v42 = vld [vmem:[#allocation68_spill] sm:$0xff] }
 0x546   :  { %1778 = vmatpush1.bf16.msra.mxu0 %v5790_v27  ;;  %1819 = vmatpush1.bf16.msra.mxu1 %v5791_v44  ;;  %v5801_v27 = vld [vmem:[#allocation69_spill] sm:$0xff]  ;;  %v5802_v44 = vld [vmem:[#allocation70_spill] sm:$0xff] }
 0x547   :  { %1779 = vmatprep.subr.bf16.mxu0 %v5792_v35  ;;  %1820 = vmatprep.subr.bf16.mxu1 %v5793_v34  ;;  %v5803_v35 = vld [vmem:[#allocation71_spill] sm:$0xff]  ;;  %v5804_v34 = vld [vmem:[#allocation72_spill] sm:$0xff] }
 0x54a   :  { %1780 = vmatpush1.bf16.msra.mxu0 %v5794_v28  ;;  %1821 = vmatpush1.bf16.msra.mxu1 %v5795_v20  ;;  %v5805_v28 = vld [vmem:[#allocation73_spill] sm:$0xff]  ;;  %v5806_v20 = vld [vmem:[#allocation74_spill] sm:$0xff] }
 0x54b   :  { %1781 = vmatprep.subr.bf16.mxu0 %v5796_v37  ;;  %1822 = vmatprep.subr.bf16.mxu1 %v5797_v4  ;;  %v5807_v37 = vld [vmem:[#allocation29_spill] sm:$0xff]  ;;  %v5808_v4 = vld [vmem:[#allocation75_spill] sm:$0xff] }
 0x54e   :  { %1782 = vmatpush1.bf16.msra.mxu0 %v5798_v32  ;;  %1823 = vmatpush1.bf16.msra.mxu1 %v5799_v31  ;;  %v5809_v32 = vld [vmem:[#allocation76_spill] sm:$0xff]  ;;  %v5810_v31 = vld [vmem:[#allocation77_spill] sm:$0xff] }
 0x54f   :  { %1783 = vmatprep.subr.bf16.mxu0 %v5800_v42  ;;  %1824 = vmatprep.subr.bf16.mxu1 %v5801_v27  ;;  %v5811_v42 = vld [vmem:[#allocation78_spill] sm:$0xff]  ;;  %v5812_v27 = vld [vmem:[#allocation79_spill] sm:$0xff] }
 0x552   :  { %1784 = vmatpush1.bf16.msra.mxu0 %v5802_v44  ;;  %1825 = vmatpush1.bf16.msra.mxu1 %v5803_v35  ;;  %v5813_v44 = vld [vmem:[#allocation80_spill] sm:$0xff]  ;;  %v5814_v35 = vld [vmem:[#allocation81_spill] sm:$0xff] }
 0x553   :  { %1785 = vmatprep.subr.bf16.mxu0 %v5804_v34  ;;  %1826 = vmatprep.subr.bf16.mxu1 %v5805_v28  ;;  %v5815_v34 = vld [vmem:[#allocation82_spill] sm:$0xff] }
 0x554   :  { %v5816_v28 = vld [vmem:[#allocation30_spill] sm:$0xff] }
 0x556   :  { %1786 = vmatpush1.bf16.msra.mxu0 %v5806_v20  ;;  %1827 = vmatpush1.bf16.msra.mxu1 %v5807_v37  ;;  %v5817_v20 = vld [vmem:[#allocation31_spill] sm:$0xff] }
 0x557   :  { %1787 = vmatprep.subr.bf16.mxu0 %v5808_v4  ;;  %1828 = vmatprep.subr.bf16.mxu1 %v5809_v32 }
 0x55a   :  { %1788 = vmatpush1.bf16.msra.mxu0 %v5810_v31  ;;  %1829 = vmatpush1.bf16.msra.mxu1 %v5811_v42 }
 0x55b   :  { %1789 = vmatprep.subr.bf16.mxu0 %v5812_v27  ;;  %1830 = vmatprep.subr.bf16.mxu1 %v5813_v44 }
 0x55e   :  { %1790 = vmatpush1.bf16.msra.mxu0 %v5814_v35  ;;  %1831 = vmatpush1.bf16.msra.mxu1 %v5815_v34  ;;  %v5820_v34 = vld [vmem:[#allocation27_spill] sm:$0xff] }
 0x55f   :  { %1875 = vmatprep.subr.bf16.mxu0 %v5816_v28  ;;  %1916 = vmatprep.subr.bf16.mxu1 %v5817_v20  ;;  %v5821_v20 = vld [vmem:[#allocation28_spill] sm:$0xff] }
 0x5d4   :  { %v1561_v37 = vpop.f32.mrb[28].mxu0  ;;  %v1602_v4 = vpop.f32.mrb[28].mxu1 }
 0x5d5   :  { %v1562_v32 = vadd.f32 %v1561_v37, %v5818_v29  ;;  %v1563_v60 = vpop.f32.mrb[29].mxu0  ;;  %v1604_v31 = vpop.f32.mrb[29].mxu1  ;;  %v1603_v30 = vadd.f32 %v1602_v4, %v5821_v20 }
 0x5d6   :  { %v1564_v42 = vadd.f32 %v1563_v60, %v5819_v63  ;;  %v1565_v38 = vpop.f32.mrb[30].mxu0  ;;  %v1606_v27 = vpop.f32.mrb[30].mxu1  ;;  %v1605_v28 = vadd.f32 %v1604_v31, %v5820_v34  ;;  %v1637_v31 = vld [vmem:[#allocation6 + $0x80] sm:$0xff]  ;;  %v1639_v34 = vld [vmem:[#allocation6 + $0x90] sm:$0xff] }
 0x5d7   :  { %v2816_v40 = vmul.f32 -1.442695, %v1562_v32  ;;  %v1566_v44 = vpop.f32.mrb[31].mxu0  ;;  %v1607_v36 = vpop.f32.mrb[31].mxu1 }
 0x5d8   :  { %v2817_v35 = vmul.f32 -1.442695, %v1564_v42  ;;  %v2818_v33 = vmul.f32 -1.442695, %v1605_v28 }
 0x5d9   :  { %3162 = vpow2.f32 %v2816_v40 }
 0x5da   :  { %3164 = vpow2.f32 %v2817_v35  ;;  %v1638_v35 = vld [vmem:[#allocation6 + $0x88] sm:$0xff] }
 0x5db   :  { %3166 = vpow2.f32 %v2818_v33 }
 0x5dc   :  { %3168 = vtanh.f32 %v1603_v30 }
 0x5e3   :  { %v3163_v39 = vpop.eup %3162 }
 0x5e4   :  { %v3165_v41 = vpop.eup %3164  ;;  %v1613_v37 = vadd.f32 1.0, %v3163_v39 }
 0x5e5   :  { %v1619_v29 = vadd.f32 1.0, %v3165_v41  ;;  %v3167_v38 = vpop.eup %3166 }
 0x5e6   :  { %3170 = vrcp.f32 %v1613_v37  ;;  %v3169_v60 = vpop.eup %3168  ;;  %v1626_v40 = vadd.f32 1.0, %v3167_v38 }
 0x5e7   :  { %3172 = vrcp.f32 %v1619_v29 }
 0x5e8   :  { %3174 = vrcp.f32 %v1626_v40 }
 0x5f0   :  { %v3171_v27 = vpop.eup %3170 }
 0x5f1   :  { %v3173_v36 = vpop.eup %3172  ;;  %v1630_v42 = vmul.f32 %v3171_v27, %v3169_v60 }
 0x5f2   :  { %v1629_v44 = vmul.f32 %v3173_v36, %v4609_v45  ;;  %v1640_v45 = vld [vmem:[#allocation6 + $0x98] sm:$0xff] }
 0x5f4   :  { %v1677_v32 = vpop.f32.mrb[32].mxu0  ;;  %v1718_v4 = vpop.f32.mrb[32].mxu1  ;;  %v4719_v28 = vadd.f32 %v1630_v42, %v1629_v44 }
 0x5f5   :  { %v1725_v39 = vadd.f32 %v1677_v32, %v1637_v31  ;;  %v1679_v30 = vpop.f32.mrb[33].mxu0  ;;  %v1720_v41 = vpop.f32.mrb[33].mxu1  ;;  %v1727_v31 = vadd.f32 %v1718_v4, %v1639_v34 }
 0x5f6   :  { %v1726_v33 = vadd.f32 %v1679_v30, %v1638_v35  ;;  %v1681_v29 = vpop.f32.mrb[34].mxu0  ;;  %v1722_v37 = vpop.f32.mrb[34].mxu1  ;;  %3176 = vtanh.f32 %v4719_v28  ;;  %v1728_v36 = vadd.f32 %v1720_v41, %v1640_v45 }
 0x5f7   :  { %v2819_v20 = vmul.f32 -1.442695, %v1725_v39  ;;  %v1682_v60 = vpop.f32.mrb[35].mxu0  ;;  %v1723_v38 = vpop.f32.mrb[35].mxu1 }
 0x5f8   :  { %v2820_v27 = vmul.f32 -1.442695, %v1726_v33  ;;  %v3175_v42 = vpop.eup %3174  ;;  %v2821_v40 = vmul.f32 -1.442695, %v1728_v36 }
 0x5f9   :  { %3178 = vpow2.f32 %v2819_v20 }
 0x5fa   :  { %3180 = vpow2.f32 %v2820_v27 }
 0x5fb   :  { %3182 = vpow2.f32 %v2821_v40  ;;  %v4735_v40 = vld [vmem:[#allocation9 + $0x2c] ss:$16 sps:$4 sm:$0xff]  }
 0x5fc   :  { %3184 = vtanh.f32 %v1727_v31  ;;  %v4740_v31 = vld [vmem:[#allocation9 + $0x20] ss:$16 sps:$4 sm:$0xff]  }
 0x600   :  { %v3177_v44 = vpop.eup %3176 }
 0x601   :  { %v1633_v32 = vmul.f32 %v3177_v44, %v3175_v42  ;;  %v4726_v42 = vld [vmem:[#allocation9] ss:$16 sps:$4 sm:$0xff]   ;;  %v4729_v44 = vld [vmem:[#allocation9 + $0x8] ss:$16 sps:$4 sm:$0xff]  }
 0x603   :  { %v3179_v63 = vpop.eup %3178  ;;  %v1758_v35 = vpack.c.bf16 %v1633_v32, %v1633_v32  ;;  %v4743_v32 = vld [vmem:[#allocation9 + $0x28] ss:$16 sps:$4 sm:$0xff]  }
 0x604   :  { %v3181_v30 = vpop.eup %3180  ;;  %v1733_v29 = vadd.f32 1.0, %v3179_v63 }
 0x605   :  { %v1739_v39 = vadd.f32 1.0, %v3181_v30  ;;  %1791 = vmatprep.mubr.bf16.mxu0 %v1758_v35  ;;  %1832 = vmatprep.mubr.bf16.mxu1 %v1758_v35  ;;  %v3183_v20 = vpop.eup %3182  ;;  %v4746_v35 = vld [vmem:[#allocation9 + $0x44] ss:$16 sps:$4 sm:$0xff]   ;;  %v4749_v30 = vld [vmem:[#allocation9 + $0x4c] ss:$16 sps:$4 sm:$0xff]  }
 0x606   :  { %3186 = vrcp.f32 %v1733_v29  ;;  %v3185_v33 = vpop.eup %3184  ;;  %v1746_v38 = vadd.f32 1.0, %v3183_v20  ;;  %v4752_v29 = vld [vmem:[#allocation9 + $0x40] ss:$16 sps:$4 sm:$0xff]   ;;  %v4758_v20 = vld [vmem:[#allocation9 + $0x64] ss:$16 sps:$4 sm:$0xff]  }
 0x607   :  { %3188 = vrcp.f32 %v1739_v39  ;;  %v4755_v39 = vld [vmem:[#allocation9 + $0x48] ss:$16 sps:$4 sm:$0xff]  }
 0x608   :  { %3190 = vrcp.f32 %v1746_v38  ;;  %v4776_v38 = vld [vmem:[#allocation9 + $0xa4] ss:$16 sps:$4 sm:$0xff]  }
 0x610   :  { %v3187_v41 = vpop.eup %3186 }
 0x611   :  { %v3189_v37 = vpop.eup %3188  ;;  %v1750_v60 = vmul.f32 %v3187_v41, %v3185_v33  ;;  %v4761_v33 = vld [vmem:[#allocation9 + $0x6c] ss:$16 sps:$4 sm:$0xff]   ;;  %v4764_v41 = vld [vmem:[#allocation9 + $0x60] ss:$16 sps:$4 sm:$0xff]  }
 0x612   :  { %v1749_v34 = vmul.f32 %v3189_v37, %v4613_v43  ;;  %v3191_v63 = vpop.eup %3190  ;;  %v4732_v43 = vld [vmem:[#allocation9 + $0x24] ss:$16 sps:$4 sm:$0xff]  }
 0x613   :  { %v4768_v37 = vld [vmem:[#allocation9 + $0x84] ss:$16 sps:$4 sm:$0xff]  }
 0x614   :  { %v4723_v4 = vadd.f32 %v1750_v60, %v1749_v34  ;;  %v4772_v60 = vld [vmem:[#allocation9 + $0x80] ss:$16 sps:$4 sm:$0xff]  }
 0x616   :  { %3192 = vtanh.f32 %v4723_v4 }
 0x620   :  { %v3193_v27 = vpop.eup %3192 }
 0x621   :  { %v1753_v45 = vmul.f32 %v3193_v27, %v3191_v63  ;;  %v5860_v27 = vld [vmem:[#allocation25_spill] sm:$0xff] }
 0x623   :  { %v1757_v36 = vpack.c.bf16 %v1753_v45, %v1753_v45 }
 0x625   :  { %1792 = vmatmul.mubr.bf16.vlgmr.msra.gmra.mrb[36].mxu0 %v1757_v36  ;;  %1833 = vmatmul.mubr.bf16.vlgmr.msra.gmra.mrb[36].mxu1 %v1757_v36 }
 0x626   :  { %1876 = vmatpush1.bf16.msra.mxu0 %v4726_v42  ;;  %1917 = vmatpush1.bf16.msra.mxu1 %v4729_v44 }
 0x627   :  { %1877 = vmatprep.subr.bf16.mxu0 %v4732_v43  ;;  %1918 = vmatprep.subr.bf16.mxu1 %v4735_v40 }
 0x628   :  { %1907 = vmatprep.mubr.bf16.mxu0 %v5604_v49  ;;  %1948 = vmatprep.mubr.bf16.mxu1 %v5604_v49 }
 0x62a   :  { %1878 = vmatpush1.bf16.msra.mxu0 %v4740_v31  ;;  %1919 = vmatpush1.bf16.msra.mxu1 %v4743_v32 }
 0x62b   :  { %1879 = vmatprep.subr.bf16.mxu0 %v4746_v35  ;;  %1920 = vmatprep.subr.bf16.mxu1 %v4749_v30 }
 0x62e   :  { %1880 = vmatpush1.bf16.msra.mxu0 %v4752_v29  ;;  %1921 = vmatpush1.bf16.msra.mxu1 %v4755_v39 }
 0x62f   :  { %1881 = vmatprep.subr.bf16.mxu0 %v4758_v20  ;;  %1922 = vmatprep.subr.bf16.mxu1 %v4761_v33 }
 0x632   :  { %1882 = vmatpush1.bf16.msra.mxu0 %v4764_v41  ;;  %1923 = vmatpush1.bf16.msra.mxu1 %v4365_v17  ;;  %v5822_v17 = vld [vmem:[#allocation46_spill] sm:$0xff] }
 0x633   :  { %1883 = vmatprep.subr.bf16.mxu0 %v4768_v37  ;;  %1924 = vmatprep.subr.bf16.mxu1 %v4369_v47  ;;  %v5823_v47 = vld [vmem:[#allocation47_spill] sm:$0xff] }
 0x636   :  { %1884 = vmatpush1.bf16.msra.mxu0 %v4772_v60  ;;  %1925 = vmatpush1.bf16.msra.mxu1 %v4373_v48  ;;  %v5824_v48 = vld [vmem:[#allocation48_spill] sm:$0xff] }
 0x637   :  { %1885 = vmatprep.subr.bf16.mxu0 %v4776_v38  ;;  %1926 = vmatprep.subr.bf16.mxu1 %v4377_v2  ;;  %v5825_v2 = vld [vmem:[#allocation49_spill] sm:$0xff] }
 0x63a   :  { %1886 = vmatpush1.bf16.msra.mxu0 %v4380_v3  ;;  %1927 = vmatpush1.bf16.msra.mxu1 %v4383_v5  ;;  %v5826_v3 = vld [vmem:[#allocation50_spill] sm:$0xff]  ;;  %v5827_v5 = vld [vmem:[#allocation51_spill] sm:$0xff] }
 0x63b   :  { %1887 = vmatprep.subr.bf16.mxu0 %v4386_v7  ;;  %1928 = vmatprep.subr.bf16.mxu1 %v4389_v8  ;;  %v5828_v7 = vld [vmem:[#allocation52_spill] sm:$0xff]  ;;  %v5829_v8 = vld [vmem:[#allocation53_spill] sm:$0xff] }
 0x63e   :  { %1888 = vmatpush1.bf16.msra.mxu0 %v4392_v9  ;;  %1929 = vmatpush1.bf16.msra.mxu1 %v4395_v10  ;;  %v5830_v9 = vld [vmem:[#allocation54_spill] sm:$0xff]  ;;  %v5831_v10 = vld [vmem:[#allocation55_spill] sm:$0xff] }
 0x63f   :  { %1889 = vmatprep.subr.bf16.mxu0 %v4398_v11  ;;  %1930 = vmatprep.subr.bf16.mxu1 %v4401_v12  ;;  %v5832_v11 = vld [vmem:[#allocation56_spill] sm:$0xff]  ;;  %v5833_v12 = vld [vmem:[#allocation57_spill] sm:$0xff] }
 0x642   :  { %1890 = vmatpush1.bf16.msra.mxu0 %v4404_v13  ;;  %1931 = vmatpush1.bf16.msra.mxu1 %v4407_v57  ;;  %v5834_v13 = vld [vmem:[#allocation58_spill] sm:$0xff]  ;;  %v5835_v57 = vld [vmem:[#allocation59_spill] sm:$0xff] }
 0x643   :  { %1991 = vmatprep.subr.bf16.mxu0 %v4410_v54  ;;  %2032 = vmatprep.subr.bf16.mxu1 %v4413_v1  ;;  %v5836_v54 = vld [vmem:[#allocation60_spill] sm:$0xff]  ;;  %v5837_v1 = vld [vmem:[#allocation61_spill] sm:$0xff] }
 0x645   :  { %1908 = vmatmul.mubr.bf16.vlgmr.msra.gmra.mrb[40].mxu0 %v1757_v36  ;;  %1949 = vmatmul.mubr.bf16.vlgmr.msra.gmra.mrb[40].mxu1 %v1757_v36 }
 0x646   :  { %1992 = vmatpush1.bf16.msra.mxu0 %v4416_v58  ;;  %2033 = vmatpush1.bf16.msra.mxu1 %v4419_v19  ;;  %v5838_v58 = vld [vmem:[#allocation62_spill] sm:$0xff]  ;;  %v5839_v19 = vld [vmem:[#allocation63_spill] sm:$0xff] }
 0x647   :  { %1993 = vmatprep.subr.bf16.mxu0 %v4422_v21  ;;  %2034 = vmatprep.subr.bf16.mxu1 %v4425_v22  ;;  %v5840_v21 = vld [vmem:[#allocation64_spill] sm:$0xff]  ;;  %v5841_v22 = vld [vmem:[#allocation65_spill] sm:$0xff] }
 0x64a   :  { %1994 = vmatpush1.bf16.msra.mxu0 %v4428_v23  ;;  %2035 = vmatpush1.bf16.msra.mxu1 %v4431_v24  ;;  %v5842_v23 = vld [vmem:[#allocation66_spill] sm:$0xff]  ;;  %v5843_v24 = vld [vmem:[#allocation67_spill] sm:$0xff] }
 0x64b   :  { %1995 = vmatprep.subr.bf16.mxu0 %v4434_v25  ;;  %2036 = vmatprep.subr.bf16.mxu1 %v4437_v26  ;;  %v5844_v25 = vld [vmem:[#allocation68_spill] sm:$0xff]  ;;  %v5845_v26 = vld [vmem:[#allocation69_spill] sm:$0xff] }
 0x64e   :  { %1996 = vmatpush1.bf16.msra.mxu0 %v5762_v14  ;;  %2037 = vmatpush1.bf16.msra.mxu1 %v5763_v52  ;;  %v5846_v14 = vld [vmem:[#allocation70_spill] sm:$0xff]  ;;  %v5847_v52 = vld [vmem:[#allocation71_spill] sm:$0xff] }
 0x64f   :  { %1997 = vmatprep.subr.bf16.mxu0 %v5764_v51  ;;  %2038 = vmatprep.subr.bf16.mxu1 %v5765_v61  ;;  %v5848_v51 = vld [vmem:[#allocation72_spill] sm:$0xff]  ;;  %v5849_v61 = vld [vmem:[#allocation73_spill] sm:$0xff] }
 0x652   :  { %1998 = vmatpush1.bf16.msra.mxu0 %v5766_v6  ;;  %2039 = vmatpush1.bf16.msra.mxu1 %v5767_v18  ;;  %v5850_v6 = vld [vmem:[#allocation74_spill] sm:$0xff]  ;;  %v5851_v18 = vld [vmem:[#allocation29_spill] sm:$0xff] }
 0x653   :  { %1999 = vmatprep.subr.bf16.mxu0 %v5768_v53  ;;  %2040 = vmatprep.subr.bf16.mxu1 %v5769_v62  ;;  %v5852_v53 = vld [vmem:[#allocation75_spill] sm:$0xff]  ;;  %v5853_v62 = vld [vmem:[#allocation76_spill] sm:$0xff] }
 0x656   :  { %2000 = vmatpush1.bf16.msra.mxu0 %v5770_v50  ;;  %2041 = vmatpush1.bf16.msra.mxu1 %v5771_v56  ;;  %v5854_v50 = vld [vmem:[#allocation77_spill] sm:$0xff]  ;;  %v5855_v56 = vld [vmem:[#allocation78_spill] sm:$0xff] }
 0x657   :  { %2001 = vmatprep.subr.bf16.mxu0 %v5772_v0  ;;  %2042 = vmatprep.subr.bf16.mxu1 %v5773_v15  ;;  %v5856_v0 = vld [vmem:[#allocation79_spill] sm:$0xff]  ;;  %v5857_v15 = vld [vmem:[#allocation80_spill] sm:$0xff] }
 0x65a   :  { %2002 = vmatpush1.bf16.msra.mxu0 %v5774_v16  ;;  %2043 = vmatpush1.bf16.msra.mxu1 %v5775_v55  ;;  %v5858_v16 = vld [vmem:[#allocation81_spill] sm:$0xff]  ;;  %v5859_v55 = vld [vmem:[#allocation82_spill] sm:$0xff] }
 0x65b   :  { %2003 = vmatprep.subr.bf16.mxu0 %v5776_v46  ;;  %2044 = vmatprep.subr.bf16.mxu1 %v5777_v59  ;;  %v4854_v46 = vld [vmem:[#allocation9 + $0x4] ss:$16 sps:$4 sm:$0xff]   ;;  %v4857_v59 = vld [vmem:[#allocation9 + $0xc] ss:$16 sps:$4 sm:$0xff]  }
 0x65e   :  { %2004 = vmatpush1.bf16.msra.mxu0 %v5822_v17  ;;  %2045 = vmatpush1.bf16.msra.mxu1 %v5823_v47  ;;  %v5861_v47 = vld [vmem:[#allocation26_spill] sm:$0xff] }
 0x65f   :  { %2005 = vmatprep.subr.bf16.mxu0 %v5824_v48  ;;  %2046 = vmatprep.subr.bf16.mxu1 %v5825_v2 }
 0x662   :  { %2006 = vmatpush1.bf16.msra.mxu0 %v5826_v3  ;;  %2047 = vmatpush1.bf16.msra.mxu1 %v5827_v5 }
 0x663   :  { %2007 = vmatprep.subr.bf16.mxu0 %v5828_v7  ;;  %2048 = vmatprep.subr.bf16.mxu1 %v5829_v8 }
 0x666   :  { %2008 = vmatpush1.bf16.msra.mxu0 %v5830_v9  ;;  %2049 = vmatpush1.bf16.msra.mxu1 %v5831_v10  ;;  %v5862_v10 = vld [vmem:[#allocation27_spill] sm:$0xff] }
 0x667   :  { %2009 = vmatprep.subr.bf16.mxu0 %v5832_v11  ;;  %2050 = vmatprep.subr.bf16.mxu1 %v5833_v12 }
 0x66a   :  { %2010 = vmatpush1.bf16.msra.mxu0 %v5834_v13  ;;  %2051 = vmatpush1.bf16.msra.mxu1 %v5835_v57  ;;  %v5863_v13 = vld [vmem:[#allocation28_spill] sm:$0xff] }
 0x66b   :  { %2011 = vmatprep.subr.bf16.mxu0 %v5836_v54  ;;  %2052 = vmatprep.subr.bf16.mxu1 %v5837_v1 }
 0x66e   :  { %2012 = vmatpush1.bf16.msra.mxu0 %v5838_v58  ;;  %2053 = vmatpush1.bf16.msra.mxu1 %v5839_v19 }
 0x66f   :  { %2013 = vmatprep.subr.bf16.mxu0 %v5840_v21  ;;  %2054 = vmatprep.subr.bf16.mxu1 %v5841_v22 }
 0x672   :  { %2014 = vmatpush1.bf16.msra.mxu0 %v5842_v23  ;;  %2055 = vmatpush1.bf16.msra.mxu1 %v5843_v24 }
 0x673   :  { %2015 = vmatprep.subr.bf16.mxu0 %v5844_v25  ;;  %2056 = vmatprep.subr.bf16.mxu1 %v5845_v26 }
 0x676   :  { %2016 = vmatpush1.bf16.msra.mxu0 %v5846_v14  ;;  %2057 = vmatpush1.bf16.msra.mxu1 %v5847_v52  ;;  %v1869_v52 = vld [vmem:[#allocation6 + $0xa0] sm:$0xff] }
 0x677   :  { %2017 = vmatprep.subr.bf16.mxu0 %v5848_v51  ;;  %2058 = vmatprep.subr.bf16.mxu1 %v5849_v61  ;;  %v1870_v51 = vld [vmem:[#allocation6 + $0xa8] sm:$0xff] }
 0x67a   :  { %2018 = vmatpush1.bf16.msra.mxu0 %v5850_v6  ;;  %2059 = vmatpush1.bf16.msra.mxu1 %v5851_v18 }
 0x67b   :  { %2019 = vmatprep.subr.bf16.mxu0 %v5852_v53  ;;  %2060 = vmatprep.subr.bf16.mxu1 %v5853_v62 }
 0x67e   :  { %2020 = vmatpush1.bf16.msra.mxu0 %v5854_v50  ;;  %2061 = vmatpush1.bf16.msra.mxu1 %v5855_v56 }
 0x67f   :  { %2021 = vmatprep.subr.bf16.mxu0 %v5856_v0  ;;  %2062 = vmatprep.subr.bf16.mxu1 %v5857_v15 }
 0x682   :  { %2022 = vmatpush1.bf16.msra.mxu0 %v5858_v16  ;;  %2063 = vmatpush1.bf16.msra.mxu1 %v5859_v55 }
 0x683   :  { %2107 = vmatprep.subr.bf16.mxu0 %v4854_v46  ;;  %2148 = vmatprep.subr.bf16.mxu1 %v4857_v59 }
 0x6f8   :  { %v1793_v34 = vpop.f32.mrb[36].mxu0  ;;  %v1834_v63 = vpop.f32.mrb[36].mxu1 }
 0x6f9   :  { %v1794_v45 = vadd.f32 %v1793_v34, %v5860_v27  ;;  %v1795_v36 = vpop.f32.mrb[37].mxu0  ;;  %v1836_v17 = vpop.f32.mrb[37].mxu1  ;;  %v1835_v57 = vadd.f32 %v1834_v63, %v5863_v13 }
 0x6fa   :  { %v1796_v48 = vadd.f32 %v1795_v36, %v5861_v47  ;;  %v1797_v2 = vpop.f32.mrb[38].mxu0  ;;  %v1838_v3 = vpop.f32.mrb[38].mxu1  ;;  %v1837_v11 = vadd.f32 %v1836_v17, %v5862_v10  ;;  %v1871_v36 = vld [vmem:[#allocation6 + $0xb0] sm:$0xff] }
 0x6fb   :  { %v2822_v5 = vmul.f32 -1.442695, %v1794_v45  ;;  %v1798_v7 = vpop.f32.mrb[39].mxu0  ;;  %v1839_v8 = vpop.f32.mrb[39].mxu1 }
 0x6fc   :  { %v2823_v9 = vmul.f32 -1.442695, %v1796_v48  ;;  %v2824_v12 = vmul.f32 -1.442695, %v1837_v11 }
 0x6fd   :  { %3194 = vpow2.f32 %v2822_v5 }
 0x6fe   :  { %3196 = vpow2.f32 %v2823_v9 }
 0x6ff   :  { %3198 = vpow2.f32 %v2824_v12 }
 0x700   :  { %3200 = vtanh.f32 %v1835_v57 }
 0x707   :  { %v3195_v54 = vpop.eup %3194 }
 0x708   :  { %v3197_v1 = vpop.eup %3196  ;;  %v1845_v58 = vadd.f32 1.0, %v3195_v54 }
 0x709   :  { %v1851_v19 = vadd.f32 1.0, %v3197_v1  ;;  %v3199_v21 = vpop.eup %3198 }
 0x70a   :  { %3202 = vrcp.f32 %v1845_v58  ;;  %v3201_v22 = vpop.eup %3200  ;;  %v1858_v26 = vadd.f32 1.0, %v3199_v21 }
 0x70b   :  { %3204 = vrcp.f32 %v1851_v19 }
 0x70c   :  { %3206 = vrcp.f32 %v1858_v26 }
 0x714   :  { %v3203_v23 = vpop.eup %3202 }
 0x715   :  { %v3205_v24 = vpop.eup %3204  ;;  %v1862_v25 = vmul.f32 %v3203_v23, %v3201_v22 }
 0x716   :  { %v1861_v14 = vmul.f32 %v3205_v24, %v4719_v28  ;;  %v1872_v28 = vld [vmem:[#allocation6 + $0xb8] sm:$0xff]  ;;  %v3207_v17 = vpop.eup %3206 }
 0x718   :  { %v1909_v61 = vpop.f32.mrb[40].mxu0  ;;  %v1950_v6 = vpop.f32.mrb[40].mxu1  ;;  %v4865_v18 = vadd.f32 %v1862_v25, %v1861_v14 }
 0x719   :  { %v1957_v53 = vadd.f32 %v1909_v61, %v1869_v52  ;;  %v1911_v62 = vpop.f32.mrb[41].mxu0  ;;  %v1952_v50 = vpop.f32.mrb[41].mxu1  ;;  %v1959_v3 = vadd.f32 %v1950_v6, %v1871_v36  ;;  %v4891_v52 = vld [vmem:[#allocation9 + $0x8c] ss:$16 sps:$4 sm:$0xff]   ;;  %v4902_v6 = vld [vmem:[#allocation9 + $0xa0] ss:$16 sps:$4 sm:$0xff]  }
 0x71a   :  { %v1958_v56 = vadd.f32 %v1911_v62, %v1870_v51  ;;  %v1913_v0 = vpop.f32.mrb[42].mxu0  ;;  %v1954_v15 = vpop.f32.mrb[42].mxu1  ;;  %3208 = vtanh.f32 %v4865_v18  ;;  %v1960_v45 = vadd.f32 %v1952_v50, %v1872_v28  ;;  %v4895_v51 = vld [vmem:[#allocation9 + $0x88] ss:$16 sps:$4 sm:$0xff]   ;;  %v4899_v61 = vld [vmem:[#allocation9 + $0xac] ss:$16 sps:$4 sm:$0xff]  }
 0x71b   :  { %v2825_v16 = vmul.f32 -1.442695, %v1957_v53  ;;  %v1914_v55 = vpop.f32.mrb[43].mxu0  ;;  %v1955_v34 = vpop.f32.mrb[43].mxu1  ;;  %v4905_v53 = vld [vmem:[#allocation9 + $0xa8] ss:$16 sps:$4 sm:$0xff]  }
 0x71c   :  { %v2826_v63 = vmul.f32 -1.442695, %v1958_v56  ;;  %v2827_v2 = vmul.f32 -1.442695, %v1960_v45  ;;  %v4908_v62 = vld [vmem:[#allocation9 + $0xc4] ss:$16 sps:$4 sm:$0xff]  }
 0x71d   :  { %3210 = vpow2.f32 %v2825_v16  ;;  %v4911_v50 = vld [vmem:[#allocation9 + $0xcc] ss:$16 sps:$4 sm:$0xff]   ;;  %v4914_v56 = vld [vmem:[#allocation9 + $0xc0] ss:$16 sps:$4 sm:$0xff]   ;;  %v4917_v0 = vld [vmem:[#allocation9 + $0xc8] ss:$16 sps:$4 sm:$0xff]  }
 0x71e   :  { %3212 = vpow2.f32 %v2826_v63  ;;  %v4920_v15 = vld [vmem:[#allocation9 + $0xe4] ss:$16 sps:$4 sm:$0xff]   ;;  %v4923_v16 = vld [vmem:[#allocation9 + $0xec] ss:$16 sps:$4 sm:$0xff]   ;;  %v4926_v55 = vld [vmem:[#allocation9 + $0xe0] ss:$16 sps:$4 sm:$0xff]  }
 0x71f   :  { %3214 = vpow2.f32 %v2827_v2  ;;  %v4929_v34 = vld [vmem:[#allocation9 + $0xe8] ss:$16 sps:$4 sm:$0xff]   ;;  %v4932_v63 = vld [vmem:[#allocation11 + $0x4] ss:$16 sps:$4 sm:$0xff]   ;;  %v4935_v28 = vld [vmem:[#allocation11 + $0xc] ss:$16 sps:$4 sm:$0xff]  }
 0x720   :  { %3216 = vtanh.f32 %v1959_v3  ;;  %v4938_v45 = vld [vmem:[#allocation11] ss:$16 sps:$4 sm:$0xff]   ;;  %v4941_v36 = vld [vmem:[#allocation11 + $0x8] ss:$16 sps:$4 sm:$0xff]  }
 0x721   :  { %v4950_v2 = vld [vmem:[#allocation11 + $0x20] ss:$16 sps:$4 sm:$0xff]   ;;  %v4953_v3 = vld [vmem:[#allocation11 + $0x28] ss:$16 sps:$4 sm:$0xff]  }
 0x724   :  { %v3209_v48 = vpop.eup %3208 }
 0x725   :  { %v1865_v5 = vmul.f32 %v3209_v48, %v3207_v17  ;;  %v4944_v17 = vld [vmem:[#allocation11 + $0x24] ss:$16 sps:$4 sm:$0xff]   ;;  %v4947_v48 = vld [vmem:[#allocation11 + $0x2c] ss:$16 sps:$4 sm:$0xff]  }
 0x727   :  { %v3211_v7 = vpop.eup %3210  ;;  %v1990_v8 = vpack.c.bf16 %v1865_v5, %v1865_v5  ;;  %v4956_v5 = vld [vmem:[#allocation11 + $0x44] ss:$16 sps:$4 sm:$0xff]  }
 0x728   :  { %v3213_v9 = vpop.eup %3212  ;;  %v1965_v11 = vadd.f32 1.0, %v3211_v7  ;;  %v4959_v7 = vld [vmem:[#allocation11 + $0x4c] ss:$16 sps:$4 sm:$0xff]  }
 0x729   :  { %v1971_v12 = vadd.f32 1.0, %v3213_v9  ;;  %2023 = vmatprep.mubr.bf16.mxu0 %v1990_v8  ;;  %2064 = vmatprep.mubr.bf16.mxu1 %v1990_v8  ;;  %v3215_v57 = vpop.eup %3214  ;;  %v4962_v8 = vld [vmem:[#allocation11 + $0x40] ss:$16 sps:$4 sm:$0xff]   ;;  %v4965_v9 = vld [vmem:[#allocation11 + $0x48] ss:$16 sps:$4 sm:$0xff]  }
 0x72a   :  { %3218 = vrcp.f32 %v1965_v11  ;;  %v3217_v54 = vpop.eup %3216  ;;  %v1978_v21 = vadd.f32 1.0, %v3215_v57  ;;  %5864 = vst [vmem:[#allocation32_spill] sm:$0xff] %v4962_v8  ;;  %5865 = vst [vmem:[#allocation33_spill] sm:$0xff] %v4965_v9  ;;  %v4968_v11 = vld [vmem:[#allocation11 + $0x64] ss:$16 sps:$4 sm:$0xff]  }
 0x72b   :  { %3220 = vrcp.f32 %v1971_v12  ;;  %5866 = vst [vmem:[#allocation34_spill] sm:$0xff] %v4968_v11  ;;  %v4971_v12 = vld [vmem:[#allocation11 + $0x6c] ss:$16 sps:$4 sm:$0xff]   ;;  %v4974_v57 = vld [vmem:[#allocation11 + $0x60] ss:$16 sps:$4 sm:$0xff]  }
 0x72c   :  { %3222 = vrcp.f32 %v1978_v21  ;;  %5867 = vst [vmem:[#allocation35_spill] sm:$0xff] %v4971_v12  ;;  %5868 = vst [vmem:[#allocation23_spill] sm:$0xff] %v4974_v57  ;;  %v4989_v21 = vld [vmem:[#allocation11 + $0x88] ss:$16 sps:$4 sm:$0xff]  }
 0x72d   :  { %5873 = vst [vmem:[#allocation39_spill] sm:$0xff] %v4989_v21 }
 0x734   :  { %v3219_v1 = vpop.eup %3218 }
 0x735   :  { %v3221_v58 = vpop.eup %3220  ;;  %v1982_v19 = vmul.f32 %v3219_v1, %v3217_v54  ;;  %v4977_v54 = vld [vmem:[#allocation11 + $0x68] ss:$16 sps:$4 sm:$0xff]   ;;  %v4980_v1 = vld [vmem:[#allocation11 + $0x84] ss:$16 sps:$4 sm:$0xff]  }
 0x736   :  { %v1981_v22 = vmul.f32 %v3221_v58, %v4723_v4  ;;  %v3223_v24 = vpop.eup %3222  ;;  %v4887_v4 = vld [vmem:[#allocation9 + $0x68] ss:$16 sps:$4 sm:$0xff]   ;;  %5869 = vst [vmem:[#allocation24_spill] sm:$0xff] %v4977_v54  ;;  %5870 = vst [vmem:[#allocation36_spill] sm:$0xff] %v4980_v1  ;;  %v4983_v58 = vld [vmem:[#allocation11 + $0x8c] ss:$16 sps:$4 sm:$0xff]  }
 0x737   :  { %5871 = vst [vmem:[#allocation37_spill] sm:$0xff] %v4983_v58 }
 0x738   :  { %v4869_v23 = vadd.f32 %v1982_v19, %v1981_v22  ;;  %v4986_v19 = vld [vmem:[#allocation11 + $0x80] ss:$16 sps:$4 sm:$0xff]   ;;  %v4992_v22 = vld [vmem:[#allocation11 + $0xa4] ss:$16 sps:$4 sm:$0xff]  }
 0x739   :  { %5872 = vst [vmem:[#allocation38_spill] sm:$0xff] %v4986_v19  ;;  %5874 = vst [vmem:[#allocation40_spill] sm:$0xff] %v4992_v22 }
 0x73a   :  { %3224 = vtanh.f32 %v4869_v23 }
 0x744   :  { %v3225_v25 = vpop.eup %3224 }
 0x745   :  { %v1985_v26 = vmul.f32 %v3225_v25, %v3223_v24  ;;  %v4995_v24 = vld [vmem:[#allocation11 + $0xac] ss:$16 sps:$4 sm:$0xff]   ;;  %v4998_v25 = vld [vmem:[#allocation11 + $0xa0] ss:$16 sps:$4 sm:$0xff]  }
 0x746   :  { %5875 = vst [vmem:[#allocation41_spill] sm:$0xff] %v4995_v24  ;;  %5876 = vst [vmem:[#allocation42_spill] sm:$0xff] %v4998_v25 }
 0x747   :  { %v1989_v14 = vpack.c.bf16 %v1985_v26, %v1985_v26  ;;  %v5001_v26 = vld [vmem:[#allocation11 + $0xa8] ss:$16 sps:$4 sm:$0xff]  }
 0x748   :  { %5877 = vst [vmem:[#allocation43_spill] sm:$0xff] %v5001_v26 }
 0x749   :  { %2024 = vmatmul.mubr.bf16.vlgmr.msra.gmra.mrb[44].mxu0 %v1989_v14  ;;  %2065 = vmatmul.mubr.bf16.vlgmr.msra.gmra.mrb[44].mxu1 %v1989_v14 }
 0x74a   :  { %2108 = vmatpush1.bf16.msra.mxu0 %v4726_v42  ;;  %2149 = vmatpush1.bf16.msra.mxu1 %v4729_v44 }
 0x74b   :  { %2109 = vmatprep.subr.bf16.mxu0 %v4732_v43  ;;  %2150 = vmatprep.subr.bf16.mxu1 %v4735_v40 }
 0x74c   :  { %2139 = vmatprep.mubr.bf16.mxu0 %v5604_v49  ;;  %2180 = vmatprep.mubr.bf16.mxu1 %v5604_v49 }
 0x74e   :  { %2110 = vmatpush1.bf16.msra.mxu0 %v4740_v31  ;;  %2151 = vmatpush1.bf16.msra.mxu1 %v4743_v32 }
 0x74f   :  { %2111 = vmatprep.subr.bf16.mxu0 %v4746_v35  ;;  %2152 = vmatprep.subr.bf16.mxu1 %v4749_v30 }
 0x752   :  { %2112 = vmatpush1.bf16.msra.mxu0 %v4752_v29  ;;  %2153 = vmatpush1.bf16.msra.mxu1 %v4755_v39 }
 0x753   :  { %2113 = vmatprep.subr.bf16.mxu0 %v4758_v20  ;;  %2154 = vmatprep.subr.bf16.mxu1 %v4761_v33 }
 0x756   :  { %2114 = vmatpush1.bf16.msra.mxu0 %v4764_v41  ;;  %2155 = vmatpush1.bf16.msra.mxu1 %v4887_v4 }
 0x757   :  { %2115 = vmatprep.subr.bf16.mxu0 %v4768_v37  ;;  %2156 = vmatprep.subr.bf16.mxu1 %v4891_v52 }
 0x75a   :  { %2116 = vmatpush1.bf16.msra.mxu0 %v4772_v60  ;;  %2157 = vmatpush1.bf16.msra.mxu1 %v4895_v51 }
 0x75b   :  { %2117 = vmatprep.subr.bf16.mxu0 %v4776_v38  ;;  %2158 = vmatprep.subr.bf16.mxu1 %v4899_v61 }
 0x75e   :  { %2118 = vmatpush1.bf16.msra.mxu0 %v4902_v6  ;;  %2159 = vmatpush1.bf16.msra.mxu1 %v4905_v53 }
 0x75f   :  { %2119 = vmatprep.subr.bf16.mxu0 %v4908_v62  ;;  %2160 = vmatprep.subr.bf16.mxu1 %v4911_v50 }
 0x762   :  { %2120 = vmatpush1.bf16.msra.mxu0 %v4914_v56  ;;  %2161 = vmatpush1.bf16.msra.mxu1 %v4917_v0 }
 0x763   :  { %2121 = vmatprep.subr.bf16.mxu0 %v4920_v15  ;;  %2162 = vmatprep.subr.bf16.mxu1 %v4923_v16 }
 0x766   :  { %2122 = vmatpush1.bf16.msra.mxu0 %v4926_v55  ;;  %2163 = vmatpush1.bf16.msra.mxu1 %v4929_v34 }
 0x767   :  { %2223 = vmatprep.subr.bf16.mxu0 %v4932_v63  ;;  %2264 = vmatprep.subr.bf16.mxu1 %v4935_v28 }
 0x769   :  { %2140 = vmatmul.mubr.bf16.vlgmr.msra.gmra.mrb[48].mxu0 %v1989_v14  ;;  %2181 = vmatmul.mubr.bf16.vlgmr.msra.gmra.mrb[48].mxu1 %v1989_v14  ;;  %v5004_v14 = vld [vmem:[#allocation11 + $0xc4] ss:$16 sps:$4 sm:$0xff]  }
 0x76a   :  { %2224 = vmatpush1.bf16.msra.mxu0 %v4938_v45  ;;  %2265 = vmatpush1.bf16.msra.mxu1 %v4941_v36  ;;  %5878 = vst [vmem:[#allocation44_spill] sm:$0xff] %v5004_v14 }
 0x76b   :  { %2225 = vmatprep.subr.bf16.mxu0 %v4944_v17  ;;  %2266 = vmatprep.subr.bf16.mxu1 %v4947_v48 }
 0x76e   :  { %2226 = vmatpush1.bf16.msra.mxu0 %v4950_v2  ;;  %2267 = vmatpush1.bf16.msra.mxu1 %v4953_v3 }
 0x76f   :  { %2227 = vmatprep.subr.bf16.mxu0 %v4956_v5  ;;  %2268 = vmatprep.subr.bf16.mxu1 %v4959_v7 }
 0x772   :  { %2228 = vmatpush1.bf16.msra.mxu0 %v4962_v8  ;;  %2269 = vmatpush1.bf16.msra.mxu1 %v4965_v9 }
 0x773   :  { %2229 = vmatprep.subr.bf16.mxu0 %v4968_v11  ;;  %2270 = vmatprep.subr.bf16.mxu1 %v4971_v12 }
 0x776   :  { %2230 = vmatpush1.bf16.msra.mxu0 %v4974_v57  ;;  %2271 = vmatpush1.bf16.msra.mxu1 %v4977_v54 }
 0x777   :  { %2231 = vmatprep.subr.bf16.mxu0 %v4980_v1  ;;  %2272 = vmatprep.subr.bf16.mxu1 %v4983_v58 }
 0x77a   :  { %2232 = vmatpush1.bf16.msra.mxu0 %v4986_v19  ;;  %2273 = vmatpush1.bf16.msra.mxu1 %v4989_v21  ;;  %v5007_v21 = vld [vmem:[#allocation11 + $0xcc] ss:$16 sps:$4 sm:$0xff]  }
 0x77b   :  { %2233 = vmatprep.subr.bf16.mxu0 %v4992_v22  ;;  %2274 = vmatprep.subr.bf16.mxu1 %v4995_v24  ;;  %5879 = vst [vmem:[#allocation45_spill] sm:$0xff] %v5007_v21  ;;  %v5010_v22 = vld [vmem:[#allocation11 + $0xc0] ss:$16 sps:$4 sm:$0xff]   ;;  %v5013_v24 = vld [vmem:[#allocation11 + $0xc8] ss:$16 sps:$4 sm:$0xff]  }
 0x77c   :  { %5880 = vst [vmem:[#allocation30_spill] sm:$0xff] %v5010_v22  ;;  %5881 = vst [vmem:[#allocation31_spill] sm:$0xff] %v5013_v24 }
 0x77e   :  { %2234 = vmatpush1.bf16.msra.mxu0 %v4998_v25  ;;  %2275 = vmatpush1.bf16.msra.mxu1 %v5001_v26  ;;  %v5016_v25 = vld [vmem:[#allocation11 + $0xe4] ss:$16 sps:$4 sm:$0xff]   ;;  %v5019_v26 = vld [vmem:[#allocation11 + $0xec] ss:$16 sps:$4 sm:$0xff]  }
 0x77f   :  { %2235 = vmatprep.subr.bf16.mxu0 %v5004_v14  ;;  %2276 = vmatprep.subr.bf16.mxu1 %v5007_v21  ;;  %5882 = vst [vmem:[#allocation46_spill] sm:$0xff] %v5016_v25  ;;  %5883 = vst [vmem:[#allocation47_spill] sm:$0xff] %v5019_v26  ;;  %v5022_v14 = vld [vmem:[#allocation11 + $0xe0] ss:$16 sps:$4 sm:$0xff]   ;;  %v5025_v21 = vld [vmem:[#allocation11 + $0xe8] ss:$16 sps:$4 sm:$0xff]  }
 0x780   :  { %5884 = vst [vmem:[#allocation48_spill] sm:$0xff] %v5022_v14  ;;  %5885 = vst [vmem:[#allocation49_spill] sm:$0xff] %v5025_v21 }
 0x782   :  { %2236 = vmatpush1.bf16.msra.mxu0 %v5010_v22  ;;  %2277 = vmatpush1.bf16.msra.mxu1 %v5013_v24  ;;  %v5028_v22 = vld [vmem:[#allocation11 + $0x104] ss:$16 sps:$4 sm:$0xff]   ;;  %v5031_v24 = vld [vmem:[#allocation11 + $0x10c] ss:$16 sps:$4 sm:$0xff]  }
 0x783   :  { %2237 = vmatprep.subr.bf16.mxu0 %v5016_v25  ;;  %2278 = vmatprep.subr.bf16.mxu1 %v5019_v26  ;;  %5886 = vst [vmem:[#allocation50_spill] sm:$0xff] %v5028_v22  ;;  %5887 = vst [vmem:[#allocation51_spill] sm:$0xff] %v5031_v24  ;;  %v5034_v25 = vld [vmem:[#allocation11 + $0x100] ss:$16 sps:$4 sm:$0xff]   ;;  %v5037_v26 = vld [vmem:[#allocation11 + $0x108] ss:$16 sps:$4 sm:$0xff]  }
 0x784   :  { %5888 = vst [vmem:[#allocation52_spill] sm:$0xff] %v5034_v25  ;;  %5889 = vst [vmem:[#allocation53_spill] sm:$0xff] %v5037_v26 }
 0x786   :  { %2238 = vmatpush1.bf16.msra.mxu0 %v5022_v14  ;;  %2279 = vmatpush1.bf16.msra.mxu1 %v5025_v21  ;;  %v5040_v14 = vld [vmem:[#allocation11 + $0x124] ss:$16 sps:$4 sm:$0xff]   ;;  %v5043_v21 = vld [vmem:[#allocation11 + $0x12c] ss:$16 sps:$4 sm:$0xff]  }
 0x787   :  { %2239 = vmatprep.subr.bf16.mxu0 %v5028_v22  ;;  %2280 = vmatprep.subr.bf16.mxu1 %v5031_v24  ;;  %5890 = vst [vmem:[#allocation54_spill] sm:$0xff] %v5040_v14  ;;  %5891 = vst [vmem:[#allocation55_spill] sm:$0xff] %v5043_v21  ;;  %v5046_v22 = vld [vmem:[#allocation11 + $0x120] ss:$16 sps:$4 sm:$0xff]   ;;  %v5049_v24 = vld [vmem:[#allocation11 + $0x128] ss:$16 sps:$4 sm:$0xff]  }
 0x788   :  { %5892 = vst [vmem:[#allocation56_spill] sm:$0xff] %v5046_v22  ;;  %5893 = vst [vmem:[#allocation57_spill] sm:$0xff] %v5049_v24 }
 0x78a   :  { %2240 = vmatpush1.bf16.msra.mxu0 %v5034_v25  ;;  %2281 = vmatpush1.bf16.msra.mxu1 %v5037_v26  ;;  %v5052_v25 = vld [vmem:[#allocation11 + $0x144] ss:$16 sps:$4 sm:$0xff]   ;;  %v5055_v26 = vld [vmem:[#allocation11 + $0x14c] ss:$16 sps:$4 sm:$0xff]  }
 0x78b   :  { %2241 = vmatprep.subr.bf16.mxu0 %v5040_v14  ;;  %2282 = vmatprep.subr.bf16.mxu1 %v5043_v21  ;;  %5894 = vst [vmem:[#allocation58_spill] sm:$0xff] %v5052_v25  ;;  %5895 = vst [vmem:[#allocation59_spill] sm:$0xff] %v5055_v26  ;;  %v5058_v14 = vld [vmem:[#allocation11 + $0x140] ss:$16 sps:$4 sm:$0xff]   ;;  %v5061_v21 = vld [vmem:[#allocation11 + $0x148] ss:$16 sps:$4 sm:$0xff]  }
 0x78c   :  { %5896 = vst [vmem:[#allocation60_spill] sm:$0xff] %v5058_v14  ;;  %5897 = vst [vmem:[#allocation61_spill] sm:$0xff] %v5061_v21 }
 0x78e   :  { %2242 = vmatpush1.bf16.msra.mxu0 %v5046_v22  ;;  %2283 = vmatpush1.bf16.msra.mxu1 %v5049_v24  ;;  %v5064_v22 = vld [vmem:[#allocation11 + $0x164] ss:$16 sps:$4 sm:$0xff]   ;;  %v5067_v24 = vld [vmem:[#allocation11 + $0x16c] ss:$16 sps:$4 sm:$0xff]  }
 0x78f   :  { %2243 = vmatprep.subr.bf16.mxu0 %v5052_v25  ;;  %2284 = vmatprep.subr.bf16.mxu1 %v5055_v26  ;;  %5898 = vst [vmem:[#allocation62_spill] sm:$0xff] %v5064_v22  ;;  %5899 = vst [vmem:[#allocation63_spill] sm:$0xff] %v5067_v24  ;;  %v5070_v25 = vld [vmem:[#allocation11 + $0x160] ss:$16 sps:$4 sm:$0xff]   ;;  %v5073_v26 = vld [vmem:[#allocation11 + $0x168] ss:$16 sps:$4 sm:$0xff]  }
 0x790   :  { %5900 = vst [vmem:[#allocation64_spill] sm:$0xff] %v5070_v25  ;;  %5901 = vst [vmem:[#allocation65_spill] sm:$0xff] %v5073_v26 }
 0x792   :  { %2244 = vmatpush1.bf16.msra.mxu0 %v5058_v14  ;;  %2285 = vmatpush1.bf16.msra.mxu1 %v5061_v21  ;;  %v5076_v14 = vld [vmem:[#allocation11 + $0x184] ss:$16 sps:$4 sm:$0xff]   ;;  %v5079_v21 = vld [vmem:[#allocation11 + $0x18c] ss:$16 sps:$4 sm:$0xff]  }
 0x793   :  { %2245 = vmatprep.subr.bf16.mxu0 %v5064_v22  ;;  %2286 = vmatprep.subr.bf16.mxu1 %v5067_v24  ;;  %5902 = vst [vmem:[#allocation66_spill] sm:$0xff] %v5076_v14  ;;  %5903 = vst [vmem:[#allocation67_spill] sm:$0xff] %v5079_v21  ;;  %v5082_v22 = vld [vmem:[#allocation11 + $0x180] ss:$16 sps:$4 sm:$0xff]   ;;  %v5085_v24 = vld [vmem:[#allocation11 + $0x188] ss:$16 sps:$4 sm:$0xff]  }
 0x794   :  { %5904 = vst [vmem:[#allocation68_spill] sm:$0xff] %v5082_v22  ;;  %5905 = vst [vmem:[#allocation69_spill] sm:$0xff] %v5085_v24 }
 0x796   :  { %2246 = vmatpush1.bf16.msra.mxu0 %v5070_v25  ;;  %2287 = vmatpush1.bf16.msra.mxu1 %v5073_v26  ;;  %v5088_v25 = vld [vmem:[#allocation11 + $0x1a4] ss:$16 sps:$4 sm:$0xff]   ;;  %v5091_v26 = vld [vmem:[#allocation11 + $0x1ac] ss:$16 sps:$4 sm:$0xff]  }
 0x797   :  { %2247 = vmatprep.subr.bf16.mxu0 %v5076_v14  ;;  %2288 = vmatprep.subr.bf16.mxu1 %v5079_v21  ;;  %5906 = vst [vmem:[#allocation70_spill] sm:$0xff] %v5088_v25  ;;  %5907 = vst [vmem:[#allocation71_spill] sm:$0xff] %v5091_v26  ;;  %v5094_v14 = vld [vmem:[#allocation11 + $0x1a0] ss:$16 sps:$4 sm:$0xff]   ;;  %v5097_v21 = vld [vmem:[#allocation11 + $0x1a8] ss:$16 sps:$4 sm:$0xff]  }
 0x798   :  { %5908 = vst [vmem:[#allocation72_spill] sm:$0xff] %v5094_v14  ;;  %5909 = vst [vmem:[#allocation73_spill] sm:$0xff] %v5097_v21 }
 0x79a   :  { %2248 = vmatpush1.bf16.msra.mxu0 %v5082_v22  ;;  %2289 = vmatpush1.bf16.msra.mxu1 %v5085_v24  ;;  %v5100_v22 = vld [vmem:[#allocation11 + $0x1c4] ss:$16 sps:$4 sm:$0xff]   ;;  %v5103_v24 = vld [vmem:[#allocation11 + $0x1cc] ss:$16 sps:$4 sm:$0xff]  }
 0x79b   :  { %2249 = vmatprep.subr.bf16.mxu0 %v5088_v25  ;;  %2290 = vmatprep.subr.bf16.mxu1 %v5091_v26  ;;  %5910 = vst [vmem:[#allocation74_spill] sm:$0xff] %v5100_v22  ;;  %5911 = vst [vmem:[#allocation29_spill] sm:$0xff] %v5103_v24  ;;  %v5106_v25 = vld [vmem:[#allocation11 + $0x1c0] ss:$16 sps:$4 sm:$0xff]   ;;  %v5109_v26 = vld [vmem:[#allocation11 + $0x1c8] ss:$16 sps:$4 sm:$0xff]  }
 0x79c   :  { %5912 = vst [vmem:[#allocation75_spill] sm:$0xff] %v5106_v25  ;;  %5913 = vst [vmem:[#allocation76_spill] sm:$0xff] %v5109_v26 }
 0x79e   :  { %2250 = vmatpush1.bf16.msra.mxu0 %v5094_v14  ;;  %2291 = vmatpush1.bf16.msra.mxu1 %v5097_v21  ;;  %v5112_v14 = vld [vmem:[#allocation11 + $0x1e4] ss:$16 sps:$4 sm:$0xff]   ;;  %v5115_v21 = vld [vmem:[#allocation11 + $0x1ec] ss:$16 sps:$4 sm:$0xff]  }
 0x79f   :  { %2251 = vmatprep.subr.bf16.mxu0 %v5100_v22  ;;  %2292 = vmatprep.subr.bf16.mxu1 %v5103_v24  ;;  %5914 = vst [vmem:[#allocation77_spill] sm:$0xff] %v5112_v14  ;;  %5915 = vst [vmem:[#allocation78_spill] sm:$0xff] %v5115_v21  ;;  %v5118_v22 = vld [vmem:[#allocation11 + $0x1e0] ss:$16 sps:$4 sm:$0xff]   ;;  %v5121_v24 = vld [vmem:[#allocation11 + $0x1e8] ss:$16 sps:$4 sm:$0xff]  }
 0x7a0   :  { %5916 = vst [vmem:[#allocation79_spill] sm:$0xff] %v5118_v22  ;;  %5917 = vst [vmem:[#allocation80_spill] sm:$0xff] %v5121_v24 }
 0x7a2   :  { %2252 = vmatpush1.bf16.msra.mxu0 %v5106_v25  ;;  %2293 = vmatpush1.bf16.msra.mxu1 %v5109_v26 }
 0x7a3   :  { %2253 = vmatprep.subr.bf16.mxu0 %v5112_v14  ;;  %2294 = vmatprep.subr.bf16.mxu1 %v5115_v21 }
 0x7a6   :  { %2254 = vmatpush1.bf16.msra.mxu0 %v5118_v22  ;;  %2295 = vmatpush1.bf16.msra.mxu1 %v5121_v24 }
 0x7a7   :  { %2339 = vmatprep.subr.bf16.mxu0 %v4854_v46  ;;  %2380 = vmatprep.subr.bf16.mxu1 %v4857_v59 }
 0x81c   :  { %v2025_v26 = vpop.f32.mrb[44].mxu0  ;;  %v2066_v25 = vpop.f32.mrb[44].mxu1 }
 0x81d   :  { %v2026_v14 = vadd.f32 %v2025_v26, %v5860_v27  ;;  %v2027_v19 = vpop.f32.mrb[45].mxu0  ;;  %v2068_v58 = vpop.f32.mrb[45].mxu1  ;;  %v2067_v59 = vadd.f32 %v2066_v25, %v5863_v13 }
 0x81e   :  { %v2028_v21 = vadd.f32 %v2027_v19, %v5861_v47  ;;  %v2029_v1 = vpop.f32.mrb[46].mxu0  ;;  %v2070_v54 = vpop.f32.mrb[46].mxu1  ;;  %v2069_v46 = vadd.f32 %v2068_v58, %v5862_v10  ;;  %v2101_v58 = vld [vmem:[#allocation6 + $0xc0] sm:$0xff]  ;;  %v2103_v10 = vld [vmem:[#allocation6 + $0xd0] sm:$0xff] }
 0x81f   :  { %v2828_v57 = vmul.f32 -1.442695, %v2026_v14  ;;  %v2030_v22 = vpop.f32.mrb[47].mxu0  ;;  %v2071_v12 = vpop.f32.mrb[47].mxu1 }
 0x820   :  { %v2829_v11 = vmul.f32 -1.442695, %v2028_v21  ;;  %v2830_v24 = vmul.f32 -1.442695, %v2069_v46  ;;  %v2102_v22 = vld [vmem:[#allocation6 + $0xc8] sm:$0xff] }
 0x821   :  { %3226 = vpow2.f32 %v2828_v57 }
 0x822   :  { %3228 = vpow2.f32 %v2829_v11 }
 0x823   :  { %3230 = vpow2.f32 %v2830_v24 }
 0x824   :  { %3232 = vtanh.f32 %v2067_v59 }
 0x82b   :  { %v3227_v9 = vpop.eup %3226 }
 0x82c   :  { %v3229_v8 = vpop.eup %3228  ;;  %v2077_v26 = vadd.f32 1.0, %v3227_v9 }
 0x82d   :  { %v2083_v27 = vadd.f32 1.0, %v3229_v8  ;;  %v3231_v54 = vpop.eup %3230 }
 0x82e   :  { %3234 = vrcp.f32 %v2077_v26  ;;  %v3233_v1 = vpop.eup %3232  ;;  %v2090_v57 = vadd.f32 1.0, %v3231_v54 }
 0x82f   :  { %3236 = vrcp.f32 %v2083_v27 }
 0x830   :  { %3238 = vrcp.f32 %v2090_v57 }
 0x838   :  { %v3235_v19 = vpop.eup %3234 }
 0x839   :  { %v3237_v12 = vpop.eup %3236  ;;  %v2094_v21 = vmul.f32 %v3235_v19, %v3233_v1 }
 0x83a   :  { %v2093_v11 = vmul.f32 %v3237_v12, %v4865_v18  ;;  %v2104_v18 = vld [vmem:[#allocation6 + $0xd8] sm:$0xff] }
 0x83c   :  { %v2141_v14 = vpop.f32.mrb[48].mxu0  ;;  %v2182_v25 = vpop.f32.mrb[48].mxu1  ;;  %v5131_v46 = vadd.f32 %v2094_v21, %v2093_v11 }
 0x83d   :  { %v2189_v9 = vadd.f32 %v2141_v14, %v2101_v58  ;;  %v2143_v24 = vpop.f32.mrb[49].mxu0  ;;  %v2184_v8 = vpop.f32.mrb[49].mxu1  ;;  %v2191_v58 = vadd.f32 %v2182_v25, %v2103_v10 }
 0x83e   :  { %v2190_v59 = vadd.f32 %v2143_v24, %v2102_v22  ;;  %v2145_v27 = vpop.f32.mrb[50].mxu0  ;;  %v2186_v26 = vpop.f32.mrb[50].mxu1  ;;  %3240 = vtanh.f32 %v5131_v46  ;;  %v2192_v12 = vadd.f32 %v2184_v8, %v2104_v18 }
 0x83f   :  { %v2831_v13 = vmul.f32 -1.442695, %v2189_v9  ;;  %v2146_v1 = vpop.f32.mrb[51].mxu0  ;;  %v2187_v54 = vpop.f32.mrb[51].mxu1 }
 0x840   :  { %v2832_v19 = vmul.f32 -1.442695, %v2190_v59  ;;  %v3239_v21 = vpop.eup %3238  ;;  %v2833_v57 = vmul.f32 -1.442695, %v2192_v12 }
 0x841   :  { %3242 = vpow2.f32 %v2831_v13 }
 0x842   :  { %3244 = vpow2.f32 %v2832_v19 }
 0x843   :  { %3246 = vpow2.f32 %v2833_v57  ;;  %v5962_v57 = vld [vmem:[#allocation72_spill] sm:$0xff] }
 0x844   :  { %3248 = vtanh.f32 %v2191_v58  ;;  %v5963_v58 = vld [vmem:[#allocation73_spill] sm:$0xff] }
 0x848   :  { %v3241_v11 = vpop.eup %3240 }
 0x849   :  { %v2097_v14 = vmul.f32 %v3241_v11, %v3239_v21  ;;  %v5960_v21 = vld [vmem:[#allocation70_spill] sm:$0xff]  ;;  %v5961_v11 = vld [vmem:[#allocation71_spill] sm:$0xff] }
 0x84b   :  { %v3243_v47 = vpop.eup %3242  ;;  %v2222_v22 = vpack.c.bf16 %v2097_v14, %v2097_v14  ;;  %v5964_v14 = vld [vmem:[#allocation74_spill] sm:$0xff] }
 0x84c   :  { %v3245_v24 = vpop.eup %3244  ;;  %v2197_v27 = vadd.f32 1.0, %v3243_v47 }
 0x84d   :  { %v2203_v9 = vadd.f32 1.0, %v3245_v24  ;;  %2255 = vmatprep.mubr.bf16.mxu0 %v2222_v22  ;;  %2296 = vmatprep.mubr.bf16.mxu1 %v2222_v22  ;;  %v3247_v13 = vpop.eup %3246  ;;  %v5965_v22 = vld [vmem:[#allocation29_spill] sm:$0xff]  ;;  %v5966_v24 = vld [vmem:[#allocation75_spill] sm:$0xff] }
 0x84e   :  { %3250 = vrcp.f32 %v2197_v27  ;;  %v3249_v59 = vpop.eup %3248  ;;  %v2210_v54 = vadd.f32 1.0, %v3247_v13  ;;  %v5967_v27 = vld [vmem:[#allocation76_spill] sm:$0xff]  ;;  %v5969_v13 = vld [vmem:[#allocation78_spill] sm:$0xff] }
 0x84f   :  { %3252 = vrcp.f32 %v2203_v9  ;;  %v5968_v9 = vld [vmem:[#allocation77_spill] sm:$0xff] }
 0x850   :  { %3254 = vrcp.f32 %v2210_v54  ;;  %v5972_v54 = vld [vmem:[#allocation25_spill] sm:$0xff] }
 0x858   :  { %v3251_v8 = vpop.eup %3250 }
 0x859   :  { %v3253_v26 = vpop.eup %3252  ;;  %v2214_v1 = vmul.f32 %v3251_v8, %v3249_v59  ;;  %v5970_v59 = vld [vmem:[#allocation79_spill] sm:$0xff]  ;;  %v5971_v8 = vld [vmem:[#allocation80_spill] sm:$0xff] }
 0x85a   :  { %v2213_v10 = vmul.f32 %v3253_v26, %v4869_v23  ;;  %v3255_v47 = vpop.eup %3254  ;;  %v5935_v23 = vld [vmem:[#allocation31_spill] sm:$0xff] }
 0x85c   :  { %v5135_v25 = vadd.f32 %v2214_v1, %v2213_v10 }
 0x85e   :  { %3256 = vtanh.f32 %v5135_v25 }
 0x868   :  { %v3257_v19 = vpop.eup %3256 }
 0x869   :  { %v2217_v18 = vmul.f32 %v3257_v19, %v3255_v47 }
 0x86b   :  { %v2221_v12 = vpack.c.bf16 %v2217_v18, %v2217_v18  ;;  %v5973_v18 = vld [vmem:[#allocation26_spill] sm:$0xff] }
 0x86d   :  { %2256 = vmatmul.mubr.bf16.vlgmr.msra.gmra.mrb[52].mxu0 %v2221_v12  ;;  %2297 = vmatmul.mubr.bf16.vlgmr.msra.gmra.mrb[52].mxu1 %v2221_v12 }
 0x86e   :  { %2340 = vmatpush1.bf16.msra.mxu0 %v4726_v42  ;;  %2381 = vmatpush1.bf16.msra.mxu1 %v4729_v44  ;;  %v5919_v42 = vld [vmem:[#allocation33_spill] sm:$0xff]  ;;  %v5920_v44 = vld [vmem:[#allocation34_spill] sm:$0xff] }
 0x86f   :  { %2341 = vmatprep.subr.bf16.mxu0 %v4732_v43  ;;  %2382 = vmatprep.subr.bf16.mxu1 %v4735_v40  ;;  %v5921_v43 = vld [vmem:[#allocation35_spill] sm:$0xff] }
 0x870   :  { %2371 = vmatprep.mubr.bf16.mxu0 %v5604_v49  ;;  %2412 = vmatprep.mubr.bf16.mxu1 %v5604_v49  ;;  %v5918_v49 = vld [vmem:[#allocation32_spill] sm:$0xff]  ;;  %v5922_v40 = vld [vmem:[#allocation23_spill] sm:$0xff] }
 0x872   :  { %2342 = vmatpush1.bf16.msra.mxu0 %v4740_v31  ;;  %2383 = vmatpush1.bf16.msra.mxu1 %v4743_v32  ;;  %v5923_v31 = vld [vmem:[#allocation24_spill] sm:$0xff] }
 0x873   :  { %2343 = vmatprep.subr.bf16.mxu0 %v4746_v35  ;;  %2384 = vmatprep.subr.bf16.mxu1 %v4749_v30  ;;  %v5924_v32 = vld [vmem:[#allocation36_spill] sm:$0xff]  ;;  %v5925_v35 = vld [vmem:[#allocation37_spill] sm:$0xff]  ;;  %v5926_v30 = vld [vmem:[#allocation38_spill] sm:$0xff] }
 0x876   :  { %2344 = vmatpush1.bf16.msra.mxu0 %v4752_v29  ;;  %2385 = vmatpush1.bf16.msra.mxu1 %v4755_v39  ;;  %v5927_v29 = vld [vmem:[#allocation39_spill] sm:$0xff]  ;;  %v5928_v39 = vld [vmem:[#allocation40_spill] sm:$0xff] }
 0x877   :  { %2345 = vmatprep.subr.bf16.mxu0 %v4758_v20  ;;  %2386 = vmatprep.subr.bf16.mxu1 %v4761_v33  ;;  %v5929_v20 = vld [vmem:[#allocation41_spill] sm:$0xff]  ;;  %v5930_v33 = vld [vmem:[#allocation42_spill] sm:$0xff] }
 0x87a   :  { %2346 = vmatpush1.bf16.msra.mxu0 %v4764_v41  ;;  %2387 = vmatpush1.bf16.msra.mxu1 %v4887_v4  ;;  %v5931_v41 = vld [vmem:[#allocation43_spill] sm:$0xff]  ;;  %v5936_v4 = vld [vmem:[#allocation46_spill] sm:$0xff] }
 0x87b   :  { %2347 = vmatprep.subr.bf16.mxu0 %v4768_v37  ;;  %2388 = vmatprep.subr.bf16.mxu1 %v4891_v52  ;;  %v5932_v37 = vld [vmem:[#allocation44_spill] sm:$0xff]  ;;  %v5937_v52 = vld [vmem:[#allocation47_spill] sm:$0xff] }
 0x87e   :  { %2348 = vmatpush1.bf16.msra.mxu0 %v4772_v60  ;;  %2389 = vmatpush1.bf16.msra.mxu1 %v4895_v51  ;;  %v5933_v60 = vld [vmem:[#allocation45_spill] sm:$0xff]  ;;  %v5938_v51 = vld [vmem:[#allocation48_spill] sm:$0xff] }
 0x87f   :  { %2349 = vmatprep.subr.bf16.mxu0 %v4776_v38  ;;  %2390 = vmatprep.subr.bf16.mxu1 %v4899_v61  ;;  %v5934_v38 = vld [vmem:[#allocation30_spill] sm:$0xff]  ;;  %v5939_v61 = vld [vmem:[#allocation49_spill] sm:$0xff] }
 0x882   :  { %2350 = vmatpush1.bf16.msra.mxu0 %v4902_v6  ;;  %2391 = vmatpush1.bf16.msra.mxu1 %v4905_v53  ;;  %v5940_v6 = vld [vmem:[#allocation50_spill] sm:$0xff]  ;;  %v5941_v53 = vld [vmem:[#allocation51_spill] sm:$0xff] }
 0x883   :  { %2351 = vmatprep.subr.bf16.mxu0 %v4908_v62  ;;  %2392 = vmatprep.subr.bf16.mxu1 %v4911_v50  ;;  %v5942_v62 = vld [vmem:[#allocation52_spill] sm:$0xff]  ;;  %v5943_v50 = vld [vmem:[#allocation53_spill] sm:$0xff] }
 0x886   :  { %2352 = vmatpush1.bf16.msra.mxu0 %v4914_v56  ;;  %2393 = vmatpush1.bf16.msra.mxu1 %v4917_v0  ;;  %v5944_v56 = vld [vmem:[#allocation54_spill] sm:$0xff]  ;;  %v5945_v0 = vld [vmem:[#allocation55_spill] sm:$0xff] }
 0x887   :  { %2353 = vmatprep.subr.bf16.mxu0 %v4920_v15  ;;  %2394 = vmatprep.subr.bf16.mxu1 %v4923_v16  ;;  %v5946_v15 = vld [vmem:[#allocation56_spill] sm:$0xff]  ;;  %v5947_v16 = vld [vmem:[#allocation57_spill] sm:$0xff] }
 0x88a   :  { %2354 = vmatpush1.bf16.msra.mxu0 %v4926_v55  ;;  %2395 = vmatpush1.bf16.msra.mxu1 %v4929_v34  ;;  %v5948_v55 = vld [vmem:[#allocation58_spill] sm:$0xff]  ;;  %v5949_v34 = vld [vmem:[#allocation59_spill] sm:$0xff] }
 0x88b   :  { %2455 = vmatprep.subr.bf16.mxu0 %v4932_v63  ;;  %2496 = vmatprep.subr.bf16.mxu1 %v4935_v28  ;;  %v5950_v63 = vld [vmem:[#allocation60_spill] sm:$0xff]  ;;  %v5951_v28 = vld [vmem:[#allocation61_spill] sm:$0xff] }
 0x88d   :  { %2372 = vmatmul.mubr.bf16.vlgmr.msra.gmra.mrb[56].mxu0 %v2221_v12  ;;  %2413 = vmatmul.mubr.bf16.vlgmr.msra.gmra.mrb[56].mxu1 %v2221_v12 }
 0x88e   :  { %2456 = vmatpush1.bf16.msra.mxu0 %v4938_v45  ;;  %2497 = vmatpush1.bf16.msra.mxu1 %v4941_v36  ;;  %v5952_v45 = vld [vmem:[#allocation62_spill] sm:$0xff]  ;;  %v5953_v36 = vld [vmem:[#allocation63_spill] sm:$0xff] }
 0x88f   :  { %2457 = vmatprep.subr.bf16.mxu0 %v4944_v17  ;;  %2498 = vmatprep.subr.bf16.mxu1 %v4947_v48  ;;  %v5954_v17 = vld [vmem:[#allocation64_spill] sm:$0xff]  ;;  %v5955_v48 = vld [vmem:[#allocation65_spill] sm:$0xff] }
 0x892   :  { %2458 = vmatpush1.bf16.msra.mxu0 %v4950_v2  ;;  %2499 = vmatpush1.bf16.msra.mxu1 %v4953_v3  ;;  %v5956_v2 = vld [vmem:[#allocation66_spill] sm:$0xff]  ;;  %v5957_v3 = vld [vmem:[#allocation67_spill] sm:$0xff] }
 0x893   :  { %2459 = vmatprep.subr.bf16.mxu0 %v4956_v5  ;;  %2500 = vmatprep.subr.bf16.mxu1 %v4959_v7  ;;  %v5958_v5 = vld [vmem:[#allocation68_spill] sm:$0xff]  ;;  %v5959_v7 = vld [vmem:[#allocation69_spill] sm:$0xff] }
 0x896   :  { %2460 = vmatpush1.bf16.msra.mxu0 %v5918_v49  ;;  %2501 = vmatpush1.bf16.msra.mxu1 %v5919_v42 }
 0x897   :  { %2461 = vmatprep.subr.bf16.mxu0 %v5920_v44  ;;  %2502 = vmatprep.subr.bf16.mxu1 %v5921_v43 }
 0x89a   :  { %2462 = vmatpush1.bf16.msra.mxu0 %v5922_v40  ;;  %2503 = vmatpush1.bf16.msra.mxu1 %v5923_v31 }
 0x89b   :  { %2463 = vmatprep.subr.bf16.mxu0 %v5924_v32  ;;  %2504 = vmatprep.subr.bf16.mxu1 %v5925_v35  ;;  %v5974_v32 = vld [vmem:[#allocation27_spill] sm:$0xff] }
 0x89e   :  { %2464 = vmatpush1.bf16.msra.mxu0 %v5926_v30  ;;  %2505 = vmatpush1.bf16.msra.mxu1 %v5927_v29  ;;  %v5975_v29 = vld [vmem:[#allocation28_spill] sm:$0xff] }
 0x89f   :  { %2465 = vmatprep.subr.bf16.mxu0 %v5928_v39  ;;  %2506 = vmatprep.subr.bf16.mxu1 %v5929_v20 }
 0x8a2   :  { %2466 = vmatpush1.bf16.msra.mxu0 %v5930_v33  ;;  %2507 = vmatpush1.bf16.msra.mxu1 %v5931_v41 }
 0x8a3   :  { %2467 = vmatprep.subr.bf16.mxu0 %v5932_v37  ;;  %2508 = vmatprep.subr.bf16.mxu1 %v5933_v60 }
 0x8a6   :  { %2468 = vmatpush1.bf16.msra.mxu0 %v5934_v38  ;;  %2509 = vmatpush1.bf16.msra.mxu1 %v5935_v23 }
 0x8a7   :  { %2469 = vmatprep.subr.bf16.mxu0 %v5936_v4  ;;  %2510 = vmatprep.subr.bf16.mxu1 %v5937_v52 }
 0x8aa   :  { %2470 = vmatpush1.bf16.msra.mxu0 %v5938_v51  ;;  %2511 = vmatpush1.bf16.msra.mxu1 %v5939_v61 }
 0x8ab   :  { %2471 = vmatprep.subr.bf16.mxu0 %v5940_v6  ;;  %2512 = vmatprep.subr.bf16.mxu1 %v5941_v53  ;;  %v2333_v6 = vld [vmem:[#allocation6 + $0xe0] sm:$0xff]  ;;  %v2334_v53 = vld [vmem:[#allocation6 + $0xe8] sm:$0xff] }
 0x8ae   :  { %2472 = vmatpush1.bf16.msra.mxu0 %v5942_v62  ;;  %2513 = vmatpush1.bf16.msra.mxu1 %v5943_v50 }
 0x8af   :  { %2473 = vmatprep.subr.bf16.mxu0 %v5944_v56  ;;  %2514 = vmatprep.subr.bf16.mxu1 %v5945_v0 }
 0x8b2   :  { %2474 = vmatpush1.bf16.msra.mxu0 %v5946_v15  ;;  %2515 = vmatpush1.bf16.msra.mxu1 %v5947_v16 }
 0x8b3   :  { %2475 = vmatprep.subr.bf16.mxu0 %v5948_v55  ;;  %2516 = vmatprep.subr.bf16.mxu1 %v5949_v34 }
 0x8b6   :  { %2476 = vmatpush1.bf16.msra.mxu0 %v5950_v63  ;;  %2517 = vmatpush1.bf16.msra.mxu1 %v5951_v28 }
 0x8b7   :  { %2477 = vmatprep.subr.bf16.mxu0 %v5952_v45  ;;  %2518 = vmatprep.subr.bf16.mxu1 %v5953_v36 }
 0x8ba   :  { %2478 = vmatpush1.bf16.msra.mxu0 %v5954_v17  ;;  %2519 = vmatpush1.bf16.msra.mxu1 %v5955_v48 }
 0x8bb   :  { %2479 = vmatprep.subr.bf16.mxu0 %v5956_v2  ;;  %2520 = vmatprep.subr.bf16.mxu1 %v5957_v3  ;;  %v2335_v2 = vld [vmem:[#allocation6 + $0xf0] sm:$0xff] }
 0x8be   :  { %2480 = vmatpush1.bf16.msra.mxu0 %v5958_v5  ;;  %2521 = vmatpush1.bf16.msra.mxu1 %v5959_v7 }
 0x8bf   :  { %2481 = vmatprep.subr.bf16.mxu0 %v5960_v21  ;;  %2522 = vmatprep.subr.bf16.mxu1 %v5961_v11 }
 0x8c2   :  { %2482 = vmatpush1.bf16.msra.mxu0 %v5962_v57  ;;  %2523 = vmatpush1.bf16.msra.mxu1 %v5963_v58 }
 0x8c3   :  { %2483 = vmatprep.subr.bf16.mxu0 %v5964_v14  ;;  %2524 = vmatprep.subr.bf16.mxu1 %v5965_v22 }
 0x8c6   :  { %2484 = vmatpush1.bf16.msra.mxu0 %v5966_v24  ;;  %2525 = vmatpush1.bf16.msra.mxu1 %v5967_v27 }
 0x8c7   :  { %2485 = vmatprep.subr.bf16.mxu0 %v5968_v9  ;;  %2526 = vmatprep.subr.bf16.mxu1 %v5969_v13 }
 0x8ca   :  { %2486 = vmatpush1.bf16.msra.mxu0 %v5970_v59  ;;  %2527 = vmatpush1.bf16.msra.mxu1 %v5971_v8 }
 0x940   :  { %v2257_v26 = vpop.f32.mrb[52].mxu0  ;;  %v2298_v1 = vpop.f32.mrb[52].mxu1 }
 0x941   :  { %v2258_v10 = vadd.f32 %v2257_v26, %v5972_v54  ;;  %v2259_v47 = vpop.f32.mrb[53].mxu0  ;;  %v2300_v19 = vpop.f32.mrb[53].mxu1  ;;  %v2299_v39 = vadd.f32 %v2298_v1, %v5975_v29 }
 0x942   :  { %v2260_v12 = vadd.f32 %v2259_v47, %v5973_v18  ;;  %v2261_v49 = vpop.f32.mrb[54].mxu0  ;;  %v2302_v42 = vpop.f32.mrb[54].mxu1  ;;  %v2301_v35 = vadd.f32 %v2300_v19, %v5974_v32 }
 0x943   :  { %v2834_v44 = vmul.f32 -1.442695, %v2258_v10  ;;  %v2262_v43 = vpop.f32.mrb[55].mxu0  ;;  %v2303_v40 = vpop.f32.mrb[55].mxu1  ;;  %v3042_v42 = vld [vmem:[#allocation14] sm:$0xff]  }
 0x944   :  { %v2835_v31 = vmul.f32 -1.442695, %v2260_v12  ;;  %v2836_v30 = vmul.f32 -1.442695, %v2301_v35  ;;  %v3043_v43 = vld [vmem:[#allocation14 + $0x8] sm:$0xff]   ;;  %v3044_v40 = vld [vmem:[#allocation14 + $0x10] sm:$0xff]  }
 0x945   :  { %3258 = vpow2.f32 %v2834_v44  ;;  %v3676_v44 = vmov 0.0   ;;  %v3047_v35 = vld [vmem:[#allocation14 + $0x28] sm:$0xff]  }
 0x946   :  { %3260 = vpow2.f32 %v2835_v31  ;;  %2861 = vmatprep.subr.bf16.mxu0 %v3676_v44  ;;  %v3046_v31 = vld [vmem:[#allocation14 + $0x20] sm:$0xff]  }
 0x947   :  { %3262 = vpow2.f32 %v2836_v30  ;;  %v3048_v30 = vld [vmem:[#allocation14 + $0x30] sm:$0xff]  }
 0x948   :  { %3264 = vtanh.f32 %v2299_v39  ;;  %v3049_v39 = vld [vmem:[#allocation14 + $0x38] sm:$0xff]  }
 0x94f   :  { %v3259_v20 = vpop.eup %3258 }
 0x950   :  { %v3261_v33 = vpop.eup %3260  ;;  %v2309_v41 = vadd.f32 1.0, %v3259_v20 }
 0x951   :  { %v2315_v37 = vadd.f32 1.0, %v3261_v33  ;;  %v3263_v60 = vpop.eup %3262 }
 0x952   :  { %3266 = vrcp.f32 %v2309_v41  ;;  %v3265_v38 = vpop.eup %3264  ;;  %v2322_v51 = vadd.f32 1.0, %v3263_v60 }
 0x953   :  { %3268 = vrcp.f32 %v2315_v37 }
 0x954   :  { %3270 = vrcp.f32 %v2322_v51 }
 0x95c   :  { %v3267_v23 = vpop.eup %3266 }
 0x95d   :  { %v3269_v4 = vpop.eup %3268  ;;  %v2326_v52 = vmul.f32 %v3267_v23, %v3265_v38 }
 0x95e   :  { %v2325_v61 = vmul.f32 %v3269_v4, %v5131_v46  ;;  %v2336_v46 = vld [vmem:[#allocation6 + $0xf8] sm:$0xff]  ;;  %v3271_v3 = vpop.eup %3270 }
 0x960   :  { %v2373_v62 = vpop.f32.mrb[56].mxu0  ;;  %v2414_v50 = vpop.f32.mrb[56].mxu1  ;;  %v5239_v56 = vadd.f32 %v2326_v52, %v2325_v61 }
 0x961   :  { %v2421_v0 = vadd.f32 %v2373_v62, %v2333_v6  ;;  %v2375_v15 = vpop.f32.mrb[57].mxu0  ;;  %v2416_v16 = vpop.f32.mrb[57].mxu1  ;;  %v2423_v21 = vadd.f32 %v2414_v50, %v2335_v2  ;;  %v2843_v2 = vld [vmem:[#allocation15] ss:$0 sm:$0xff] }
 0x962   :  { %v2422_v55 = vadd.f32 %v2375_v15, %v2334_v53  ;;  %v2377_v34 = vpop.f32.mrb[58].mxu0  ;;  %v2418_v63 = vpop.f32.mrb[58].mxu1  ;;  %3272 = vtanh.f32 %v5239_v56  ;;  %v2424_v48 = vadd.f32 %v2416_v16, %v2336_v46 }
 0x963   :  { %v2837_v28 = vmul.f32 -1.442695, %v2421_v0  ;;  %v2378_v45 = vpop.f32.mrb[59].mxu0  ;;  %v2419_v36 = vpop.f32.mrb[59].mxu1 }
 0x964   :  { %v2838_v17 = vmul.f32 -1.442695, %v2422_v55  ;;  %v2839_v7 = vmul.f32 -1.442695, %v2424_v48 }
 0x965   :  { %3274 = vpow2.f32 %v2837_v28 }
 0x966   :  { %3276 = vpow2.f32 %v2838_v17 }
 0x967   :  { %3278 = vpow2.f32 %v2839_v7 }
 0x968   :  { %3280 = vtanh.f32 %v2423_v21 }
 0x96c   :  { %v3273_v5 = vpop.eup %3272 }
 0x96d   :  { %v2329_v11 = vmul.f32 %v3273_v5, %v3271_v3 }
 0x96f   :  { %v3275_v57 = vpop.eup %3274  ;;  %v2454_v58 = vpack.c.bf16 %v2329_v11, %v2329_v11 }
 0x970   :  { %v3277_v14 = vpop.eup %3276  ;;  %v2429_v22 = vadd.f32 1.0, %v3275_v57 }
 0x971   :  { %v2435_v24 = vadd.f32 1.0, %v3277_v14  ;;  %2487 = vmatprep.mubr.bf16.mxu0 %v2454_v58  ;;  %2528 = vmatprep.mubr.bf16.mxu1 %v2454_v58  ;;  %v3279_v27 = vpop.eup %3278 }
 0x972   :  { %3282 = vrcp.f32 %v2429_v22  ;;  %v3281_v9 = vpop.eup %3280  ;;  %v2442_v26 = vadd.f32 1.0, %v3279_v27 }
 0x973   :  { %3284 = vrcp.f32 %v2435_v24 }
 0x974   :  { %3286 = vrcp.f32 %v2442_v26 }
 0x97c   :  { %v3283_v13 = vpop.eup %3282 }
 0x97d   :  { %v3285_v59 = vpop.eup %3284  ;;  %v2446_v8 = vmul.f32 %v3283_v13, %v3281_v9 }
 0x97e   :  { %v2445_v1 = vmul.f32 %v3285_v59, %v5135_v25  ;;  %v3287_v47 = vpop.eup %3286  ;;  %v3045_v25 = vld [vmem:[#allocation14 + $0x18] sm:$0xff]  }
 0x980   :  { %v2447_v10 = vadd.f32 %v2446_v8, %v2445_v1 }
 0x982   :  { %3288 = vtanh.f32 %v2447_v10 }
 0x98c   :  { %v3289_v19 = vpop.eup %3288 }
 0x98d   :  { %v2449_v12 = vmul.f32 %v3289_v19, %v3287_v47 }
 0x98f   :  { %v2453_v49 = vpack.c.bf16 %v2449_v12, %v2449_v12 }
 0x991   :  { %2488 = vmatmul.mubr.bf16.vlgmr.msra.gmra.mrb[60].mxu0 %v2453_v49  ;;  %2529 = vmatmul.mubr.bf16.vlgmr.msra.gmra.mrb[60].mxu1 %v2453_v49 }
 0x992   :  { %2862 = vmatpush3.bf16.msra.mxu0 %v3042_v42  ;;  %2877 = vmatprep.mubr.msk.bf16.mxu0 %vm3677_vm0, %v3676_v44 }
 0x993   :  { %2863 = vmatprep.subr.bf16.mxu0 %v3676_v44 }
 0x996   :  { %2864 = vmatpush3.bf16.msra.mxu0 %v3043_v43 }
 0x997   :  { %2865 = vmatprep.subr.bf16.mxu0 %v3676_v44 }
 0x99a   :  { %2866 = vmatpush3.bf16.msra.mxu0 %v3044_v40 }
 0x99b   :  { %2867 = vmatprep.subr.bf16.mxu0 %v3676_v44 }
 0x99e   :  { %2868 = vmatpush3.bf16.msra.mxu0 %v3045_v25 }
 0x99f   :  { %2869 = vmatprep.subr.bf16.mxu0 %v3676_v44 }
 0x9a2   :  { %2870 = vmatpush3.bf16.msra.mxu0 %v3046_v31 }
 0x9a3   :  { %2871 = vmatprep.subr.bf16.mxu0 %v3676_v44 }
 0x9a6   :  { %2872 = vmatpush3.bf16.msra.mxu0 %v3047_v35 }
 0x9a7   :  { %2873 = vmatprep.subr.bf16.mxu0 %v3676_v44 }
 0x9aa   :  { %2874 = vmatpush3.bf16.msra.mxu0 %v3048_v30 }
 0x9ab   :  { %2875 = vmatprep.subr.bf16.mxu0 %v3676_v44 }
 0x9ae   :  { %2876 = vmatpush3.bf16.msra.mxu0 %v3049_v39 }
 0xa64   :  { %v2489_v20 = vpop.f32.mrb[60].mxu0  ;;  %v2530_v33 = vpop.f32.mrb[60].mxu1 }
 0xa65   :  { %v2490_v41 = vadd.f32 %v2489_v20, %v5972_v54  ;;  %v2491_v37 = vpop.f32.mrb[61].mxu0  ;;  %v2532_v60 = vpop.f32.mrb[61].mxu1  ;;  %v2531_v50 = vadd.f32 %v2530_v33, %v5975_v29 }
 0xa66   :  { %v2492_v38 = vadd.f32 %v2491_v37, %v5973_v18  ;;  %v2493_v23 = vpop.f32.mrb[62].mxu0  ;;  %v2534_v4 = vpop.f32.mrb[62].mxu1  ;;  %v2533_v53 = vadd.f32 %v2532_v60, %v5974_v32 }
 0xa67   :  { %v2840_v52 = vmul.f32 -1.442695, %v2490_v41  ;;  %v2494_v51 = vpop.f32.mrb[63].mxu0  ;;  %v2535_v61 = vpop.f32.mrb[63].mxu1 }
 0xa68   :  { %v2841_v6 = vmul.f32 -1.442695, %v2492_v38  ;;  %v2842_v62 = vmul.f32 -1.442695, %v2533_v53 }
 0xa69   :  { %3290 = vpow2.f32 %v2840_v52 }
 0xa6a   :  { %3292 = vpow2.f32 %v2841_v6 }
 0xa6b   :  { %3294 = vpow2.f32 %v2842_v62 }
 0xa6c   :  { %3296 = vtanh.f32 %v2531_v50 }
 0xa73   :  { %v3291_v0 = vpop.eup %3290 }
 0xa74   :  { %v3293_v15 = vpop.eup %3292  ;;  %v2541_v54 = vadd.f32 1.0, %v3291_v0 }
 0xa75   :  { %v2547_v16 = vadd.f32 1.0, %v3293_v15  ;;  %v3295_v18 = vpop.eup %3294 }
 0xa76   :  { %3298 = vrcp.f32 %v2541_v54  ;;  %v3297_v55 = vpop.eup %3296  ;;  %v2554_v45 = vadd.f32 1.0, %v3295_v18 }
 0xa77   :  { %3300 = vrcp.f32 %v2547_v16 }
 0xa78   :  { %3302 = vrcp.f32 %v2554_v45 }
 0xa80   :  { %v3299_v34 = vpop.eup %3298 }
 0xa81   :  { %v3301_v63 = vpop.eup %3300  ;;  %v2558_v28 = vmul.f32 %v3299_v34, %v3297_v55 }
 0xa82   :  { %v2557_v36 = vmul.f32 %v3301_v63, %v5239_v56  ;;  %v3303_v29 = vpop.eup %3302 }
 0xa84   :  { %v2559_v32 = vadd.f32 %v2558_v28, %v2557_v36 }
 0xa86   :  { %3304 = vtanh.f32 %v2559_v32 }
 0xa90   :  { %v3305_v17 = vpop.eup %3304 }
 0xa91   :  { %v2561_v46 = vmul.f32 %v3305_v17, %v3303_v29 }
 0xa93   :  { %v2568_v48 = vpack.c.bf16 %v2561_v46, %v2561_v46 }
 0xa95   :  { %2878 = vmatmul.mubr.bf16.vlgmr.msra.gmra.mrb[64].mxu0 %v2568_v48 }
 0xb68   :  { %v2674_v3 = vpop.f32.mrb[64].mxu0 }
 0xb69   :  { %v2675_v5 = vadd.f32 %v2843_v2, %v2674_v3  ;;  %v2879_v7 = vpop.f32.mrb[65].mxu0 }
 0xb6a   :  { %v2677_v21 = vpop.f32.mrb[66].mxu0 }
 0xb6b   :  { %2680 = vst [vmem:[#allocation17] sm:$0xff] %v2675_v5  ;;  %v2880_v11 = vpop.f32.mrb[67].mxu0 }
 0xb6c   :  { %3641 = shalt.err (!%p3638_p10)
}
 0xb6d   :  { %s3642_s25 = scalar_lea.hbm %s5266_s6, 128 }
 0xb6e   :  { %p3643_p11 = scmp.ne.s32.totalorder %s5266_s6, %s3642_s25  ;;  %p3646_p12 = scmp.lt.u32.totalorder %s3642_s25, %s5266_s6 }
 0xb70   :  { %p3648_p13 = pnand %p3646_p12, %p3643_p11 }
 0xb72   :  { %3651 = shalt.err (!%p3648_p13)
}
 0xb73   :  { %2690 = dma.vmem_to_hbm [thread:$0]  %s2688_s23, 128, %s5266_s6, [#allocation8]  }
 0xb74   :  { %3660 = dma.done.wait [#allocation8], 128  }
 0xb75   :  { %3661 = vsyncadd [#allocation8], 4294967168 }
 0xb76   :  { %2694 = vsyncpa [#allocation7], 1 }
 0xb77   :  { %2695 = vsyncpa [#allocation10], 1 }
 0xb78   :  { %2696 = vsyncpa [#allocation13], 1 }
 0xb79   :  { %2697 = vsyncpa [#allocation16], 1 }
 0xb7a   :  { %2698 = vsyncpa [#allocation8], 1 }

</bundles_post_ra>
